<compile_context>
chip_gen: v7x
topology: tpu7x:2x2x1
jax: 0.10.0
libtpu: 0.0.40
codegen_flags: <defaults>
</compile_context>

<pallas_src>
import functools

import jax
import jax.numpy as jnp
from jax.experimental import pallas as pl
from jax.experimental.pallas import tpu as pltpu


def _round_up(x, m):
    return (x + m - 1) // m * m


# ---------------------------------------------------------------------------
# Pallas kernel: fused matmul + per-channel affine + activation (+ residual)
# ---------------------------------------------------------------------------
def _fused_matmul_kernel(*refs, act, order, has_residual):
    if has_residual:
        x_ref, w_ref, scale_ref, shift_ref, r_ref, o_ref = refs
    else:
        x_ref, w_ref, scale_ref, shift_ref, o_ref = refs
        r_ref = None

    # bf16 x bf16 -> f32 accumulation on the MXU.
    y = jnp.dot(x_ref[...], w_ref[...], preferred_element_type=jnp.float32)

    def _act(v):
        if act == "relu":
            return jnp.maximum(v, 0.0)
        if act == "lrelu":
            return jnp.where(v >= 0.0, v, 0.2 * v)
        if act == "tanh":
            return jnp.tanh(v)
        return v

    scale = scale_ref[...]
    shift = shift_ref[...]
    if order == "affine_act":      # conv -> BN/bias -> activation
        y = _act(y * scale + shift)
    else:                          # conv -> activation -> BN  ("act_affine")
        y = _act(y) * scale + shift
    if r_ref is not None:          # fused residual skip-add
        y = y + r_ref[...]
    o_ref[...] = y.astype(o_ref.dtype)


def _pick_tm(M, tm_max=512):
    if M <= 256:
        return _round_up(M, 8)
    # >= 2 grid steps so v7x megacore has work for both TensorCores.
    return min(tm_max, _round_up((M + 1) // 2, 8))


def fused_matmul(patches, w, scale, shift, *, act, order, residual=None):
    """patches: (M, K), w: (K, N), scale/shift: (N,), residual: (M, N)|None."""
    M, K = patches.shape
    _, N = w.shape
    tm = _pick_tm(M)
    Mp = _round_up(M, tm)

    x = patches.astype(jnp.bfloat16)
    if Mp != M:
        x = jnp.pad(x, ((0, Mp - M), (0, 0)))
    wp = w.astype(jnp.bfloat16)
    sp = scale.astype(jnp.float32).reshape(1, N)
    bp = shift.astype(jnp.float32).reshape(1, N)

    inputs = [x, wp, sp, bp]
    in_specs = [
        pl.BlockSpec((tm, K), lambda i: (i, 0)),
        # Weight / scale / shift stay resident across the M grid.
        # TODO(synk): pl.Buffered(1) single-buffering of these constant blocks
        #             would halve their VMEM footprint; not needed at these sizes.
        pl.BlockSpec((K, N), lambda i: (0, 0)),
        pl.BlockSpec((1, N), lambda i: (0, 0)),
        pl.BlockSpec((1, N), lambda i: (0, 0)),
    ]
    if residual is not None:
        r = residual.astype(jnp.float32)
        if Mp != M:
            r = jnp.pad(r, ((0, Mp - M), (0, 0)))
        inputs.append(r)
        in_specs.append(pl.BlockSpec((tm, N), lambda i: (i, 0)))

    # Explicit VMEM budget (double-buffered blocks + slack), clamped so it is
    # always safe on v7x's 64 MiB physical VMEM.
    vmem_need = 2 * tm * K * 2 + 2 * K * N * 2 + 2 * tm * N * 4 + 4 * 8 * 128 * 4
    if residual is not None:
        vmem_need += 2 * tm * N * 4
    vmem_limit = int(min(48 * 2**20, max(32 * 2**20, 3 * vmem_need)))

    bytes_accessed = Mp * K * 2 + K * N * 2 + Mp * N * 4 + 2 * N * 4
    if residual is not None:
        bytes_accessed += Mp * N * 4

    out = pl.pallas_call(
        functools.partial(_fused_matmul_kernel, act=act, order=order,
                          has_residual=residual is not None),
        out_shape=jax.ShapeDtypeStruct((Mp, N), jnp.float32),
        grid_spec=pltpu.PrefetchScalarGridSpec(
            num_scalar_prefetch=0,
            grid=(Mp // tm,),
            in_specs=in_specs,
            out_specs=pl.BlockSpec((tm, N), lambda i: (i, 0)),
        ),
        compiler_params=pltpu.CompilerParams(
            dimension_semantics=("parallel",),
            vmem_limit_bytes=vmem_limit,
        ),
        cost_estimate=pl.CostEstimate(
            flops=2 * Mp * K * N,
            transcendentals=(Mp * N if act == "tanh" else 0),
            bytes_accessed=bytes_accessed,
        ),
    )(*inputs)
    return out if Mp == M else out[:M]


# ---------------------------------------------------------------------------
# JAX-side glue: padding, im2col (bf16), 4-phase conv-transpose
# ---------------------------------------------------------------------------
def _im2col(x_nhwc, kh, kw, stride):
    """x already spatially padded. Returns (M, kh*kw*C) and output dims."""
    N, H, W, C = x_nhwc.shape
    Ho = (H - kh) // stride + 1
    Wo = (W - kw) // stride + 1
    cols = []
    for i in range(kh):
        for j in range(kw):
            cols.append(x_nhwc[:, i:i + stride * Ho:stride, j:j + stride * Wo:stride, :])
    patches = jnp.stack(cols, axis=-2)                 # (N, Ho, Wo, kh*kw, C)
    return patches.reshape(N * Ho * Wo, kh * kw * C), (N, Ho, Wo)


# TODO(synk): im2col patches are still materialized in HBM by XLA glue; an
#             in-kernel halo-window gather (manual DMA per output-row tile)
#             would remove the kh*kw read amplification entirely.
def conv2d_fused(x_nhwc, w_oihw, scale, shift, *, stride, pad, pad_mode,
                 act, order, residual=None):
    Cout, Cin, kh, kw = w_oihw.shape
    x = x_nhwc.astype(jnp.bfloat16)            # bf16 operands, half the patch traffic
    xpad = jnp.pad(x, ((0, 0), (pad, pad), (pad, pad), (0, 0)), mode=pad_mode)
    patches, (N, Ho, Wo) = _im2col(xpad, kh, kw, stride)
    wmat = jnp.transpose(w_oihw, (2, 3, 1, 0)).reshape(kh * kw * Cin, Cout)
    res2d = None if residual is None else residual.reshape(N * Ho * Wo, Cout)
    y = fused_matmul(patches, wmat, scale, shift, act=act, order=order,
                     residual=res2d)
    return y.reshape(N, Ho, Wo, Cout)


def conv_transpose2d_fused(x_nhwc, w_iohw, scale, shift, *, act, order):
    """ConvTranspose2d(k=3, stride=2, padding=1, output_padding=1, zeros) via
    the 4-phase (sub-pixel) decomposition: one fused matmul over the
    un-dilated input produces all four output parities, then interleave."""
    Cin, Cout, kh, kw = w_iohw.shape
    assert (kh, kw) == (3, 3), "only the 3x3/stride-2 deconv used by ResGenerator"
    N, H, W, _ = x_nhwc.shape

    x = x_nhwc.astype(jnp.bfloat16)
    xp = jnp.pad(x, ((0, 0), (0, 1), (0, 1), (0, 0)))       # zero halo bottom/right
    t0 = xp[:, :H, :W, :]             # x[iy,   ix  ]
    t1 = xp[:, :H, 1:W + 1, :]        # x[iy,   ix+1]
    t2 = xp[:, 1:H + 1, :W, :]        # x[iy+1, ix  ]
    t3 = xp[:, 1:H + 1, 1:W + 1, :]   # x[iy+1, ix+1]
    patches = jnp.concatenate([t0, t1, t2, t3], axis=-1).reshape(N * H * W, 4 * Cin)

    w = w_iohw                                   # (Cin, Cout, ky, kx)
    zero = jnp.zeros((Cin, Cout), w.dtype)

    def phase_w(taps):                           # one (Cin,Cout) block per t0..t3
        return jnp.concatenate(taps, axis=0)     # (4*Cin, Cout)

    # output parity (ry, rx): out[2iy+ry, 2ix+rx]
    w00 = phase_w([w[:, :, 1, 1], zero,          zero,          zero])
    w01 = phase_w([w[:, :, 1, 2], w[:, :, 1, 0], zero,          zero])
    w10 = phase_w([w[:, :, 2, 1], zero,          w[:, :, 0, 1], zero])
    w11 = phase_w([w[:, :, 2, 2], w[:, :, 2, 0], w[:, :, 0, 2], w[:, :, 0, 0]])
    wmat = jnp.concatenate([w00, w01, w10, w11], axis=1)     # (4*Cin, 4*Cout)

    y = fused_matmul(patches, wmat, jnp.tile(scale, 4), jnp.tile(shift, 4),
                     act=act, order=order)                   # (M, 4*Cout)
    y = y.reshape(N, H, W, 2, 2, Cout)                       # [..., ry, rx, c]
    y = jnp.transpose(y, (0, 1, 3, 2, 4, 5)).reshape(N, 2 * H, 2 * W, Cout)
    return y


def _fold_bn(gamma, beta, eps=1e-5):
    # eval-mode BN with freshly-initialized running stats (mean=0, var=1)
    scale = gamma / jnp.sqrt(1.0 + eps)
    shift = beta
    return scale, shift


# ---------------------------------------------------------------------------
# Parameter construction (deterministic, synthetic)
# ---------------------------------------------------------------------------
def init_params(key, channels):
    n_res = 6
    ch_num = len(channels)

    def nrm(k, shape, fan_in):
        return jax.random.normal(k, shape, jnp.float32) / jnp.sqrt(float(fan_in))

    def bn(k, c):
        k1, k2 = jax.random.split(k)
        return {"gamma": 1.0 + 0.1 * jax.random.normal(k1, (c,), jnp.float32),
                "beta": 0.1 * jax.random.normal(k2, (c,), jnp.float32)}

    keys = jax.random.split(key, 64)
    ki = iter(keys)
    params = {}

    c0 = channels[0]
    params["conv1"] = {"w": nrm(next(ki), (c0, 3, 7, 7), 3 * 49), **bn(next(ki), c0)}

    params["down"] = []
    for i in range(ch_num - 1):
        ci, co = channels[i], channels[i + 1]
        params["down"].append({"w": nrm(next(ki), (co, ci, 3, 3), ci * 9),
                               **bn(next(ki), co)})

    cl = channels[-1]
    params["res"] = []
    for _ in range(n_res):
        params["res"].append({"w": nrm(next(ki), (cl, cl, 3, 3), cl * 9),
                              **bn(next(ki), cl)})

    params["up"] = []
    for i in range(ch_num - 1):
        k = ch_num - i - 2
        ci, co = channels[k + 1], channels[k]   # ConvTranspose weight is (in, out, kh, kw)
        params["up"].append({"w": nrm(next(ki), (ci, co, 3, 3), ci * 9),
                             **bn(next(ki), co)})

    params["last"] = {"w": nrm(next(ki), (3, c0, 7, 7), c0 * 49),
                      "b": 0.1 * jax.random.normal(next(ki), (3,), jnp.float32)}
    return params


# ---------------------------------------------------------------------------
# ResGenerator forward
# ---------------------------------------------------------------------------
def res_generator_forward(params, image_nchw):
    y = jnp.transpose(image_nchw.astype(jnp.float32), (0, 2, 3, 1))   # -> NHWC

    # conv1: Conv(7x7, reflect) -> BN -> ReLU
    p = params["conv1"]
    s, b = _fold_bn(p["gamma"], p["beta"])
    y = conv2d_fused(y, p["w"], s, b, stride=1, pad=3, pad_mode="reflect",
                     act="relu", order="affine_act")

    # Downsample: Conv(3x3, s2, reflect) -> LeakyReLU(0.2) -> BN -> Dropout2d(eval=id)
    for p in params["down"]:
        s, b = _fold_bn(p["gamma"], p["beta"])
        y = conv2d_fused(y, p["w"], s, b, stride=2, pad=1, pad_mode="reflect",
                         act="lrelu", order="act_affine")

    # 6 Residual blocks (SAME conv & BN applied twice, then + x); the skip-add
    # is fused into the second conv's kernel epilogue.
    for p in params["res"]:
        s, b = _fold_bn(p["gamma"], p["beta"])
        r = conv2d_fused(y, p["w"], s, b, stride=1, pad=1, pad_mode="reflect",
                         act="lrelu", order="act_affine")
        y = conv2d_fused(r, p["w"], s, b, stride=1, pad=1, pad_mode="reflect",
                         act="lrelu", order="act_affine", residual=y)

    # Upsample: ConvTranspose(3x3, s2, out_pad 1) -> LeakyReLU -> BN -> Dropout2d(eval=id)
    for p in params["up"]:
        s, b = _fold_bn(p["gamma"], p["beta"])
        y = conv_transpose2d_fused(y, p["w"], s, b, act="lrelu", order="act_affine")

    # last: Conv(7x7, reflect, bias) -> Tanh
    p = params["last"]
    y = conv2d_fused(y, p["w"], jnp.ones((3,), jnp.float32), p["b"],
                     stride=1, pad=3, pad_mode="reflect",
                     act="tanh", order="affine_act")

    return jnp.transpose(y, (0, 3, 1, 2))   # -> NCHW


if __name__ == "__main__":
    channels = [8, 16, 32]          # small version of the default [64, 128, 256]
    key = jax.random.PRNGKey(0)
    k_params, k_x = jax.random.split(key)
    params = init_params(k_params, channels)

    x = jax.random.normal(k_x, (2, 3, 16, 16), jnp.float32)   # NCHW image

    fwd = jax.jit(res_generator_forward)
    out = jax.block_until_ready(fwd(params, x))

    assert out.shape == (2, 3, 16, 16), out.shape
    assert bool(jnp.all(jnp.isfinite(out)))
    assert bool(jnp.all(jnp.abs(out) <= 1.0))    # tanh output range
    print("KERNEL_OK")
</pallas_src>

<mosaic_0001>
module attributes {stable_mosaic.version = 11 : i64} {
  func.func @_fused_matmul_kernel(%arg0: i32, %arg1: memref<256x147xbf16, #tpu.memory_space<vmem>>, %arg2: memref<147x8xbf16, #tpu.memory_space<vmem>>, %arg3: memref<1x8xf32, #tpu.memory_space<vmem>>, %arg4: memref<1x8xf32, #tpu.memory_space<vmem>>, %arg5: memref<256x8xf32, #tpu.memory_space<vmem>>) attributes {dimension_semantics = [#tpu.dimension_semantics<parallel>], iteration_bounds = array<i64: 2>, scalar_prefetch = 0 : i64, scratch_operands = 0 : i64, tpu.core_type = #tpu.core_type<tc>, window_params = [{transform_indices = @transform_0, window_bounds = array<i64: 256, 147>}, {pipeline_mode = #tpu.pipeline_mode<synchronous>, transform_indices = @transform_1, window_bounds = array<i64: 147, 8>}, {pipeline_mode = #tpu.pipeline_mode<synchronous>, transform_indices = @transform_2, window_bounds = array<i64: 1, 8>}, {pipeline_mode = #tpu.pipeline_mode<synchronous>, transform_indices = @transform_3, window_bounds = array<i64: 1, 8>}, {transform_indices = @transform_4, window_bounds = array<i64: 256, 8>}]} {
    %c0 = arith.constant 0 : index
    %c0_0 = arith.constant 0 : index
    %0 = vector.load %arg1[%c0, %c0_0] : memref<256x147xbf16, #tpu.memory_space<vmem>>, vector<256x147xbf16>
    %c0_1 = arith.constant 0 : index
    %c0_2 = arith.constant 0 : index
    %1 = vector.load %arg2[%c0_1, %c0_2] : memref<147x8xbf16, #tpu.memory_space<vmem>>, vector<147x8xbf16>
    %cst = arith.constant dense<0.000000e+00> : vector<256x8xf32>
    %2 = tpu.matmul %0, %1, %cst {dimension_numbers = #tpu.dot_dimension_numbers<[1], [0], [0], [1], [0, 0, 1, 1], [], []>} : vector<256x147xbf16>, vector<147x8xbf16>, vector<256x8xf32> -> vector<256x8xf32>
    %c0_3 = arith.constant 0 : index
    %c0_4 = arith.constant 0 : index
    %3 = vector.load %arg3[%c0_3, %c0_4] : memref<1x8xf32, #tpu.memory_space<vmem>>, vector<1x8xf32>
    %c0_5 = arith.constant 0 : index
    %c0_6 = arith.constant 0 : index
    %4 = vector.load %arg4[%c0_5, %c0_6] : memref<1x8xf32, #tpu.memory_space<vmem>>, vector<1x8xf32>
    %5 = vector.broadcast %3 : vector<1x8xf32> to vector<256x8xf32>
    %6 = arith.mulf %2, %5 : vector<256x8xf32>
    %7 = vector.broadcast %4 : vector<1x8xf32> to vector<256x8xf32>
    %8 = arith.addf %6, %7 : vector<256x8xf32>
    %cst_7 = arith.constant 0.000000e+00 : f32
    %9 = vector.broadcast %cst_7 : f32 to vector<256x8xf32>
    %10 = arith.maximumf %8, %9 : vector<256x8xf32>
    %c0_8 = arith.constant 0 : index
    %c0_9 = arith.constant 0 : index
    %11 = vector.load %arg5[%c0_8, %c0_9] : memref<256x8xf32, #tpu.memory_space<vmem>>, vector<256x8xf32>
    tpu.vector_store %arg5[%c0_8, %c0_9], %10 {strides = array<i32>} : memref<256x8xf32, #tpu.memory_space<vmem>>, vector<256x8xf32>,
    return
  }
  func.func @transform_0(%arg0: i32) -> (i32, i32) {
    %c0_i32 = arith.constant 0 : i32
    %c0_i32_0 = arith.constant 0 : i32
    return %arg0, %c0_i32 : i32, i32
  }
  func.func @transform_1(%arg0: i32) -> (i32, i32) {
    %c0_i32 = arith.constant 0 : i32
    %c0_i32_0 = arith.constant 0 : i32
    %c0_i32_1 = arith.constant 0 : i32
    return %c0_i32, %c0_i32_0 : i32, i32
  }
  func.func @transform_2(%arg0: i32) -> (i32, i32) {
    %c0_i32 = arith.constant 0 : i32
    %c0_i32_0 = arith.constant 0 : i32
    %c0_i32_1 = arith.constant 0 : i32
    return %c0_i32, %c0_i32_0 : i32, i32
  }
  func.func @transform_3(%arg0: i32) -> (i32, i32) {
    %c0_i32 = arith.constant 0 : i32
    %c0_i32_0 = arith.constant 0 : i32
    %c0_i32_1 = arith.constant 0 : i32
    return %c0_i32, %c0_i32_0 : i32, i32
  }
  func.func @transform_4(%arg0: i32) -> (i32, i32) {
    %c0_i32 = arith.constant 0 : i32
    %c0_i32_0 = arith.constant 0 : i32
    return %arg0, %c0_i32 : i32, i32
  }
}

module attributes {stable_mosaic.version = 11 : i64} {
  func.func @_fused_matmul_kernel(%arg0: i32, %arg1: memref<128x72xbf16, #tpu.memory_space<vmem>>, %arg2: memref<72x16xbf16, #tpu.memory_space<vmem>>, %arg3: memref<1x16xf32, #tpu.memory_space<vmem>>, %arg4: memref<1x16xf32, #tpu.memory_space<vmem>>, %arg5: memref<128x16xf32, #tpu.memory_space<vmem>>) attributes {dimension_semantics = [#tpu.dimension_semantics<parallel>], iteration_bounds = array<i64: 1>, scalar_prefetch = 0 : i64, scratch_operands = 0 : i64, tpu.core_type = #tpu.core_type<tc>, window_params = [{transform_indices = @transform_0, window_bounds = array<i64: 128, 72>}, {pipeline_mode = #tpu.pipeline_mode<synchronous>, transform_indices = @transform_1, window_bounds = array<i64: 72, 16>}, {pipeline_mode = #tpu.pipeline_mode<synchronous>, transform_indices = @transform_2, window_bounds = array<i64: 1, 16>}, {pipeline_mode = #tpu.pipeline_mode<synchronous>, transform_indices = @transform_3, window_bounds = array<i64: 1, 16>}, {transform_indices = @transform_4, window_bounds = array<i64: 128, 16>}]} {
    %c0 = arith.constant 0 : index
    %c0_0 = arith.constant 0 : index
    %0 = vector.load %arg1[%c0, %c0_0] : memref<128x72xbf16, #tpu.memory_space<vmem>>, vector<128x72xbf16>
    %c0_1 = arith.constant 0 : index
    %c0_2 = arith.constant 0 : index
    %1 = vector.load %arg2[%c0_1, %c0_2] : memref<72x16xbf16, #tpu.memory_space<vmem>>, vector<72x16xbf16>
    %cst = arith.constant dense<0.000000e+00> : vector<128x16xf32>
    %2 = tpu.matmul %0, %1, %cst {dimension_numbers = #tpu.dot_dimension_numbers<[1], [0], [0], [1], [0, 0, 1, 1], [], []>} : vector<128x72xbf16>, vector<72x16xbf16>, vector<128x16xf32> -> vector<128x16xf32>
    %c0_3 = arith.constant 0 : index
    %c0_4 = arith.constant 0 : index
    %3 = vector.load %arg3[%c0_3, %c0_4] : memref<1x16xf32, #tpu.memory_space<vmem>>, vector<1x16xf32>
    %c0_5 = arith.constant 0 : index
    %c0_6 = arith.constant 0 : index
    %4 = vector.load %arg4[%c0_5, %c0_6] : memref<1x16xf32, #tpu.memory_space<vmem>>, vector<1x16xf32>
    %cst_7 = arith.constant 0.000000e+00 : f32
    %5 = vector.broadcast %cst_7 : f32 to vector<128x16xf32>
    %6 = arith.cmpf oge, %2, %5 : vector<128x16xf32>
    %cst_8 = arith.constant 2.000000e-01 : f32
    %7 = vector.broadcast %cst_8 : f32 to vector<128x16xf32>
    %8 = arith.mulf %7, %2 : vector<128x16xf32>
    %9 = arith.select %6, %2, %8 : vector<128x16xi1>, vector<128x16xf32>
    %10 = vector.broadcast %3 : vector<1x16xf32> to vector<128x16xf32>
    %11 = arith.mulf %9, %10 : vector<128x16xf32>
    %12 = vector.broadcast %4 : vector<1x16xf32> to vector<128x16xf32>
    %13 = arith.addf %11, %12 : vector<128x16xf32>
    %c0_9 = arith.constant 0 : index
    %c0_10 = arith.constant 0 : index
    %14 = vector.load %arg5[%c0_9, %c0_10] : memref<128x16xf32, #tpu.memory_space<vmem>>, vector<128x16xf32>
    tpu.vector_store %arg5[%c0_9, %c0_10], %13 {strides = array<i32>} : memref<128x16xf32, #tpu.memory_space<vmem>>, vector<128x16xf32>,
    return
  }
  func.func @transform_0(%arg0: i32) -> (i32, i32) {
    %c0_i32 = arith.constant 0 : i32
    %c0_i32_0 = arith.constant 0 : i32
    return %arg0, %c0_i32 : i32, i32
  }
  func.func @transform_1(%arg0: i32) -> (i32, i32) {
    %c0_i32 = arith.constant 0 : i32
    %c0_i32_0 = arith.constant 0 : i32
    %c0_i32_1 = arith.constant 0 : i32
    return %c0_i32, %c0_i32_0 : i32, i32
  }
  func.func @transform_2(%arg0: i32) -> (i32, i32) {
    %c0_i32 = arith.constant 0 : i32
    %c0_i32_0 = arith.constant 0 : i32
    %c0_i32_1 = arith.constant 0 : i32
    return %c0_i32, %c0_i32_0 : i32, i32
  }
  func.func @transform_3(%arg0: i32) -> (i32, i32) {
    %c0_i32 = arith.constant 0 : i32
    %c0_i32_0 = arith.constant 0 : i32
    %c0_i32_1 = arith.constant 0 : i32
    return %c0_i32, %c0_i32_0 : i32, i32
  }
  func.func @transform_4(%arg0: i32) -> (i32, i32) {
    %c0_i32 = arith.constant 0 : i32
    %c0_i32_0 = arith.constant 0 : i32
    return %arg0, %c0_i32 : i32, i32
  }
}

module attributes {stable_mosaic.version = 11 : i64} {
  func.func @_fused_matmul_kernel(%arg0: i32, %arg1: memref<32x144xbf16, #tpu.memory_space<vmem>>, %arg2: memref<144x32xbf16, #tpu.memory_space<vmem>>, %arg3: memref<1x32xf32, #tpu.memory_space<vmem>>, %arg4: memref<1x32xf32, #tpu.memory_space<vmem>>, %arg5: memref<32x32xf32, #tpu.memory_space<vmem>>) attributes {dimension_semantics = [#tpu.dimension_semantics<parallel>], iteration_bounds = array<i64: 1>, scalar_prefetch = 0 : i64, scratch_operands = 0 : i64, tpu.core_type = #tpu.core_type<tc>, window_params = [{transform_indices = @transform_0, window_bounds = array<i64: 32, 144>}, {pipeline_mode = #tpu.pipeline_mode<synchronous>, transform_indices = @transform_1, window_bounds = array<i64: 144, 32>}, {pipeline_mode = #tpu.pipeline_mode<synchronous>, transform_indices = @transform_2, window_bounds = array<i64: 1, 32>}, {pipeline_mode = #tpu.pipeline_mode<synchronous>, transform_indices = @transform_3, window_bounds = array<i64: 1, 32>}, {transform_indices = @transform_4, window_bounds = array<i64: 32, 32>}]} {
    %c0 = arith.constant 0 : index
    %c0_0 = arith.constant 0 : index
    %0 = vector.load %arg1[%c0, %c0_0] : memref<32x144xbf16, #tpu.memory_space<vmem>>, vector<32x144xbf16>
    %c0_1 = arith.constant 0 : index
    %c0_2 = arith.constant 0 : index
    %1 = vector.load %arg2[%c0_1, %c0_2] : memref<144x32xbf16, #tpu.memory_space<vmem>>, vector<144x32xbf16>
    %cst = arith.constant dense<0.000000e+00> : vector<32x32xf32>
    %2 = tpu.matmul %0, %1, %cst {dimension_numbers = #tpu.dot_dimension_numbers<[1], [0], [0], [1], [0, 0, 1, 1], [], []>} : vector<32x144xbf16>, vector<144x32xbf16>, vector<32x32xf32> -> vector<32x32xf32>
    %c0_3 = arith.constant 0 : index
    %c0_4 = arith.constant 0 : index
    %3 = vector.load %arg3[%c0_3, %c0_4] : memref<1x32xf32, #tpu.memory_space<vmem>>, vector<1x32xf32>
    %c0_5 = arith.constant 0 : index
    %c0_6 = arith.constant 0 : index
    %4 = vector.load %arg4[%c0_5, %c0_6] : memref<1x32xf32, #tpu.memory_space<vmem>>, vector<1x32xf32>
    %cst_7 = arith.constant 0.000000e+00 : f32
    %5 = vector.broadcast %cst_7 : f32 to vector<32x32xf32>
    %6 = arith.cmpf oge, %2, %5 : vector<32x32xf32>
    %cst_8 = arith.constant 2.000000e-01 : f32
    %7 = vector.broadcast %cst_8 : f32 to vector<32x32xf32>
    %8 = arith.mulf %7, %2 : vector<32x32xf32>
    %9 = arith.select %6, %2, %8 : vector<32x32xi1>, vector<32x32xf32>
    %10 = vector.broadcast %3 : vector<1x32xf32> to vector<32x32xf32>
    %11 = arith.mulf %9, %10 : vector<32x32xf32>
    %12 = vector.broadcast %4 : vector<1x32xf32> to vector<32x32xf32>
    %13 = arith.addf %11, %12 : vector<32x32xf32>
    %c0_9 = arith.constant 0 : index
    %c0_10 = arith.constant 0 : index
    %14 = vector.load %arg5[%c0_9, %c0_10] : memref<32x32xf32, #tpu.memory_space<vmem>>, vector<32x32xf32>
    tpu.vector_store %arg5[%c0_9, %c0_10], %13 {strides = array<i32>} : memref<32x32xf32, #tpu.memory_space<vmem>>, vector<32x32xf32>,
    return
  }
  func.func @transform_0(%arg0: i32) -> (i32, i32) {
    %c0_i32 = arith.constant 0 : i32
    %c0_i32_0 = arith.constant 0 : i32
    return %arg0, %c0_i32 : i32, i32
  }
  func.func @transform_1(%arg0: i32) -> (i32, i32) {
    %c0_i32 = arith.constant 0 : i32
    %c0_i32_0 = arith.constant 0 : i32
    %c0_i32_1 = arith.constant 0 : i32
    return %c0_i32, %c0_i32_0 : i32, i32
  }
  func.func @transform_2(%arg0: i32) -> (i32, i32) {
    %c0_i32 = arith.constant 0 : i32
    %c0_i32_0 = arith.constant 0 : i32
    %c0_i32_1 = arith.constant 0 : i32
    return %c0_i32, %c0_i32_0 : i32, i32
  }
  func.func @transform_3(%arg0: i32) -> (i32, i32) {
    %c0_i32 = arith.constant 0 : i32
    %c0_i32_0 = arith.constant 0 : i32
    %c0_i32_1 = arith.constant 0 : i32
    return %c0_i32, %c0_i32_0 : i32, i32
  }
  func.func @transform_4(%arg0: i32) -> (i32, i32) {
    %c0_i32 = arith.constant 0 : i32
    %c0_i32_0 = arith.constant 0 : i32
    return %arg0, %c0_i32 : i32, i32
  }
}

module attributes {stable_mosaic.version = 11 : i64} {
  func.func @_fused_matmul_kernel(%arg0: i32, %arg1: memref<32x288xbf16, #tpu.memory_space<vmem>>, %arg2: memref<288x32xbf16, #tpu.memory_space<vmem>>, %arg3: memref<1x32xf32, #tpu.memory_space<vmem>>, %arg4: memref<1x32xf32, #tpu.memory_space<vmem>>, %arg5: memref<32x32xf32, #tpu.memory_space<vmem>>) attributes {dimension_semantics = [#tpu.dimension_semantics<parallel>], iteration_bounds = array<i64: 1>, scalar_prefetch = 0 : i64, scratch_operands = 0 : i64, tpu.core_type = #tpu.core_type<tc>, window_params = [{transform_indices = @transform_0, window_bounds = array<i64: 32, 288>}, {pipeline_mode = #tpu.pipeline_mode<synchronous>, transform_indices = @transform_1, window_bounds = array<i64: 288, 32>}, {pipeline_mode = #tpu.pipeline_mode<synchronous>, transform_indices = @transform_2, window_bounds = array<i64: 1, 32>}, {pipeline_mode = #tpu.pipeline_mode<synchronous>, transform_indices = @transform_3, window_bounds = array<i64: 1, 32>}, {transform_indices = @transform_4, window_bounds = array<i64: 32, 32>}]} {
    %c0 = arith.constant 0 : index
    %c0_0 = arith.constant 0 : index
    %0 = vector.load %arg1[%c0, %c0_0] : memref<32x288xbf16, #tpu.memory_space<vmem>>, vector<32x288xbf16>
    %c0_1 = arith.constant 0 : index
    %c0_2 = arith.constant 0 : index
    %1 = vector.load %arg2[%c0_1, %c0_2] : memref<288x32xbf16, #tpu.memory_space<vmem>>, vector<288x32xbf16>
    %cst = arith.constant dense<0.000000e+00> : vector<32x32xf32>
    %2 = tpu.matmul %0, %1, %cst {dimension_numbers = #tpu.dot_dimension_numbers<[1], [0], [0], [1], [0, 0, 1, 1], [], []>} : vector<32x288xbf16>, vector<288x32xbf16>, vector<32x32xf32> -> vector<32x32xf32>
    %c0_3 = arith.constant 0 : index
    %c0_4 = arith.constant 0 : index
    %3 = vector.load %arg3[%c0_3, %c0_4] : memref<1x32xf32, #tpu.memory_space<vmem>>, vector<1x32xf32>
    %c0_5 = arith.constant 0 : index
    %c0_6 = arith.constant 0 : index
    %4 = vector.load %arg4[%c0_5, %c0_6] : memref<1x32xf32, #tpu.memory_space<vmem>>, vector<1x32xf32>
    %cst_7 = arith.constant 0.000000e+00 : f32
    %5 = vector.broadcast %cst_7 : f32 to vector<32x32xf32>
    %6 = arith.cmpf oge, %2, %5 : vector<32x32xf32>
    %cst_8 = arith.constant 2.000000e-01 : f32
    %7 = vector.broadcast %cst_8 : f32 to vector<32x32xf32>
    %8 = arith.mulf %7, %2 : vector<32x32xf32>
    %9 = arith.select %6, %2, %8 : vector<32x32xi1>, vector<32x32xf32>
    %10 = vector.broadcast %3 : vector<1x32xf32> to vector<32x32xf32>
    %11 = arith.mulf %9, %10 : vector<32x32xf32>
    %12 = vector.broadcast %4 : vector<1x32xf32> to vector<32x32xf32>
    %13 = arith.addf %11, %12 : vector<32x32xf32>
    %c0_9 = arith.constant 0 : index
    %c0_10 = arith.constant 0 : index
    %14 = vector.load %arg5[%c0_9, %c0_10] : memref<32x32xf32, #tpu.memory_space<vmem>>, vector<32x32xf32>
    tpu.vector_store %arg5[%c0_9, %c0_10], %13 {strides = array<i32>} : memref<32x32xf32, #tpu.memory_space<vmem>>, vector<32x32xf32>,
    return
  }
  func.func @transform_0(%arg0: i32) -> (i32, i32) {
    %c0_i32 = arith.constant 0 : i32
    %c0_i32_0 = arith.constant 0 : i32
    return %arg0, %c0_i32 : i32, i32
  }
  func.func @transform_1(%arg0: i32) -> (i32, i32) {
    %c0_i32 = arith.constant 0 : i32
    %c0_i32_0 = arith.constant 0 : i32
    %c0_i32_1 = arith.constant 0 : i32
    return %c0_i32, %c0_i32_0 : i32, i32
  }
  func.func @transform_2(%arg0: i32) -> (i32, i32) {
    %c0_i32 = arith.constant 0 : i32
    %c0_i32_0 = arith.constant 0 : i32
    %c0_i32_1 = arith.constant 0 : i32
    return %c0_i32, %c0_i32_0 : i32, i32
  }
  func.func @transform_3(%arg0: i32) -> (i32, i32) {
    %c0_i32 = arith.constant 0 : i32
    %c0_i32_0 = arith.constant 0 : i32
    %c0_i32_1 = arith.constant 0 : i32
    return %c0_i32, %c0_i32_0 : i32, i32
  }
  func.func @transform_4(%arg0: i32) -> (i32, i32) {
    %c0_i32 = arith.constant 0 : i32
    %c0_i32_0 = arith.constant 0 : i32
    return %arg0, %c0_i32 : i32, i32
  }
}

module attributes {stable_mosaic.version = 11 : i64} {
  func.func @_fused_matmul_kernel(%arg0: i32, %arg1: memref<32x288xbf16, #tpu.memory_space<vmem>>, %arg2: memref<288x32xbf16, #tpu.memory_space<vmem>>, %arg3: memref<1x32xf32, #tpu.memory_space<vmem>>, %arg4: memref<1x32xf32, #tpu.memory_space<vmem>>, %arg5: memref<32x32xf32, #tpu.memory_space<vmem>>, %arg6: memref<32x32xf32, #tpu.memory_space<vmem>>) attributes {dimension_semantics = [#tpu.dimension_semantics<parallel>], iteration_bounds = array<i64: 1>, scalar_prefetch = 0 : i64, scratch_operands = 0 : i64, tpu.core_type = #tpu.core_type<tc>, window_params = [{transform_indices = @transform_0, window_bounds = array<i64: 32, 288>}, {pipeline_mode = #tpu.pipeline_mode<synchronous>, transform_indices = @transform_1, window_bounds = array<i64: 288, 32>}, {pipeline_mode = #tpu.pipeline_mode<synchronous>, transform_indices = @transform_2, window_bounds = array<i64: 1, 32>}, {pipeline_mode = #tpu.pipeline_mode<synchronous>, transform_indices = @transform_3, window_bounds = array<i64: 1, 32>}, {transform_indices = @transform_4, window_bounds = array<i64: 32, 32>}, {transform_indices = @transform_5, window_bounds = array<i64: 32, 32>}]} {
    %c0 = arith.constant 0 : index
    %c0_0 = arith.constant 0 : index
    %0 = vector.load %arg1[%c0, %c0_0] : memref<32x288xbf16, #tpu.memory_space<vmem>>, vector<32x288xbf16>
    %c0_1 = arith.constant 0 : index
    %c0_2 = arith.constant 0 : index
    %1 = vector.load %arg2[%c0_1, %c0_2] : memref<288x32xbf16, #tpu.memory_space<vmem>>, vector<288x32xbf16>
    %cst = arith.constant dense<0.000000e+00> : vector<32x32xf32>
    %2 = tpu.matmul %0, %1, %cst {dimension_numbers = #tpu.dot_dimension_numbers<[1], [0], [0], [1], [0, 0, 1, 1], [], []>} : vector<32x288xbf16>, vector<288x32xbf16>, vector<32x32xf32> -> vector<32x32xf32>
    %c0_3 = arith.constant 0 : index
    %c0_4 = arith.constant 0 : index
    %3 = vector.load %arg3[%c0_3, %c0_4] : memref<1x32xf32, #tpu.memory_space<vmem>>, vector<1x32xf32>
    %c0_5 = arith.constant 0 : index
    %c0_6 = arith.constant 0 : index
    %4 = vector.load %arg4[%c0_5, %c0_6] : memref<1x32xf32, #tpu.memory_space<vmem>>, vector<1x32xf32>
    %cst_7 = arith.constant 0.000000e+00 : f32
    %5 = vector.broadcast %cst_7 : f32 to vector<32x32xf32>
    %6 = arith.cmpf oge, %2, %5 : vector<32x32xf32>
    %cst_8 = arith.constant 2.000000e-01 : f32
    %7 = vector.broadcast %cst_8 : f32 to vector<32x32xf32>
    %8 = arith.mulf %7, %2 : vector<32x32xf32>
    %9 = arith.select %6, %2, %8 : vector<32x32xi1>, vector<32x32xf32>
    %10 = vector.broadcast %3 : vector<1x32xf32> to vector<32x32xf32>
    %11 = arith.mulf %9, %10 : vector<32x32xf32>
    %12 = vector.broadcast %4 : vector<1x32xf32> to vector<32x32xf32>
    %13 = arith.addf %11, %12 : vector<32x32xf32>
    %c0_9 = arith.constant 0 : index
    %c0_10 = arith.constant 0 : index
    %14 = vector.load %arg5[%c0_9, %c0_10] : memref<32x32xf32, #tpu.memory_space<vmem>>, vector<32x32xf32>
    %15 = arith.addf %13, %14 : vector<32x32xf32>
    %c0_11 = arith.constant 0 : index
    %c0_12 = arith.constant 0 : index
    %16 = vector.load %arg6[%c0_11, %c0_12] : memref<32x32xf32, #tpu.memory_space<vmem>>, vector<32x32xf32>
    tpu.vector_store %arg6[%c0_11, %c0_12], %15 {strides = array<i32>} : memref<32x32xf32, #tpu.memory_space<vmem>>, vector<32x32xf32>,
    return
  }
  func.func @transform_0(%arg0: i32) -> (i32, i32) {
    %c0_i32 = arith.constant 0 : i32
    %c0_i32_0 = arith.constant 0 : i32
    return %arg0, %c0_i32 : i32, i32
  }
  func.func @transform_1(%arg0: i32) -> (i32, i32) {
    %c0_i32 = arith.constant 0 : i32
    %c0_i32_0 = arith.constant 0 : i32
    %c0_i32_1 = arith.constant 0 : i32
    return %c0_i32, %c0_i32_0 : i32, i32
  }
  func.func @transform_2(%arg0: i32) -> (i32, i32) {
    %c0_i32 = arith.constant 0 : i32
    %c0_i32_0 = arith.constant 0 : i32
    %c0_i32_1 = arith.constant 0 : i32
    return %c0_i32, %c0_i32_0 : i32, i32
  }
  func.func @transform_3(%arg0: i32) -> (i32, i32) {
    %c0_i32 = arith.constant 0 : i32
    %c0_i32_0 = arith.constant 0 : i32
    %c0_i32_1 = arith.constant 0 : i32
    return %c0_i32, %c0_i32_0 : i32, i32
  }
  func.func @transform_4(%arg0: i32) -> (i32, i32) {
    %c0_i32 = arith.constant 0 : i32
    %c0_i32_0 = arith.constant 0 : i32
    return %arg0, %c0_i32 : i32, i32
  }
  func.func @transform_5(%arg0: i32) -> (i32, i32) {
    %c0_i32 = arith.constant 0 : i32
    %c0_i32_0 = arith.constant 0 : i32
    return %arg0, %c0_i32 : i32, i32
  }
}

module attributes {stable_mosaic.version = 11 : i64} {
  func.func @_fused_matmul_kernel(%arg0: i32, %arg1: memref<32x128xbf16, #tpu.memory_space<vmem>>, %arg2: memref<128x64xbf16, #tpu.memory_space<vmem>>, %arg3: memref<1x64xf32, #tpu.memory_space<vmem>>, %arg4: memref<1x64xf32, #tpu.memory_space<vmem>>, %arg5: memref<32x64xf32, #tpu.memory_space<vmem>>) attributes {dimension_semantics = [#tpu.dimension_semantics<parallel>], iteration_bounds = array<i64: 1>, scalar_prefetch = 0 : i64, scratch_operands = 0 : i64, tpu.core_type = #tpu.core_type<tc>, window_params = [{transform_indices = @transform_0, window_bounds = array<i64: 32, 128>}, {pipeline_mode = #tpu.pipeline_mode<synchronous>, transform_indices = @transform_1, window_bounds = array<i64: 128, 64>}, {pipeline_mode = #tpu.pipeline_mode<synchronous>, transform_indices = @transform_2, window_bounds = array<i64: 1, 64>}, {pipeline_mode = #tpu.pipeline_mode<synchronous>, transform_indices = @transform_3, window_bounds = array<i64: 1, 64>}, {transform_indices = @transform_4, window_bounds = array<i64: 32, 64>}]} {
    %c0 = arith.constant 0 : index
    %c0_0 = arith.constant 0 : index
    %0 = vector.load %arg1[%c0, %c0_0] : memref<32x128xbf16, #tpu.memory_space<vmem>>, vector<32x128xbf16>
    %c0_1 = arith.constant 0 : index
    %c0_2 = arith.constant 0 : index
    %1 = vector.load %arg2[%c0_1, %c0_2] : memref<128x64xbf16, #tpu.memory_space<vmem>>, vector<128x64xbf16>
    %cst = arith.constant dense<0.000000e+00> : vector<32x64xf32>
    %2 = tpu.matmul %0, %1, %cst {dimension_numbers = #tpu.dot_dimension_numbers<[1], [0], [0], [1], [0, 0, 1, 1], [], []>} : vector<32x128xbf16>, vector<128x64xbf16>, vector<32x64xf32> -> vector<32x64xf32>
    %c0_3 = arith.constant 0 : index
    %c0_4 = arith.constant 0 : index
    %3 = vector.load %arg3[%c0_3, %c0_4] : memref<1x64xf32, #tpu.memory_space<vmem>>, vector<1x64xf32>
    %c0_5 = arith.constant 0 : index
    %c0_6 = arith.constant 0 : index
    %4 = vector.load %arg4[%c0_5, %c0_6] : memref<1x64xf32, #tpu.memory_space<vmem>>, vector<1x64xf32>
    %cst_7 = arith.constant 0.000000e+00 : f32
    %5 = vector.broadcast %cst_7 : f32 to vector<32x64xf32>
    %6 = arith.cmpf oge, %2, %5 : vector<32x64xf32>
    %cst_8 = arith.constant 2.000000e-01 : f32
    %7 = vector.broadcast %cst_8 : f32 to vector<32x64xf32>
    %8 = arith.mulf %7, %2 : vector<32x64xf32>
    %9 = arith.select %6, %2, %8 : vector<32x64xi1>, vector<32x64xf32>
    %10 = vector.broadcast %3 : vector<1x64xf32> to vector<32x64xf32>
    %11 = arith.mulf %9, %10 : vector<32x64xf32>
    %12 = vector.broadcast %4 : vector<1x64xf32> to vector<32x64xf32>
    %13 = arith.addf %11, %12 : vector<32x64xf32>
    %c0_9 = arith.constant 0 : index
    %c0_10 = arith.constant 0 : index
    %14 = vector.load %arg5[%c0_9, %c0_10] : memref<32x64xf32, #tpu.memory_space<vmem>>, vector<32x64xf32>
    tpu.vector_store %arg5[%c0_9, %c0_10], %13 {strides = array<i32>} : memref<32x64xf32, #tpu.memory_space<vmem>>, vector<32x64xf32>,
    return
  }
  func.func @transform_0(%arg0: i32) -> (i32, i32) {
    %c0_i32 = arith.constant 0 : i32
    %c0_i32_0 = arith.constant 0 : i32
    return %arg0, %c0_i32 : i32, i32
  }
  func.func @transform_1(%arg0: i32) -> (i32, i32) {
    %c0_i32 = arith.constant 0 : i32
    %c0_i32_0 = arith.constant 0 : i32
    %c0_i32_1 = arith.constant 0 : i32
    return %c0_i32, %c0_i32_0 : i32, i32
  }
  func.func @transform_2(%arg0: i32) -> (i32, i32) {
    %c0_i32 = arith.constant 0 : i32
    %c0_i32_0 = arith.constant 0 : i32
    %c0_i32_1 = arith.constant 0 : i32
    return %c0_i32, %c0_i32_0 : i32, i32
  }
  func.func @transform_3(%arg0: i32) -> (i32, i32) {
    %c0_i32 = arith.constant 0 : i32
    %c0_i32_0 = arith.constant 0 : i32
    %c0_i32_1 = arith.constant 0 : i32
    return %c0_i32, %c0_i32_0 : i32, i32
  }
  func.func @transform_4(%arg0: i32) -> (i32, i32) {
    %c0_i32 = arith.constant 0 : i32
    %c0_i32_0 = arith.constant 0 : i32
    return %arg0, %c0_i32 : i32, i32
  }
}

module attributes {stable_mosaic.version = 11 : i64} {
  func.func @_fused_matmul_kernel(%arg0: i32, %arg1: memref<128x64xbf16, #tpu.memory_space<vmem>>, %arg2: memref<64x32xbf16, #tpu.memory_space<vmem>>, %arg3: memref<1x32xf32, #tpu.memory_space<vmem>>, %arg4: memref<1x32xf32, #tpu.memory_space<vmem>>, %arg5: memref<128x32xf32, #tpu.memory_space<vmem>>) attributes {dimension_semantics = [#tpu.dimension_semantics<parallel>], iteration_bounds = array<i64: 1>, scalar_prefetch = 0 : i64, scratch_operands = 0 : i64, tpu.core_type = #tpu.core_type<tc>, window_params = [{transform_indices = @transform_0, window_bounds = array<i64: 128, 64>}, {pipeline_mode = #tpu.pipeline_mode<synchronous>, transform_indices = @transform_1, window_bounds = array<i64: 64, 32>}, {pipeline_mode = #tpu.pipeline_mode<synchronous>, transform_indices = @transform_2, window_bounds = array<i64: 1, 32>}, {pipeline_mode = #tpu.pipeline_mode<synchronous>, transform_indices = @transform_3, window_bounds = array<i64: 1, 32>}, {transform_indices = @transform_4, window_bounds = array<i64: 128, 32>}]} {
    %c0 = arith.constant 0 : index
    %c0_0 = arith.constant 0 : index
    %0 = vector.load %arg1[%c0, %c0_0] : memref<128x64xbf16, #tpu.memory_space<vmem>>, vector<128x64xbf16>
    %c0_1 = arith.constant 0 : index
    %c0_2 = arith.constant 0 : index
    %1 = vector.load %arg2[%c0_1, %c0_2] : memref<64x32xbf16, #tpu.memory_space<vmem>>, vector<64x32xbf16>
    %cst = arith.constant dense<0.000000e+00> : vector<128x32xf32>
    %2 = tpu.matmul %0, %1, %cst {dimension_numbers = #tpu.dot_dimension_numbers<[1], [0], [0], [1], [0, 0, 1, 1], [], []>} : vector<128x64xbf16>, vector<64x32xbf16>, vector<128x32xf32> -> vector<128x32xf32>
    %c0_3 = arith.constant 0 : index
    %c0_4 = arith.constant 0 : index
    %3 = vector.load %arg3[%c0_3, %c0_4] : memref<1x32xf32, #tpu.memory_space<vmem>>, vector<1x32xf32>
    %c0_5 = arith.constant 0 : index
    %c0_6 = arith.constant 0 : index
    %4 = vector.load %arg4[%c0_5, %c0_6] : memref<1x32xf32, #tpu.memory_space<vmem>>, vector<1x32xf32>
    %cst_7 = arith.constant 0.000000e+00 : f32
    %5 = vector.broadcast %cst_7 : f32 to vector<128x32xf32>
    %6 = arith.cmpf oge, %2, %5 : vector<128x32xf32>
    %cst_8 = arith.constant 2.000000e-01 : f32
    %7 = vector.broadcast %cst_8 : f32 to vector<128x32xf32>
    %8 = arith.mulf %7, %2 : vector<128x32xf32>
    %9 = arith.select %6, %2, %8 : vector<128x32xi1>, vector<128x32xf32>
    %10 = vector.broadcast %3 : vector<1x32xf32> to vector<128x32xf32>
    %11 = arith.mulf %9, %10 : vector<128x32xf32>
    %12 = vector.broadcast %4 : vector<1x32xf32> to vector<128x32xf32>
    %13 = arith.addf %11, %12 : vector<128x32xf32>
    %c0_9 = arith.constant 0 : index
    %c0_10 = arith.constant 0 : index
    %14 = vector.load %arg5[%c0_9, %c0_10] : memref<128x32xf32, #tpu.memory_space<vmem>>, vector<128x32xf32>
    tpu.vector_store %arg5[%c0_9, %c0_10], %13 {strides = array<i32>} : memref<128x32xf32, #tpu.memory_space<vmem>>, vector<128x32xf32>,
    return
  }
  func.func @transform_0(%arg0: i32) -> (i32, i32) {
    %c0_i32 = arith.constant 0 : i32
    %c0_i32_0 = arith.constant 0 : i32
    return %arg0, %c0_i32 : i32, i32
  }
  func.func @transform_1(%arg0: i32) -> (i32, i32) {
    %c0_i32 = arith.constant 0 : i32
    %c0_i32_0 = arith.constant 0 : i32
    %c0_i32_1 = arith.constant 0 : i32
    return %c0_i32, %c0_i32_0 : i32, i32
  }
  func.func @transform_2(%arg0: i32) -> (i32, i32) {
    %c0_i32 = arith.constant 0 : i32
    %c0_i32_0 = arith.constant 0 : i32
    %c0_i32_1 = arith.constant 0 : i32
    return %c0_i32, %c0_i32_0 : i32, i32
  }
  func.func @transform_3(%arg0: i32) -> (i32, i32) {
    %c0_i32 = arith.constant 0 : i32
    %c0_i32_0 = arith.constant 0 : i32
    %c0_i32_1 = arith.constant 0 : i32
    return %c0_i32, %c0_i32_0 : i32, i32
  }
  func.func @transform_4(%arg0: i32) -> (i32, i32) {
    %c0_i32 = arith.constant 0 : i32
    %c0_i32_0 = arith.constant 0 : i32
    return %arg0, %c0_i32 : i32, i32
  }
}

module attributes {stable_mosaic.version = 11 : i64} {
  func.func @_fused_matmul_kernel(%arg0: i32, %arg1: memref<256x392xbf16, #tpu.memory_space<vmem>>, %arg2: memref<392x3xbf16, #tpu.memory_space<vmem>>, %arg3: memref<1x3xf32, #tpu.memory_space<vmem>>, %arg4: memref<1x3xf32, #tpu.memory_space<vmem>>, %arg5: memref<256x3xf32, #tpu.memory_space<vmem>>) attributes {dimension_semantics = [#tpu.dimension_semantics<parallel>], iteration_bounds = array<i64: 2>, scalar_prefetch = 0 : i64, scratch_operands = 0 : i64, tpu.core_type = #tpu.core_type<tc>, window_params = [{transform_indices = @transform_0, window_bounds = array<i64: 256, 392>}, {pipeline_mode = #tpu.pipeline_mode<synchronous>, transform_indices = @transform_1, window_bounds = array<i64: 392, 3>}, {pipeline_mode = #tpu.pipeline_mode<synchronous>, transform_indices = @transform_2, window_bounds = array<i64: 1, 3>}, {pipeline_mode = #tpu.pipeline_mode<synchronous>, transform_indices = @transform_3, window_bounds = array<i64: 1, 3>}, {transform_indices = @transform_4, window_bounds = array<i64: 256, 3>}]} {
    %c0 = arith.constant 0 : index
    %c0_0 = arith.constant 0 : index
    %0 = vector.load %arg1[%c0, %c0_0] : memref<256x392xbf16, #tpu.memory_space<vmem>>, vector<256x392xbf16>
    %c0_1 = arith.constant 0 : index
    %c0_2 = arith.constant 0 : index
    %1 = vector.load %arg2[%c0_1, %c0_2] : memref<392x3xbf16, #tpu.memory_space<vmem>>, vector<392x3xbf16>
    %cst = arith.constant dense<0.000000e+00> : vector<256x3xf32>
    %2 = tpu.matmul %0, %1, %cst {dimension_numbers = #tpu.dot_dimension_numbers<[1], [0], [0], [1], [0, 0, 1, 1], [], []>} : vector<256x392xbf16>, vector<392x3xbf16>, vector<256x3xf32> -> vector<256x3xf32>
    %c0_3 = arith.constant 0 : index
    %c0_4 = arith.constant 0 : index
    %3 = vector.load %arg3[%c0_3, %c0_4] : memref<1x3xf32, #tpu.memory_space<vmem>>, vector<1x3xf32>
    %c0_5 = arith.constant 0 : index
    %c0_6 = arith.constant 0 : index
    %4 = vector.load %arg4[%c0_5, %c0_6] : memref<1x3xf32, #tpu.memory_space<vmem>>, vector<1x3xf32>
    %5 = vector.broadcast %3 : vector<1x3xf32> to vector<256x3xf32>
    %6 = arith.mulf %2, %5 : vector<256x3xf32>
    %7 = vector.broadcast %4 : vector<1x3xf32> to vector<256x3xf32>
    %8 = arith.addf %6, %7 : vector<256x3xf32>
    %9 = math.tanh %8 : vector<256x3xf32>
    %c0_7 = arith.constant 0 : index
    %c0_8 = arith.constant 0 : index
    %10 = vector.load %arg5[%c0_7, %c0_8] : memref<256x3xf32, #tpu.memory_space<vmem>>, vector<256x3xf32>
    tpu.vector_store %arg5[%c0_7, %c0_8], %9 {strides = array<i32>} : memref<256x3xf32, #tpu.memory_space<vmem>>, vector<256x3xf32>,
    return
  }
  func.func @transform_0(%arg0: i32) -> (i32, i32) {
    %c0_i32 = arith.constant 0 : i32
    %c0_i32_0 = arith.constant 0 : i32
    return %arg0, %c0_i32 : i32, i32
  }
  func.func @transform_1(%arg0: i32) -> (i32, i32) {
    %c0_i32 = arith.constant 0 : i32
    %c0_i32_0 = arith.constant 0 : i32
    %c0_i32_1 = arith.constant 0 : i32
    return %c0_i32, %c0_i32_0 : i32, i32
  }
  func.func @transform_2(%arg0: i32) -> (i32, i32) {
    %c0_i32 = arith.constant 0 : i32
    %c0_i32_0 = arith.constant 0 : i32
    %c0_i32_1 = arith.constant 0 : i32
    return %c0_i32, %c0_i32_0 : i32, i32
  }
  func.func @transform_3(%arg0: i32) -> (i32, i32) {
    %c0_i32 = arith.constant 0 : i32
    %c0_i32_0 = arith.constant 0 : i32
    %c0_i32_1 = arith.constant 0 : i32
    return %c0_i32, %c0_i32_0 : i32, i32
  }
  func.func @transform_4(%arg0: i32) -> (i32, i32) {
    %c0_i32 = arith.constant 0 : i32
    %c0_i32_0 = arith.constant 0 : i32
    return %arg0, %c0_i32 : i32, i32
  }
}

</mosaic_0001>

<bundles_post_ra>
// kernel: res_generator_forward.18
= control target key start
LH: loop header
LB: loop body
LE: loop exit
PB: predicated region body
PF: predicated region fallthrough
CT: control target
= control target key end

     0   :  { %s1069_s15 = smov 0   ;;  %s1313_s0 = inlined_call_operand.vmem [shape: bf16[512,147], index: 0, kind: input, shape index: {}]   ;;  %s1314_s1 = inlined_call_operand.vmem [shape: bf16[147,8], index: 1, kind: input, shape index: {}]   ;;  %s1315_s2 = inlined_call_operand.vmem [shape: f32[1,8], index: 2, kind: input, shape index: {}]   ;;  %s1316_s3 = inlined_call_operand.vmem [shape: f32[1,8], index: 3, kind: input, shape index: {}]   ;;  %s1317_s4 = inlined_call_operand.vmem [shape: f32[512,8], index: 4, kind: output, shape index: {}]  }
   0x1 LB: > { %s873_s16 = sadd.s32 4294967295, %s1040_s15   ;;  %p877_p0 = scmp.ge.s32.totalorder %s1040_s15, 1  ;;  %s1040_s15 = sphi %s1069_s15, %s14_s15  }
   0x2   : > { %p164_p1 = scmp.lt.s32.totalorder %s1040_s15, 3 }
   0x4   : > { %p165_p2 = pnand %p877_p0, %p164_p1 }
   0x5   : > { %v976_v0 = vld [vmem:[%s1314_s1] sm:$0xff] (!%p165_p2)   ;;  %v1042_v1 = vmov (!%p165_p2), 0   ;;  %v977_v2 = vld [vmem:[%s1314_s1 + $0x8] sm:$0xff] (!%p165_p2)   ;;  %v978_v3 = vld [vmem:[%s1314_s1 + $0x10] sm:$0xff] (!%p165_p2)   ;;  %s878_s23 = sshll.u32 (!%p165_p2), %s873_s16, 5  ;;  %vm457_vm0 = vcmask (!%p165_p2), 154624  }
   0x6   : > { %168 = sbr.rel (%p165_p2) target bundleno = 323 (0x143), region = 36  ;;  %513 = vmatprep.subr.bf16.mxu0 (!%p165_p2), %v1042_v1  ;;  %946 = vmatprep.subr.bf16.mxu1 (!%p165_p2), %v1042_v1  ;;  %p192_p3 = scmp.lt.s32.totalorder (!%p165_p2), %s878_s23, 63  ;;  %v979_v4 = vld [vmem:[%s1314_s1 + $0x18] sm:$0xff] (!%p165_p2)   ;;  %v980_v5 = vld [vmem:[%s1314_s1 + $0x20] sm:$0xff] (!%p165_p2)   ;;  %v981_v8 = vld [vmem:[%s1314_s1 + $0x28] sm:$0xff] (!%p165_p2)   ;;  %vm506_vm1 = vcmask (!%p165_p2), 1040384  }
   0x7   : > { %514 = vmatpush1.bf16.msra.mxu0 (!%p165_p2), %v976_v0  ;;  %956 = vmatpush1.bf16.msra.mxu1 (!%p165_p2), %v976_v0  ;;  %v982_v9 = vld [vmem:[%s1314_s1 + $0x30] sm:$0xff] (!%p165_p2)   ;;  %v983_v10 = vld [vmem:[%s1314_s1 + $0x38] sm:$0xff] (!%p165_p2)   ;;  %vm507_vm2 = vcmask (!%p165_p2), 1041408   ;;  %v1043_v11 = vmov (!%p165_p2), 65535   ;;  %v984_v13 = vld [vmem:[%s1314_s1 + $0x40] sm:$0xff] (!%p165_p2)   ;;  %vm784_vm3 = vcmask (!%p165_p2), 64512  }
   0x8   : > { %515 = vmatprep.subr.bf16.mxu0 (!%p165_p2), %v1042_v1  ;;  %947 = vmatprep.subr.bf16.mxu1 (!%p165_p2), %v1042_v1  ;;  %v508_v12 = vsel (!%p165_p2), %vm506_vm1, 4294967295, %v1043_v11  ;;  %v985_v14 = vld [vmem:[%s1314_s1 + $0x48] ss:$0 sps:$4 sm:$0x33] (!%p165_p2)   ;;  %v1168_v47 = vld [vmem:[%s1315_s2] ss:$0 sm:$0xff] (!%p165_p2) }
   0x9   : > { %v509_v15 = vsel (!%p165_p2), %vm507_vm2, %v508_v12, 0  ;;  %v1173_v49 = vld [vmem:[%s1316_s3] ss:$0 sm:$0xff] (!%p165_p2) }
   0xa   : > { %v511_v16 = vand.u32 (!%p165_p2), %v985_v14, %v509_v15 }
   0xb   : > { %516 = vmatpush1.bf16.msra.mxu0 (!%p165_p2), %v977_v2  ;;  %957 = vmatpush1.bf16.msra.mxu1 (!%p165_p2), %v977_v2 }
   0xc   : > { %517 = vmatprep.subr.bf16.mxu0 (!%p165_p2), %v1042_v1  ;;  %948 = vmatprep.subr.bf16.mxu1 (!%p165_p2), %v1042_v1 }
   0xd   : > { %s1319_s23 = smov (!%p192_p3, %s878_s23), 63 }
   0xe   : > { %s945_s26 = sshll.u32 %s1319_s23, 3 }
   0xf   : > { %518 = vmatpush1.bf16.msra.mxu0 %v978_v3  ;;  %958 = vmatpush1.bf16.msra.mxu1 %v978_v3  ;;  %s1097_s29 = scalar_lea.vmem %s1313_s0, %s945_s26  ;;  %s1186_s24 = scalar_lea.vmem %s1317_s4, %s945_s26 }
  0x10   : > { %519 = vmatprep.subr.bf16.mxu0 %v1042_v1  ;;  %949 = vmatprep.subr.bf16.mxu1 %v1042_v1  ;;  %v988_v6 = vld [vmem:[%s1097_s29 + $0x4] ss:$8 sps:$4 sm:$0xff]   ;;  %v986_v17 = vld [vmem:[%s1097_s29] ss:$8 sps:$4 sm:$0xff]   ;;  %v992_v19 = vld [vmem:[%s1097_s29 + $0x14] ss:$8 sps:$4 sm:$0xff]  }
  0x11   : > { %v991_v7 = vld [vmem:[%s1097_s29 + $0x84] ss:$8 sps:$4 sm:$0xff]   ;;  %925 = vmatprep.mubr.msk.bf16.mxu0 %vm457_vm0, %v988_v6  ;;  %v989_v18 = vld [vmem:[%s1097_s29 + $0x80] ss:$8 sps:$4 sm:$0xff]   ;;  %v994_v20 = vld [vmem:[%s1097_s29 + $0x94] ss:$8 sps:$4 sm:$0xff]  }
  0x12   : > { %933 = vmatprep.mubr.msk.bf16.mxu1 %vm457_vm0, %v991_v7  ;;  %v996_v21 = vld [vmem:[%s1097_s29 + $0x10] ss:$8 sps:$4 sm:$0xff]   ;;  %v998_v23 = vld [vmem:[%s1097_s29 + $0x24] ss:$8 sps:$4 sm:$0xff]   ;;  %v1002_v25 = vld [vmem:[%s1097_s29 + $0x20] ss:$8 sps:$4 sm:$0xff]  }
  0x13   : > { %520 = vmatpush1.bf16.msra.mxu0 %v979_v4  ;;  %959 = vmatpush1.bf16.msra.mxu1 %v979_v4  ;;  %v997_v22 = vld [vmem:[%s1097_s29 + $0x90] ss:$8 sps:$4 sm:$0xff]   ;;  %v1000_v24 = vld [vmem:[%s1097_s29 + $0xa4] ss:$8 sps:$4 sm:$0xff]   ;;  %v1003_v26 = vld [vmem:[%s1097_s29 + $0xa0] ss:$8 sps:$4 sm:$0xff]  }
  0x14   : > { %521 = vmatprep.subr.bf16.mxu0 %v1042_v1  ;;  %950 = vmatprep.subr.bf16.mxu1 %v1042_v1  ;;  %v1004_v27 = vld [vmem:[%s1097_s29 + $0x34] ss:$8 sps:$4 sm:$0xff]   ;;  %v1008_v29 = vld [vmem:[%s1097_s29 + $0x30] ss:$8 sps:$4 sm:$0xff]   ;;  %v1010_v31 = vld [vmem:[%s1097_s29 + $0x44] ss:$8 sps:$4 sm:$0xff]  }
  0x15   : > { %v1006_v28 = vld [vmem:[%s1097_s29 + $0xb4] ss:$8 sps:$4 sm:$0xff]   ;;  %v1009_v30 = vld [vmem:[%s1097_s29 + $0xb0] ss:$8 sps:$4 sm:$0xff]   ;;  %v1012_v32 = vld [vmem:[%s1097_s29 + $0xc4] ss:$8 sps:$4 sm:$0xff]  }
  0x16   : > { %v1014_v33 = vld [vmem:[%s1097_s29 + $0x40] ss:$8 sps:$4 sm:$0xff]   ;;  %v1016_v35 = vld [vmem:[%s1097_s29 + $0x54] ss:$8 sps:$4 sm:$0xff]   ;;  %v1020_v37 = vld [vmem:[%s1097_s29 + $0x50] ss:$8 sps:$4 sm:$0xff]  }
  0x17   : > { %522 = vmatpush1.bf16.msra.mxu0 %v980_v5  ;;  %960 = vmatpush1.bf16.msra.mxu1 %v980_v5  ;;  %v1015_v34 = vld [vmem:[%s1097_s29 + $0xc0] ss:$8 sps:$4 sm:$0xff]   ;;  %v1018_v36 = vld [vmem:[%s1097_s29 + $0xd4] ss:$8 sps:$4 sm:$0xff]   ;;  %v1021_v38 = vld [vmem:[%s1097_s29 + $0xd0] ss:$8 sps:$4 sm:$0xff]  }
  0x18   : > { %523 = vmatprep.subr.bf16.mxu0 %v1042_v1  ;;  %951 = vmatprep.subr.bf16.mxu1 %v1042_v1  ;;  %v1022_v39 = vld [vmem:[%s1097_s29 + $0x64] ss:$8 sps:$4 sm:$0xff]   ;;  %v1026_v41 = vld [vmem:[%s1097_s29 + $0x60] ss:$8 sps:$4 sm:$0xff]   ;;  %v1028_v43 = vld [vmem:[%s1097_s29 + $0x74] ss:$8 sps:$4 sm:$0xff]  }
  0x19   : > { %v1024_v40 = vld [vmem:[%s1097_s29 + $0xe4] ss:$8 sps:$4 sm:$0xff]   ;;  %v1027_v42 = vld [vmem:[%s1097_s29 + $0xe0] ss:$8 sps:$4 sm:$0xff]   ;;  %v1030_v44 = vld [vmem:[%s1097_s29 + $0xf4] ss:$8 sps:$4 sm:$0xff]  }
  0x1a   : > { %v1032_v45 = vld [vmem:[%s1097_s29 + $0x70] ss:$8 sps:$4 sm:$0xff]  }
  0x1b   : > { %524 = vmatpush1.bf16.msra.mxu0 %v981_v8  ;;  %961 = vmatpush1.bf16.msra.mxu1 %v981_v8  ;;  %v1033_v46 = vld [vmem:[%s1097_s29 + $0xf0] ss:$8 sps:$4 sm:$0xff]  }
  0x1c   : > { %525 = vmatprep.subr.bf16.mxu0 %v1042_v1  ;;  %952 = vmatprep.subr.bf16.mxu1 %v1042_v1 }
  0x1f   : > { %526 = vmatpush1.bf16.msra.mxu0 %v982_v9  ;;  %962 = vmatpush1.bf16.msra.mxu1 %v982_v9 }
  0x20   : > { %527 = vmatprep.subr.bf16.mxu0 %v1042_v1  ;;  %953 = vmatprep.subr.bf16.mxu1 %v1042_v1 }
  0x23   : > { %528 = vmatpush1.bf16.msra.mxu0 %v983_v10  ;;  %963 = vmatpush1.bf16.msra.mxu1 %v983_v10 }
  0x24   : > { %529 = vmatprep.subr.bf16.mxu0 %v1042_v1  ;;  %954 = vmatprep.subr.bf16.mxu1 %v1042_v1 }
  0x27   : > { %530 = vmatpush1.bf16.msra.mxu0 %v984_v13  ;;  %964 = vmatpush1.bf16.msra.mxu1 %v984_v13 }
  0x28   : > { %531 = vmatprep.subr.bf16.mxu0 %v1042_v1  ;;  %955 = vmatprep.subr.bf16.mxu1 %v1042_v1 }
  0x2b   : > { %532 = vmatpush1.bf16.msra.mxu0 %v511_v16  ;;  %965 = vmatpush1.bf16.msra.mxu1 %v511_v16 }
  0x2e   : > { %546 = vmatmul.mubr.bf16.vlgmr.msra.gmra.mrb[0].mxu0 %v986_v17  ;;  %610 = vmatmul.mubr.bf16.vlgmr.msra.gmra.mrb[0].mxu1 %v989_v18 }
  0x2f   : > { %926 = vmatprep.mubr.msk.bf16.mxu0 %vm457_vm0, %v992_v19  ;;  %934 = vmatprep.mubr.msk.bf16.mxu1 %vm457_vm0, %v994_v20 }
  0x36   : > { %554 = vmatmul.mubr.bf16.gmra.mrb[4].mxu0 %v996_v21  ;;  %618 = vmatmul.mubr.bf16.gmra.mrb[4].mxu1 %v997_v22 }
  0x37   : > { %927 = vmatprep.mubr.msk.bf16.mxu0 %vm457_vm0, %v998_v23  ;;  %935 = vmatprep.mubr.msk.bf16.mxu1 %vm457_vm0, %v1000_v24 }
  0x3e   : > { %562 = vmatmul.mubr.bf16.gmra.mrb[8].mxu0 %v1002_v25  ;;  %626 = vmatmul.mubr.bf16.gmra.mrb[8].mxu1 %v1003_v26 }
  0x3f   : > { %928 = vmatprep.mubr.msk.bf16.mxu0 %vm457_vm0, %v1004_v27  ;;  %936 = vmatprep.mubr.msk.bf16.mxu1 %vm457_vm0, %v1006_v28 }
  0x46   : > { %570 = vmatmul.mubr.bf16.gmra.mrb[12].mxu0 %v1008_v29  ;;  %634 = vmatmul.mubr.bf16.gmra.mrb[12].mxu1 %v1009_v30 }
  0x47   : > { %929 = vmatprep.mubr.msk.bf16.mxu0 %vm457_vm0, %v1010_v31  ;;  %937 = vmatprep.mubr.msk.bf16.mxu1 %vm457_vm0, %v1012_v32 }
  0x4e   : > { %578 = vmatmul.mubr.bf16.gmra.mrb[16].mxu0 %v1014_v33  ;;  %642 = vmatmul.mubr.bf16.gmra.mrb[16].mxu1 %v1015_v34 }
  0x4f   : > { %930 = vmatprep.mubr.msk.bf16.mxu0 %vm457_vm0, %v1016_v35  ;;  %938 = vmatprep.mubr.msk.bf16.mxu1 %vm457_vm0, %v1018_v36 }
  0x56   : > { %586 = vmatmul.mubr.bf16.gmra.mrb[20].mxu0 %v1020_v37  ;;  %650 = vmatmul.mubr.bf16.gmra.mrb[20].mxu1 %v1021_v38 }
  0x57   : > { %931 = vmatprep.mubr.msk.bf16.mxu0 %vm457_vm0, %v1022_v39  ;;  %939 = vmatprep.mubr.msk.bf16.mxu1 %vm457_vm0, %v1024_v40 }
  0x5e   : > { %594 = vmatmul.mubr.bf16.gmra.mrb[24].mxu0 %v1026_v41  ;;  %658 = vmatmul.mubr.bf16.gmra.mrb[24].mxu1 %v1027_v42 }
  0x5f   : > { %932 = vmatprep.mubr.msk.bf16.mxu0 %vm457_vm0, %v1028_v43  ;;  %940 = vmatprep.mubr.msk.bf16.mxu1 %vm457_vm0, %v1030_v44 }
  0x66   : > { %602 = vmatmul.mubr.bf16.gmra.mrb[28].mxu0 %v1032_v45  ;;  %666 = vmatmul.mubr.bf16.gmra.mrb[28].mxu1 %v1033_v46 }
 0x101   : > { %v547_v48 = vpop.f32.mrb[0].mxu0  ;;  %v611_v50 = vpop.f32.mrb[0].mxu1 }
 0x102   : > { %v682_v51 = vmul.f32 %v1168_v47, %v547_v48  ;;  %v698_v52 = vmul.f32 %v1168_v47, %v611_v50  ;;  %v549_v53 = vpop.f32.mrb[1].mxu0  ;;  %v613_v54 = vpop.f32.mrb[1].mxu1 }
 0x103   : > { %v550_v55 = vpop.f32.mrb[2].mxu0  ;;  %v614_v56 = vpop.f32.mrb[2].mxu1 }
 0x104   : > { %v720_v57 = vadd.f32 %v1173_v49, %v682_v51  ;;  %v736_v58 = vadd.f32 %v1173_v49, %v698_v52  ;;  %v683_v59 = vmul.f32 %v1168_v47, %v550_v55  ;;  %v699_v60 = vmul.f32 %v1168_v47, %v614_v56  ;;  %v552_v61 = vpop.f32.mrb[3].mxu0  ;;  %v616_v62 = vpop.f32.mrb[3].mxu1 }
 0x106   : > { %v752_v63 = vmax.f32 %v720_v57, 0.0  ;;  %v768_v0 = vmax.f32 %v736_v58, 0.0  ;;  %v721_v1 = vadd.f32 %v1173_v49, %v683_v59  ;;  %v737_v2 = vadd.f32 %v1173_v49, %v699_v60 }
 0x108   : > { %785 = vst.msk [vmem:[%s1186_s24] sm:$0xff] %vm784_vm3, %v752_v63  ;;  %801 = vst.msk [vmem:[%s1186_s24 + $0x80] sm:$0xff] %vm784_vm3, %v768_v0  ;;  %v753_v3 = vmax.f32 %v721_v1, 0.0  ;;  %v769_v4 = vmax.f32 %v737_v2, 0.0 }
 0x109   : > { %v555_v5 = vpop.f32.mrb[4].mxu0  ;;  %v619_v6 = vpop.f32.mrb[4].mxu1 }
 0x10a   : > { %786 = vst.msk [vmem:[%s1186_s24 + $0x8] sm:$0xff] %vm784_vm3, %v753_v3  ;;  %802 = vst.msk [vmem:[%s1186_s24 + $0x88] sm:$0xff] %vm784_vm3, %v769_v4  ;;  %v684_v7 = vmul.f32 %v1168_v47, %v555_v5  ;;  %v700_v8 = vmul.f32 %v1168_v47, %v619_v6  ;;  %v557_v9 = vpop.f32.mrb[5].mxu0  ;;  %v621_v10 = vpop.f32.mrb[5].mxu1 }
 0x10b   : > { %v558_v11 = vpop.f32.mrb[6].mxu0  ;;  %v622_v12 = vpop.f32.mrb[6].mxu1 }
 0x10c   : > { %v722_v13 = vadd.f32 %v1173_v49, %v684_v7  ;;  %v738_v14 = vadd.f32 %v1173_v49, %v700_v8  ;;  %v685_v15 = vmul.f32 %v1168_v47, %v558_v11  ;;  %v701_v16 = vmul.f32 %v1168_v47, %v622_v12  ;;  %v560_v17 = vpop.f32.mrb[7].mxu0  ;;  %v624_v18 = vpop.f32.mrb[7].mxu1 }
 0x10e   : > { %v754_v19 = vmax.f32 %v722_v13, 0.0  ;;  %v770_v20 = vmax.f32 %v738_v14, 0.0  ;;  %v723_v21 = vadd.f32 %v1173_v49, %v685_v15  ;;  %v739_v22 = vadd.f32 %v1173_v49, %v701_v16 }
 0x110   : > { %787 = vst.msk [vmem:[%s1186_s24 + $0x10] sm:$0xff] %vm784_vm3, %v754_v19  ;;  %803 = vst.msk [vmem:[%s1186_s24 + $0x90] sm:$0xff] %vm784_vm3, %v770_v20  ;;  %v755_v23 = vmax.f32 %v723_v21, 0.0  ;;  %v771_v24 = vmax.f32 %v739_v22, 0.0 }
 0x111   : > { %v563_v25 = vpop.f32.mrb[8].mxu0  ;;  %v627_v26 = vpop.f32.mrb[8].mxu1 }
 0x112   : > { %788 = vst.msk [vmem:[%s1186_s24 + $0x18] sm:$0xff] %vm784_vm3, %v755_v23  ;;  %804 = vst.msk [vmem:[%s1186_s24 + $0x98] sm:$0xff] %vm784_vm3, %v771_v24  ;;  %v686_v27 = vmul.f32 %v1168_v47, %v563_v25  ;;  %v702_v28 = vmul.f32 %v1168_v47, %v627_v26  ;;  %v565_v29 = vpop.f32.mrb[9].mxu0  ;;  %v629_v30 = vpop.f32.mrb[9].mxu1 }
 0x113   : > { %v566_v31 = vpop.f32.mrb[10].mxu0  ;;  %v630_v32 = vpop.f32.mrb[10].mxu1 }
 0x114   : > { %v724_v33 = vadd.f32 %v1173_v49, %v686_v27  ;;  %v740_v34 = vadd.f32 %v1173_v49, %v702_v28  ;;  %v687_v35 = vmul.f32 %v1168_v47, %v566_v31  ;;  %v703_v36 = vmul.f32 %v1168_v47, %v630_v32  ;;  %v568_v37 = vpop.f32.mrb[11].mxu0  ;;  %v632_v38 = vpop.f32.mrb[11].mxu1 }
 0x116   : > { %v756_v39 = vmax.f32 %v724_v33, 0.0  ;;  %v772_v40 = vmax.f32 %v740_v34, 0.0  ;;  %v725_v41 = vadd.f32 %v1173_v49, %v687_v35  ;;  %v741_v42 = vadd.f32 %v1173_v49, %v703_v36 }
 0x118   : > { %789 = vst.msk [vmem:[%s1186_s24 + $0x20] sm:$0xff] %vm784_vm3, %v756_v39  ;;  %805 = vst.msk [vmem:[%s1186_s24 + $0xa0] sm:$0xff] %vm784_vm3, %v772_v40  ;;  %v757_v43 = vmax.f32 %v725_v41, 0.0  ;;  %v773_v44 = vmax.f32 %v741_v42, 0.0 }
 0x119   : > { %v571_v45 = vpop.f32.mrb[12].mxu0  ;;  %v635_v46 = vpop.f32.mrb[12].mxu1 }
 0x11a   : > { %790 = vst.msk [vmem:[%s1186_s24 + $0x28] sm:$0xff] %vm784_vm3, %v757_v43  ;;  %806 = vst.msk [vmem:[%s1186_s24 + $0xa8] sm:$0xff] %vm784_vm3, %v773_v44  ;;  %v688_v48 = vmul.f32 %v1168_v47, %v571_v45  ;;  %v704_v50 = vmul.f32 %v1168_v47, %v635_v46  ;;  %v573_v51 = vpop.f32.mrb[13].mxu0  ;;  %v637_v52 = vpop.f32.mrb[13].mxu1 }
 0x11b   : > { %v574_v53 = vpop.f32.mrb[14].mxu0  ;;  %v638_v54 = vpop.f32.mrb[14].mxu1 }
 0x11c   : > { %v726_v55 = vadd.f32 %v1173_v49, %v688_v48  ;;  %v742_v56 = vadd.f32 %v1173_v49, %v704_v50  ;;  %v689_v57 = vmul.f32 %v1168_v47, %v574_v53  ;;  %v705_v58 = vmul.f32 %v1168_v47, %v638_v54  ;;  %v576_v59 = vpop.f32.mrb[15].mxu0  ;;  %v640_v60 = vpop.f32.mrb[15].mxu1 }
 0x11e   : > { %v758_v61 = vmax.f32 %v726_v55, 0.0  ;;  %v774_v62 = vmax.f32 %v742_v56, 0.0  ;;  %v727_v63 = vadd.f32 %v1173_v49, %v689_v57  ;;  %v743_v0 = vadd.f32 %v1173_v49, %v705_v58 }
 0x120   : > { %791 = vst.msk [vmem:[%s1186_s24 + $0x30] sm:$0xff] %vm784_vm3, %v758_v61  ;;  %807 = vst.msk [vmem:[%s1186_s24 + $0xb0] sm:$0xff] %vm784_vm3, %v774_v62  ;;  %v759_v1 = vmax.f32 %v727_v63, 0.0  ;;  %v775_v2 = vmax.f32 %v743_v0, 0.0 }
 0x121   : > { %v579_v3 = vpop.f32.mrb[16].mxu0  ;;  %v643_v4 = vpop.f32.mrb[16].mxu1 }
 0x122   : > { %792 = vst.msk [vmem:[%s1186_s24 + $0x38] sm:$0xff] %vm784_vm3, %v759_v1  ;;  %808 = vst.msk [vmem:[%s1186_s24 + $0xb8] sm:$0xff] %vm784_vm3, %v775_v2  ;;  %v690_v5 = vmul.f32 %v1168_v47, %v579_v3  ;;  %v706_v6 = vmul.f32 %v1168_v47, %v643_v4  ;;  %v581_v7 = vpop.f32.mrb[17].mxu0  ;;  %v645_v8 = vpop.f32.mrb[17].mxu1 }
 0x123   : > { %v582_v9 = vpop.f32.mrb[18].mxu0  ;;  %v646_v10 = vpop.f32.mrb[18].mxu1 }
 0x124   : > { %v728_v11 = vadd.f32 %v1173_v49, %v690_v5  ;;  %v744_v12 = vadd.f32 %v1173_v49, %v706_v6  ;;  %v691_v13 = vmul.f32 %v1168_v47, %v582_v9  ;;  %v707_v14 = vmul.f32 %v1168_v47, %v646_v10  ;;  %v584_v15 = vpop.f32.mrb[19].mxu0  ;;  %v648_v16 = vpop.f32.mrb[19].mxu1 }
 0x126   : > { %v760_v17 = vmax.f32 %v728_v11, 0.0  ;;  %v776_v18 = vmax.f32 %v744_v12, 0.0  ;;  %v729_v19 = vadd.f32 %v1173_v49, %v691_v13  ;;  %v745_v20 = vadd.f32 %v1173_v49, %v707_v14 }
 0x128   : > { %793 = vst.msk [vmem:[%s1186_s24 + $0x40] sm:$0xff] %vm784_vm3, %v760_v17  ;;  %809 = vst.msk [vmem:[%s1186_s24 + $0xc0] sm:$0xff] %vm784_vm3, %v776_v18  ;;  %v761_v21 = vmax.f32 %v729_v19, 0.0  ;;  %v777_v22 = vmax.f32 %v745_v20, 0.0 }
 0x129   : > { %v587_v23 = vpop.f32.mrb[20].mxu0  ;;  %v651_v24 = vpop.f32.mrb[20].mxu1 }
 0x12a   : > { %794 = vst.msk [vmem:[%s1186_s24 + $0x48] sm:$0xff] %vm784_vm3, %v761_v21  ;;  %810 = vst.msk [vmem:[%s1186_s24 + $0xc8] sm:$0xff] %vm784_vm3, %v777_v22  ;;  %v692_v25 = vmul.f32 %v1168_v47, %v587_v23  ;;  %v708_v26 = vmul.f32 %v1168_v47, %v651_v24  ;;  %v589_v27 = vpop.f32.mrb[21].mxu0  ;;  %v653_v28 = vpop.f32.mrb[21].mxu1 }
 0x12b   : > { %v590_v29 = vpop.f32.mrb[22].mxu0  ;;  %v654_v30 = vpop.f32.mrb[22].mxu1 }
 0x12c   : > { %v730_v31 = vadd.f32 %v1173_v49, %v692_v25  ;;  %v746_v32 = vadd.f32 %v1173_v49, %v708_v26  ;;  %v693_v33 = vmul.f32 %v1168_v47, %v590_v29  ;;  %v709_v34 = vmul.f32 %v1168_v47, %v654_v30  ;;  %v592_v35 = vpop.f32.mrb[23].mxu0  ;;  %v656_v36 = vpop.f32.mrb[23].mxu1 }
 0x12e   : > { %v762_v37 = vmax.f32 %v730_v31, 0.0  ;;  %v778_v38 = vmax.f32 %v746_v32, 0.0  ;;  %v731_v39 = vadd.f32 %v1173_v49, %v693_v33  ;;  %v747_v40 = vadd.f32 %v1173_v49, %v709_v34 }
 0x130   : > { %795 = vst.msk [vmem:[%s1186_s24 + $0x50] sm:$0xff] %vm784_vm3, %v762_v37  ;;  %811 = vst.msk [vmem:[%s1186_s24 + $0xd0] sm:$0xff] %vm784_vm3, %v778_v38  ;;  %v763_v41 = vmax.f32 %v731_v39, 0.0  ;;  %v779_v42 = vmax.f32 %v747_v40, 0.0 }
 0x131   : > { %v595_v43 = vpop.f32.mrb[24].mxu0  ;;  %v659_v44 = vpop.f32.mrb[24].mxu1 }
 0x132   : > { %796 = vst.msk [vmem:[%s1186_s24 + $0x58] sm:$0xff] %vm784_vm3, %v763_v41  ;;  %812 = vst.msk [vmem:[%s1186_s24 + $0xd8] sm:$0xff] %vm784_vm3, %v779_v42  ;;  %v694_v45 = vmul.f32 %v1168_v47, %v595_v43  ;;  %v710_v46 = vmul.f32 %v1168_v47, %v659_v44  ;;  %v597_v48 = vpop.f32.mrb[25].mxu0  ;;  %v661_v50 = vpop.f32.mrb[25].mxu1 }
 0x133   : > { %v598_v51 = vpop.f32.mrb[26].mxu0  ;;  %v662_v52 = vpop.f32.mrb[26].mxu1 }
 0x134   : > { %v732_v53 = vadd.f32 %v1173_v49, %v694_v45  ;;  %v748_v54 = vadd.f32 %v1173_v49, %v710_v46  ;;  %v695_v55 = vmul.f32 %v1168_v47, %v598_v51  ;;  %v711_v56 = vmul.f32 %v1168_v47, %v662_v52  ;;  %v600_v57 = vpop.f32.mrb[27].mxu0  ;;  %v664_v58 = vpop.f32.mrb[27].mxu1 }
 0x136   : > { %v764_v59 = vmax.f32 %v732_v53, 0.0  ;;  %v780_v60 = vmax.f32 %v748_v54, 0.0  ;;  %v733_v61 = vadd.f32 %v1173_v49, %v695_v55  ;;  %v749_v62 = vadd.f32 %v1173_v49, %v711_v56 }
 0x138   : > { %797 = vst.msk [vmem:[%s1186_s24 + $0x60] sm:$0xff] %vm784_vm3, %v764_v59  ;;  %813 = vst.msk [vmem:[%s1186_s24 + $0xe0] sm:$0xff] %vm784_vm3, %v780_v60  ;;  %v765_v63 = vmax.f32 %v733_v61, 0.0  ;;  %v781_v0 = vmax.f32 %v749_v62, 0.0 }
 0x139   : > { %v603_v1 = vpop.f32.mrb[28].mxu0  ;;  %v667_v2 = vpop.f32.mrb[28].mxu1 }
 0x13a   : > { %798 = vst.msk [vmem:[%s1186_s24 + $0x68] sm:$0xff] %vm784_vm3, %v765_v63  ;;  %814 = vst.msk [vmem:[%s1186_s24 + $0xe8] sm:$0xff] %vm784_vm3, %v781_v0  ;;  %v696_v3 = vmul.f32 %v1168_v47, %v603_v1  ;;  %v712_v4 = vmul.f32 %v1168_v47, %v667_v2  ;;  %v605_v5 = vpop.f32.mrb[29].mxu0  ;;  %v669_v6 = vpop.f32.mrb[29].mxu1 }
 0x13b   : > { %v606_v7 = vpop.f32.mrb[30].mxu0  ;;  %v670_v8 = vpop.f32.mrb[30].mxu1 }
 0x13c   : > { %v734_v9 = vadd.f32 %v1173_v49, %v696_v3  ;;  %v750_v10 = vadd.f32 %v1173_v49, %v712_v4  ;;  %v697_v11 = vmul.f32 %v1168_v47, %v606_v7  ;;  %v713_v12 = vmul.f32 %v1168_v47, %v670_v8  ;;  %v608_v13 = vpop.f32.mrb[31].mxu0  ;;  %v672_v14 = vpop.f32.mrb[31].mxu1 }
 0x13e   : > { %v766_v15 = vmax.f32 %v734_v9, 0.0  ;;  %v782_v16 = vmax.f32 %v750_v10, 0.0  ;;  %v735_v17 = vadd.f32 %v1173_v49, %v697_v11  ;;  %v751_v18 = vadd.f32 %v1173_v49, %v713_v12 }
 0x140   : > { %799 = vst.msk [vmem:[%s1186_s24 + $0x70] sm:$0xff] %vm784_vm3, %v766_v15  ;;  %815 = vst.msk [vmem:[%s1186_s24 + $0xf0] sm:$0xff] %vm784_vm3, %v782_v16  ;;  %v767_v19 = vmax.f32 %v735_v17, 0.0  ;;  %v783_v20 = vmax.f32 %v751_v18, 0.0 }
 0x142   : > { %800 = vst.msk [vmem:[%s1186_s24 + $0x78] sm:$0xff] %vm784_vm3, %v767_v19  ;;  %816 = vst.msk [vmem:[%s1186_s24 + $0xf8] sm:$0xff] %vm784_vm3, %v783_v20 }
 0x143 PF: > { %s14_s15 = sadd.s32 1, %s1040_s15  }
 0x144   : > { %p11_p4 = scmp.ge.s32.totalorder %s14_s15, 4  }
 0x146   :  { %13 = sbr.rel (!%p11_p4) target bundleno = 1 (0x1), region = 66 }

// kernel: res_generator_forward.19
= control target key start
LH: loop header
LB: loop body
LE: loop exit
PB: predicated region body
PF: predicated region fallthrough
CT: control target
= control target key end

     0   :  { %vm110_vm0 = vcmask 588800   ;;  %vm135_vm1 = vcmask 1043456   ;;  %vm330_vm4 = vcmask 130048   ;;  %s620_s1 = inlined_call_operand.vmem [shape: bf16[72,16], index: 1, kind: input, shape index: {}]   ;;  %s621_s0 = inlined_call_operand.vmem [shape: bf16[128,72], index: 0, kind: input, shape index: {}]   ;;  %s622_s2 = inlined_call_operand.vmem [shape: f32[1,16], index: 2, kind: input, shape index: {}]   ;;  %s623_s3 = inlined_call_operand.vmem [shape: f32[1,16], index: 3, kind: input, shape index: {}]   ;;  %s624_s4 = inlined_call_operand.vmem [shape: f32[128,16], index: 4, kind: output, shape index: {}]  }
   0x1   :  { %v425_v0 = vld [vmem:[%s620_s1] sm:$0xff]   ;;  %v426_v1 = vld [vmem:[%s620_s1 + $0x8] sm:$0xff]   ;;  %v427_v2 = vld [vmem:[%s620_s1 + $0x10] sm:$0xff]  }
   0x2   :  { %387 = vmatprep.subr.bf16.mxu0 %v425_v0  ;;  %413 = vmatprep.subr.bf16.mxu1 %v425_v0  ;;  %v430_v3 = vld [vmem:[%s621_s0] sm:$0xff]   ;;  %v428_v5 = vld [vmem:[%s620_s1 + $0x18] sm:$0xff]   ;;  %v432_v8 = vld [vmem:[%s621_s0 + $0x8] sm:$0xff]  }
   0x3   :  { %388 = vmatpush3.bf16.msra.mxu0 %v425_v0  ;;  %418 = vmatpush3.bf16.msra.mxu1 %v425_v0  ;;  %v431_v4 = vld [vmem:[%s621_s0 + $0x20] sm:$0xff]   ;;  %v433_v9 = vld [vmem:[%s621_s0 + $0x28] sm:$0xff]   ;;  %v434_v10 = vld [vmem:[%s621_s0 + $0x10] sm:$0xff]  }
   0x4   :  { %389 = vmatprep.subr.bf16.mxu0 %v426_v1  ;;  %414 = vmatprep.subr.bf16.mxu1 %v426_v1  ;;  %v429_v6 = vld [vmem:[%s620_s1 + $0x20] ss:$0 sps:$4 sm:$0xff]   ;;  %v435_v11 = vld [vmem:[%s621_s0 + $0x30] sm:$0xff]   ;;  %v436_v12 = vld [vmem:[%s621_s0 + $0x18] sm:$0xff]  }
   0x5   :  { %397 = vmatprep.mubr.msk.bf16.mxu0 %vm110_vm0, %v430_v3  ;;  %405 = vmatprep.mubr.msk.bf16.mxu1 %vm110_vm0, %v431_v4  ;;  %v137_v7 = vsel %vm135_vm1, %v429_v6, 0  ;;  %v437_v13 = vld [vmem:[%s621_s0 + $0x38] sm:$0xff]   ;;  %v513_v15 = vld [vmem:[%s622_s2] ss:$0 sm:$0xff] }
   0x6   :  { %v518_v19 = vld [vmem:[%s623_s3] ss:$0 sm:$0xff] }
   0x7   :  { %390 = vmatpush3.bf16.msra.mxu0 %v426_v1  ;;  %419 = vmatpush3.bf16.msra.mxu1 %v426_v1 }
   0x8   :  { %391 = vmatprep.subr.bf16.mxu0 %v427_v2  ;;  %415 = vmatprep.subr.bf16.mxu1 %v427_v2 }
   0xb   :  { %392 = vmatpush3.bf16.msra.mxu0 %v427_v2  ;;  %420 = vmatpush3.bf16.msra.mxu1 %v427_v2 }
   0xc   :  { %393 = vmatprep.subr.bf16.mxu0 %v428_v5  ;;  %416 = vmatprep.subr.bf16.mxu1 %v428_v5 }
   0xf   :  { %394 = vmatpush3.bf16.msra.mxu0 %v428_v5  ;;  %421 = vmatpush3.bf16.msra.mxu1 %v428_v5 }
  0x10   :  { %423 = vmatprep.subr.msk.bf16.mxu0 %vm135_vm1, %v429_v6  ;;  %424 = vmatprep.subr.msk.bf16.mxu1 %vm135_vm1, %v429_v6 }
  0x13   :  { %396 = vmatpush3.bf16.msra.mxu0 %v137_v7  ;;  %422 = vmatpush3.bf16.msra.mxu1 %v137_v7 }
  0x16   :  { %398 = vmatmul.mubr.msk.bf16.vlgmr.msra.gmra.mrb[0].mxu0 %vm110_vm0, %v432_v8  ;;  %406 = vmatmul.mubr.msk.bf16.vlgmr.msra.gmra.mrb[0].mxu1 %vm110_vm0, %v433_v9 }
  0x17   :  { %401 = vmatprep.mubr.msk.bf16.mxu0 %vm110_vm0, %v434_v10  ;;  %409 = vmatprep.mubr.msk.bf16.mxu1 %vm110_vm0, %v435_v11 }
  0x1e   :  { %402 = vmatmul.mubr.msk.bf16.gmra.mrb[4].mxu0 %vm110_vm0, %v436_v12  ;;  %410 = vmatmul.mubr.msk.bf16.gmra.mrb[4].mxu1 %vm110_vm0, %v437_v13 }
  0xe9   :  { %v399_v14 = vpop.f32.mrb[0].mxu0  ;;  %v407_v16 = vpop.f32.mrb[0].mxu1 }
  0xea   :  { %vm240_vm2 = vcmp.ge.f32.partialorder %v399_v14, 0.0  ;;  %v256_v17 = vmul.f32 0.2, %v399_v14  ;;  %vm248_vm3 = vcmp.ge.f32.partialorder %v407_v16, 0.0  ;;  %v264_v18 = vmul.f32 0.2, %v407_v16 }
  0xeb   :  { %v173_v20 = vpop.f32.mrb[1].mxu0  ;;  %v205_v21 = vpop.f32.mrb[1].mxu1 }
  0xec   :  { %v272_v22 = vsel %vm240_vm2, %v399_v14, %v256_v17  ;;  %v280_v23 = vsel %vm248_vm3, %v407_v16, %v264_v18  ;;  %vm238_vm5 = vcmp.ge.f32.partialorder %v173_v20, 0.0  ;;  %v254_v24 = vmul.f32 0.2, %v173_v20  ;;  %v400_v25 = vpop.f32.mrb[2].mxu0  ;;  %v408_v26 = vpop.f32.mrb[2].mxu1 }
  0xed   :  { %v294_v27 = vmul.f32 %v513_v15, %v272_v22  ;;  %v302_v28 = vmul.f32 %v513_v15, %v280_v23  ;;  %vm246_vm6 = vcmp.ge.f32.partialorder %v205_v21, 0.0  ;;  %v262_v29 = vmul.f32 0.2, %v205_v21  ;;  %v176_v30 = vpop.f32.mrb[3].mxu0  ;;  %v208_v31 = vpop.f32.mrb[3].mxu1 }
  0xee   :  { %v270_v32 = vsel %vm238_vm5, %v173_v20, %v254_v24  ;;  %vm241_vm7 = vcmp.ge.f32.partialorder %v400_v25, 0.0  ;;  %v257_v33 = vmul.f32 0.2, %v400_v25  ;;  %vm249_vm8 = vcmp.ge.f32.partialorder %v408_v26, 0.0 }
  0xef   :  { %v316_v34 = vadd.f32 %v518_v19, %v294_v27  ;;  %v324_v35 = vadd.f32 %v518_v19, %v302_v28  ;;  %v292_v36 = vmul.f32 %v513_v15, %v270_v32  ;;  %v278_v37 = vsel %vm246_vm6, %v205_v21, %v262_v29 }
  0xf0   :  { %v300_v38 = vmul.f32 %v513_v15, %v278_v37  ;;  %v273_v39 = vsel %vm241_vm7, %v400_v25, %v257_v33  ;;  %v265_v40 = vmul.f32 0.2, %v408_v26  ;;  %vm239_vm9 = vcmp.ge.f32.partialorder %v176_v30, 0.0 }
  0xf1   :  { %333 = vst.msk [vmem:[%s624_s4 + $0x10] sm:$0xff] %vm330_vm4, %v316_v34  ;;  %341 = vst.msk [vmem:[%s624_s4 + $0x50] sm:$0xff] %vm330_vm4, %v324_v35  ;;  %v314_v41 = vadd.f32 %v518_v19, %v292_v36  ;;  %v295_v42 = vmul.f32 %v513_v15, %v273_v39  ;;  %v255_v43 = vmul.f32 0.2, %v176_v30  ;;  %vm247_vm10 = vcmp.ge.f32.partialorder %v208_v31, 0.0  ;;  %v403_v44 = vpop.f32.mrb[4].mxu0 }
  0xf2   :  { %v411_v45 = vpop.f32.mrb[4].mxu1  ;;  %v322_v46 = vadd.f32 %v518_v19, %v300_v38  ;;  %v281_v47 = vsel %vm249_vm8, %v408_v26, %v265_v40  ;;  %v263_v48 = vmul.f32 0.2, %v208_v31  ;;  %vm244_vm11 = vcmp.ge.f32.partialorder %v403_v44, 0.0  ;;  %v189_v49 = vpop.f32.mrb[5].mxu0 }
  0xf3   :  { %v221_v50 = vpop.f32.mrb[5].mxu1  ;;  %331 = vst.msk [vmem:[%s624_s4] sm:$0xff] %vm330_vm4, %v314_v41  ;;  %v317_v51 = vadd.f32 %v518_v19, %v295_v42  ;;  %v303_v52 = vmul.f32 %v513_v15, %v281_v47  ;;  %v271_v53 = vsel %vm239_vm9, %v176_v30, %v255_v43  ;;  %v260_v54 = vmul.f32 0.2, %v403_v44  ;;  %v404_v55 = vpop.f32.mrb[6].mxu0 }
  0xf4   :  { %v412_v56 = vpop.f32.mrb[6].mxu1  ;;  %339 = vst.msk [vmem:[%s624_s4 + $0x40] sm:$0xff] %vm330_vm4, %v322_v46  ;;  %v293_v57 = vmul.f32 %v513_v15, %v271_v53  ;;  %v279_v58 = vsel %vm247_vm10, %v208_v31, %v263_v48  ;;  %vm252_vm12 = vcmp.ge.f32.partialorder %v411_v45, 0.0  ;;  %v268_v59 = vmul.f32 0.2, %v411_v45  ;;  %v192_v60 = vpop.f32.mrb[7].mxu0 }
  0xf5   :  { %v224_v61 = vpop.f32.mrb[7].mxu1  ;;  %334 = vst.msk [vmem:[%s624_s4 + $0x18] sm:$0xff] %vm330_vm4, %v317_v51  ;;  %v325_v62 = vadd.f32 %v518_v19, %v303_v52  ;;  %v301_v63 = vmul.f32 %v513_v15, %v279_v58  ;;  %v276_v0 = vsel %vm244_vm11, %v403_v44, %v260_v54  ;;  %vm242_vm13 = vcmp.ge.f32.partialorder %v189_v49, 0.0 }
  0xf6   :  { %v315_v1 = vadd.f32 %v518_v19, %v293_v57  ;;  %v298_v2 = vmul.f32 %v513_v15, %v276_v0  ;;  %v284_v3 = vsel %vm252_vm12, %v411_v45, %v268_v59  ;;  %v258_v4 = vmul.f32 0.2, %v189_v49 }
  0xf7   :  { %342 = vst.msk [vmem:[%s624_s4 + $0x58] sm:$0xff] %vm330_vm4, %v325_v62  ;;  %v323_v5 = vadd.f32 %v518_v19, %v301_v63  ;;  %v306_v6 = vmul.f32 %v513_v15, %v284_v3  ;;  %vm250_vm14 = vcmp.ge.f32.partialorder %v221_v50, 0.0  ;;  %v266_v7 = vmul.f32 0.2, %v221_v50 }
  0xf8   :  { %332 = vst.msk [vmem:[%s624_s4 + $0x8] sm:$0xff] %vm330_vm4, %v315_v1  ;;  %v320_v8 = vadd.f32 %v518_v19, %v298_v2  ;;  %v274_v9 = vsel %vm242_vm13, %v189_v49, %v258_v4  ;;  %vm245_vm15 = vcmp.ge.f32.partialorder %v404_v55, 0.0  ;;  %v261_v10 = vmul.f32 0.2, %v404_v55 }
  0xf9   :  { %340 = vst.msk [vmem:[%s624_s4 + $0x48] sm:$0xff] %vm330_vm4, %v323_v5  ;;  %v328_v11 = vadd.f32 %v518_v19, %v306_v6  ;;  %v296_v12 = vmul.f32 %v513_v15, %v274_v9  ;;  %v282_v13 = vsel %vm250_vm14, %v221_v50, %v266_v7  ;;  %vm253_vm0 = vcmp.ge.f32.partialorder %v412_v56, 0.0 }
  0xfa   :  { %337 = vst.msk [vmem:[%s624_s4 + $0x30] sm:$0xff] %vm330_vm4, %v320_v8  ;;  %v304_v14 = vmul.f32 %v513_v15, %v282_v13  ;;  %v277_v16 = vsel %vm245_vm15, %v404_v55, %v261_v10  ;;  %v269_v17 = vmul.f32 0.2, %v412_v56  ;;  %vm243_vm1 = vcmp.ge.f32.partialorder %v192_v60, 0.0 }
  0xfb   :  { %345 = vst.msk [vmem:[%s624_s4 + $0x70] sm:$0xff] %vm330_vm4, %v328_v11  ;;  %v318_v18 = vadd.f32 %v518_v19, %v296_v12  ;;  %v299_v20 = vmul.f32 %v513_v15, %v277_v16  ;;  %v259_v21 = vmul.f32 0.2, %v192_v60  ;;  %vm251_vm2 = vcmp.ge.f32.partialorder %v224_v61, 0.0 }
  0xfc   :  { %v326_v22 = vadd.f32 %v518_v19, %v304_v14  ;;  %v285_v23 = vsel %vm253_vm0, %v412_v56, %v269_v17  ;;  %v267_v24 = vmul.f32 0.2, %v224_v61 }
  0xfd   :  { %335 = vst.msk [vmem:[%s624_s4 + $0x20] sm:$0xff] %vm330_vm4, %v318_v18  ;;  %v321_v25 = vadd.f32 %v518_v19, %v299_v20  ;;  %v307_v26 = vmul.f32 %v513_v15, %v285_v23  ;;  %v275_v27 = vsel %vm243_vm1, %v192_v60, %v259_v21 }
  0xfe   :  { %343 = vst.msk [vmem:[%s624_s4 + $0x60] sm:$0xff] %vm330_vm4, %v326_v22  ;;  %v297_v28 = vmul.f32 %v513_v15, %v275_v27  ;;  %v283_v29 = vsel %vm251_vm2, %v224_v61, %v267_v24 }
  0xff   :  { %338 = vst.msk [vmem:[%s624_s4 + $0x38] sm:$0xff] %vm330_vm4, %v321_v25  ;;  %v329_v30 = vadd.f32 %v518_v19, %v307_v26  ;;  %v305_v31 = vmul.f32 %v513_v15, %v283_v29 }
 0x100   :  { %v319_v32 = vadd.f32 %v518_v19, %v297_v28 }
 0x101   :  { %346 = vst.msk [vmem:[%s624_s4 + $0x78] sm:$0xff] %vm330_vm4, %v329_v30  ;;  %v327_v33 = vadd.f32 %v518_v19, %v305_v31 }
 0x102   :  { %336 = vst.msk [vmem:[%s624_s4 + $0x28] sm:$0xff] %vm330_vm4, %v319_v32 }
 0x103   :  { %344 = vst.msk [vmem:[%s624_s4 + $0x68] sm:$0xff] %vm330_vm4, %v327_v33 }

// kernel: res_generator_forward.20
= control target key start
LH: loop header
LB: loop body
LE: loop exit
PB: predicated region body
PF: predicated region fallthrough
CT: control target
= control target key end

     0   :  { %v262_v0 = vmov 0   ;;  %vm112_vm0 = vcmask 130048   ;;  %vm202_vm4 = vcmask 261120   ;;  %s345_s1 = inlined_call_operand.vmem [shape: bf16[144,32], index: 1, kind: input, shape index: {}]   ;;  %s346_s0 = inlined_call_operand.vmem [shape: bf16[32,144], index: 0, kind: input, shape index: {}]   ;;  %s347_s2 = inlined_call_operand.vmem [shape: f32[1,32], index: 2, kind: input, shape index: {}]   ;;  %s348_s3 = inlined_call_operand.vmem [shape: f32[1,32], index: 3, kind: input, shape index: {}]   ;;  %s349_s4 = inlined_call_operand.vmem [shape: f32[32,32], index: 4, kind: output, shape index: {}]  }
   0x1   :  { %119 = vmatprep.subr.bf16.mxu0 %v262_v0  ;;  %228 = vmatprep.subr.bf16.mxu1 %v262_v0  ;;  %v247_v1 = vld [vmem:[%s345_s1] sm:$0xff]   ;;  %v248_v2 = vld [vmem:[%s345_s1 + $0x8] sm:$0xff]   ;;  %v249_v3 = vld [vmem:[%s345_s1 + $0x10] sm:$0xff]  }
   0x2   :  { %120 = vmatpush1.bf16.msra.mxu0 %v247_v1  ;;  %237 = vmatpush1.bf16.msra.mxu1 %v247_v1  ;;  %v250_v4 = vld [vmem:[%s345_s1 + $0x18] sm:$0xff]   ;;  %v258_v5 = vld [vmem:[%s346_s0 + $0x4] ss:$8 sps:$4 sm:$0xff]   ;;  %v253_v9 = vld [vmem:[%s345_s1 + $0x30] sm:$0xff]  }
   0x3   :  { %121 = vmatprep.subr.bf16.mxu0 %v262_v0  ;;  %229 = vmatprep.subr.bf16.mxu1 %v262_v0  ;;  %v261_v6 = vld [vmem:[%s346_s0 + $0x14] ss:$8 sps:$4 sm:$0xff]   ;;  %v251_v7 = vld [vmem:[%s345_s1 + $0x20] sm:$0xff]   ;;  %v252_v8 = vld [vmem:[%s345_s1 + $0x28] sm:$0xff]  }
   0x4   :  { %224 = vmatprep.mubr.msk.bf16.mxu0 %vm112_vm0, %v258_v5  ;;  %225 = vmatprep.mubr.msk.bf16.mxu1 %vm112_vm0, %v261_v6  ;;  %v254_v10 = vld [vmem:[%s345_s1 + $0x38] sm:$0xff]   ;;  %v255_v11 = vld [vmem:[%s345_s1 + $0x40] sm:$0xff]  }
   0x5   :  { %v256_v12 = vld [vmem:[%s346_s0] ss:$8 sps:$4 sm:$0xff]   ;;  %v259_v13 = vld [vmem:[%s346_s0 + $0x10] ss:$8 sps:$4 sm:$0xff]  }
   0x6   :  { %122 = vmatpush1.bf16.msra.mxu0 %v248_v2  ;;  %238 = vmatpush1.bf16.msra.mxu1 %v248_v2  ;;  %v226_v15 = vld [vmem:[%s347_s2] ss:$0 sm:$0xff] }
   0x7   :  { %123 = vmatprep.subr.bf16.mxu0 %v262_v0  ;;  %230 = vmatprep.subr.bf16.mxu1 %v262_v0  ;;  %v227_v21 = vld [vmem:[%s348_s3] ss:$0 sm:$0xff] }
   0xa   :  { %124 = vmatpush1.bf16.msra.mxu0 %v249_v3  ;;  %239 = vmatpush1.bf16.msra.mxu1 %v249_v3 }
   0xb   :  { %125 = vmatprep.subr.bf16.mxu0 %v262_v0  ;;  %231 = vmatprep.subr.bf16.mxu1 %v262_v0 }
   0xe   :  { %126 = vmatpush1.bf16.msra.mxu0 %v250_v4  ;;  %240 = vmatpush1.bf16.msra.mxu1 %v250_v4 }
   0xf   :  { %127 = vmatprep.subr.bf16.mxu0 %v262_v0  ;;  %232 = vmatprep.subr.bf16.mxu1 %v262_v0 }
  0x12   :  { %128 = vmatpush1.bf16.msra.mxu0 %v251_v7  ;;  %241 = vmatpush1.bf16.msra.mxu1 %v251_v7 }
  0x13   :  { %129 = vmatprep.subr.bf16.mxu0 %v262_v0  ;;  %233 = vmatprep.subr.bf16.mxu1 %v262_v0 }
  0x16   :  { %130 = vmatpush1.bf16.msra.mxu0 %v252_v8  ;;  %242 = vmatpush1.bf16.msra.mxu1 %v252_v8 }
  0x17   :  { %131 = vmatprep.subr.bf16.mxu0 %v262_v0  ;;  %234 = vmatprep.subr.bf16.mxu1 %v262_v0 }
  0x1a   :  { %132 = vmatpush1.bf16.msra.mxu0 %v253_v9  ;;  %243 = vmatpush1.bf16.msra.mxu1 %v253_v9 }
  0x1b   :  { %133 = vmatprep.subr.bf16.mxu0 %v262_v0  ;;  %235 = vmatprep.subr.bf16.mxu1 %v262_v0 }
  0x1e   :  { %134 = vmatpush1.bf16.msra.mxu0 %v254_v10  ;;  %244 = vmatpush1.bf16.msra.mxu1 %v254_v10 }
  0x1f   :  { %135 = vmatprep.subr.bf16.mxu0 %v262_v0  ;;  %236 = vmatprep.subr.bf16.mxu1 %v262_v0 }
  0x22   :  { %136 = vmatpush1.bf16.msra.mxu0 %v255_v11  ;;  %245 = vmatpush1.bf16.msra.mxu1 %v255_v11 }
  0x25   :  { %152 = vmatmul.mubr.bf16.vlgmr.msra.gmra.mrb[0].mxu0 %v256_v12  ;;  %160 = vmatmul.mubr.bf16.vlgmr.msra.gmra.mrb[0].mxu1 %v259_v13 }
  0xf8   :  { %v153_v14 = vpop.f32.mrb[0].mxu0  ;;  %v161_v16 = vpop.f32.mrb[0].mxu1 }
  0xf9   :  { %vm170_vm1 = vcmp.ge.f32.partialorder %v153_v14, 0.0  ;;  %v174_v17 = vmul.f32 0.2, %v153_v14  ;;  %vm172_vm2 = vcmp.ge.f32.partialorder %v161_v16, 0.0  ;;  %v176_v18 = vmul.f32 0.2, %v161_v16 }
  0xfa   :  { %v155_v19 = vpop.f32.mrb[1].mxu0  ;;  %v163_v20 = vpop.f32.mrb[1].mxu1 }
  0xfb   :  { %v178_v22 = vsel %vm170_vm1, %v153_v14, %v174_v17  ;;  %v180_v23 = vsel %vm172_vm2, %v161_v16, %v176_v18  ;;  %v156_v24 = vpop.f32.mrb[2].mxu0  ;;  %v164_v25 = vpop.f32.mrb[2].mxu1 }
  0xfc   :  { %v188_v26 = vmul.f32 %v226_v15, %v178_v22  ;;  %v190_v27 = vmul.f32 %v226_v15, %v180_v23  ;;  %vm171_vm3 = vcmp.ge.f32.partialorder %v156_v24, 0.0  ;;  %v175_v28 = vmul.f32 0.2, %v156_v24  ;;  %v158_v29 = vpop.f32.mrb[3].mxu0  ;;  %v166_v30 = vpop.f32.mrb[3].mxu1 }
  0xfd   :  { %vm173_vm5 = vcmp.ge.f32.partialorder %v164_v25, 0.0  ;;  %v177_v31 = vmul.f32 0.2, %v164_v25 }
  0xfe   :  { %v198_v32 = vadd.f32 %v227_v21, %v188_v26  ;;  %v200_v33 = vadd.f32 %v227_v21, %v190_v27  ;;  %v179_v34 = vsel %vm171_vm3, %v156_v24, %v175_v28 }
  0xff   :  { %v189_v35 = vmul.f32 %v226_v15, %v179_v34  ;;  %v181_v36 = vsel %vm173_vm5, %v164_v25, %v177_v31 }
 0x100   :  { %203 = vst.msk [vmem:[%s349_s4] sm:$0xff] %vm202_vm4, %v198_v32  ;;  %205 = vst.msk [vmem:[%s349_s4 + $0x10] sm:$0xff] %vm202_vm4, %v200_v33  ;;  %v191_v37 = vmul.f32 %v226_v15, %v181_v36 }
 0x101   :  { %v199_v38 = vadd.f32 %v227_v21, %v189_v35 }
 0x102   :  { %v201_v39 = vadd.f32 %v227_v21, %v191_v37 }
 0x103   :  { %204 = vst.msk [vmem:[%s349_s4 + $0x8] sm:$0xff] %vm202_vm4, %v199_v38 }
 0x104   :  { %206 = vst.msk [vmem:[%s349_s4 + $0x18] sm:$0xff] %vm202_vm4, %v201_v39 }

// kernel: res_generator_forward.21
= control target key start
LH: loop header
LB: loop body
LE: loop exit
PB: predicated region body
PF: predicated region fallthrough
CT: control target
= control target key end

     0   :  { %vm200_vm0 = vcmask 261120   ;;  %s562_s1 = inlined_call_operand.vmem [shape: bf16[288,32], index: 1, kind: input, shape index: {}]   ;;  %s563_s0 = inlined_call_operand.vmem [shape: bf16[32,288], index: 0, kind: input, shape index: {}]   ;;  %s564_s2 = inlined_call_operand.vmem [shape: f32[1,32], index: 2, kind: input, shape index: {}]   ;;  %s565_s3 = inlined_call_operand.vmem [shape: f32[1,32], index: 3, kind: input, shape index: {}]   ;;  %s566_s4 = inlined_call_operand.vmem [shape: f32[32,32], index: 4, kind: output, shape index: {}]  }
   0x1   :  { %v415_v0 = vld [vmem:[%s562_s1 + $0x40] sm:$0xff]   ;;  %v417_v2 = vld [vmem:[%s562_s1 + $0x48] sm:$0xff]   ;;  %v419_v4 = vld [vmem:[%s562_s1 + $0x50] sm:$0xff]  }
   0x2   :  { %v416_v1 = vld [vmem:[%s562_s1] sm:$0xff]   ;;  %375 = vmatprep.subr.bf16.mxu0 %v415_v0  ;;  %v418_v3 = vld [vmem:[%s562_s1 + $0x8] sm:$0xff]   ;;  %v420_v5 = vld [vmem:[%s562_s1 + $0x10] sm:$0xff]  }
   0x3   :  { %376 = vmatpush3.bf16.msra.mxu0 %v416_v1  ;;  %v421_v6 = vld [vmem:[%s562_s1 + $0x58] sm:$0xff]   ;;  %v423_v8 = vld [vmem:[%s562_s1 + $0x60] sm:$0xff]   ;;  %v425_v11 = vld [vmem:[%s562_s1 + $0x68] sm:$0xff]  }
   0x4   :  { %377 = vmatprep.subr.bf16.mxu0 %v417_v2  ;;  %v422_v7 = vld [vmem:[%s562_s1 + $0x18] sm:$0xff]   ;;  %v429_v9 = vld [vmem:[%s562_s1 + $0x80] sm:$0xff]   ;;  %v426_v12 = vld [vmem:[%s562_s1 + $0x28] sm:$0xff]  }
   0x5   :  { %v424_v10 = vld [vmem:[%s562_s1 + $0x20] sm:$0xff]   ;;  %407 = vmatprep.subr.bf16.mxu1 %v429_v9  ;;  %v432_v13 = vld [vmem:[%s562_s1 + $0x88] sm:$0xff]   ;;  %v427_v14 = vld [vmem:[%s562_s1 + $0x70] sm:$0xff]  }
   0x6   :  { %408 = vmatpush3.bf16.msra.mxu1 %v429_v9  ;;  %v435_v15 = vld [vmem:[%s563_s0 + $0x4] ss:$12 sps:$4 sm:$0xff]   ;;  %v436_v16 = vld [vmem:[%s563_s0 + $0x8] ss:$12 sps:$4 sm:$0xff]   ;;  %v437_v17 = vld [vmem:[%s563_s0 + $0x20] ss:$12 sps:$4 sm:$0xff]  }
   0x7   :  { %378 = vmatpush3.bf16.msra.mxu0 %v418_v3  ;;  %409 = vmatprep.subr.bf16.mxu1 %v432_v13  ;;  %v428_v18 = vld [vmem:[%s562_s1 + $0x30] sm:$0xff]   ;;  %v430_v19 = vld [vmem:[%s562_s1 + $0x78] sm:$0xff]   ;;  %v433_v21 = vld [vmem:[%s563_s0] ss:$12 sps:$4 sm:$0xff]  }
   0x8   :  { %379 = vmatprep.subr.bf16.mxu0 %v419_v4  ;;  %239 = vmatprep.mubr.bf16.mxu0 %v435_v15  ;;  %v431_v20 = vld [vmem:[%s562_s1 + $0x38] sm:$0xff]   ;;  %v373_v35 = vld [vmem:[%s564_s2] ss:$0 sm:$0xff] }
   0x9   :  { %411 = vmatprep.mubr.msk.bf16.mxu1 %vm200_vm0, %v436_v16  ;;  %v438_v22 = vld [vmem:[%s563_s0 + $0x1c] ss:$12 sps:$4 sm:$0xff]   ;;  %v440_v23 = vld [vmem:[%s563_s0 + $0x18] ss:$12 sps:$4 sm:$0xff]   ;;  %v374_v38 = vld [vmem:[%s565_s3] ss:$0 sm:$0xff] }
   0xa   :  { %410 = vmatpush3.bf16.msra.mxu1 %v432_v13 }
   0xb   :  { %380 = vmatpush3.bf16.msra.mxu0 %v420_v5 }
   0xc   :  { %381 = vmatprep.subr.bf16.mxu0 %v421_v6 }
   0xd   :  { %412 = vmatmul.mubr.msk.bf16.vlgmr.msra.gmra.mrb[0].mxu1 %vm200_vm0, %v437_v17 }
   0xf   :  { %382 = vmatpush3.bf16.msra.mxu0 %v422_v7 }
  0x10   :  { %383 = vmatprep.subr.bf16.mxu0 %v423_v8 }
  0x13   :  { %384 = vmatpush3.bf16.msra.mxu0 %v424_v10 }
  0x14   :  { %385 = vmatprep.subr.bf16.mxu0 %v425_v11 }
  0x17   :  { %386 = vmatpush3.bf16.msra.mxu0 %v426_v12 }
  0x18   :  { %387 = vmatprep.subr.bf16.mxu0 %v427_v14 }
  0x1b   :  { %388 = vmatpush3.bf16.msra.mxu0 %v428_v18 }
  0x1c   :  { %389 = vmatprep.subr.bf16.mxu0 %v430_v19 }
  0x1f   :  { %390 = vmatpush3.bf16.msra.mxu0 %v431_v20 }
  0x22   :  { %240 = vmatmul.mubr.bf16.vlgmr.msra.gmra.mrb[0].mxu0 %v433_v21 }
  0x23   :  { %247 = vmatprep.mubr.bf16.mxu0 %v438_v22 }
  0x2a   :  { %248 = vmatmul.mubr.bf16.gmra.mrb[4].mxu0 %v440_v23 }
  0xe0   :  { %v413_v24 = vpop.f32.mrb[0].mxu1 }
  0xe1   :  { %v290_v25 = vpop.f32.mrb[1].mxu1 }
  0xe2   :  { %v414_v26 = vpop.f32.mrb[2].mxu1 }
  0xe3   :  { %v293_v27 = vpop.f32.mrb[3].mxu1 }
  0xf5   :  { %v391_v28 = vpop.f32.mrb[0].mxu0 }
  0xf6   :  { %v392_v29 = vpop.f32.mrb[1].mxu0 }
  0xf7   :  { %v393_v30 = vadd.f32 %v392_v29, %v391_v28  ;;  %v394_v31 = vpop.f32.mrb[2].mxu0 }
  0xf8   :  { %v395_v32 = vpop.f32.mrb[3].mxu0 }
  0xf9   :  { %v396_v33 = vadd.f32 %v395_v32, %v394_v31  ;;  %v291_v34 = vadd.f32 %v393_v30, %v290_v25 }
  0xfb   :  { %vm307_vm1 = vcmp.ge.f32.partialorder %v291_v34, 0.0  ;;  %v311_v36 = vmul.f32 0.2, %v291_v34  ;;  %v294_v37 = vadd.f32 %v396_v33, %v293_v27 }
  0xfd   :  { %v315_v39 = vsel %vm307_vm1, %v291_v34, %v311_v36  ;;  %vm308_vm2 = vcmp.ge.f32.partialorder %v294_v37, 0.0  ;;  %v312_v40 = vmul.f32 0.2, %v294_v37  ;;  %v397_v41 = vpop.f32.mrb[4].mxu0 }
  0xfe   :  { %v325_v42 = vmul.f32 %v373_v35, %v315_v39  ;;  %v398_v43 = vpop.f32.mrb[5].mxu0 }
  0xff   :  { %v316_v44 = vsel %vm308_vm2, %v294_v37, %v312_v40  ;;  %v399_v45 = vadd.f32 %v398_v43, %v397_v41  ;;  %v400_v46 = vpop.f32.mrb[6].mxu0 }
 0x100   :  { %v335_v47 = vadd.f32 %v374_v38, %v325_v42  ;;  %v326_v48 = vmul.f32 %v373_v35, %v316_v44  ;;  %v401_v49 = vpop.f32.mrb[7].mxu0 }
 0x101   :  { %v299_v50 = vadd.f32 %v413_v24, %v399_v45  ;;  %v402_v51 = vadd.f32 %v401_v49, %v400_v46 }
 0x102   :  { %339 = vst.msk [vmem:[%s566_s4] sm:$0xff] %vm200_vm0, %v335_v47  ;;  %v336_v52 = vadd.f32 %v374_v38, %v326_v48 }
 0x103   :  { %vm309_vm3 = vcmp.ge.f32.partialorder %v299_v50, 0.0  ;;  %v313_v53 = vmul.f32 0.2, %v299_v50  ;;  %v302_v54 = vadd.f32 %v414_v26, %v402_v51 }
 0x104   :  { %340 = vst.msk [vmem:[%s566_s4 + $0x8] sm:$0xff] %vm200_vm0, %v336_v52 }
 0x105   :  { %v317_v55 = vsel %vm309_vm3, %v299_v50, %v313_v53  ;;  %vm310_vm4 = vcmp.ge.f32.partialorder %v302_v54, 0.0  ;;  %v314_v56 = vmul.f32 0.2, %v302_v54 }
 0x106   :  { %v327_v57 = vmul.f32 %v373_v35, %v317_v55 }
 0x107   :  { %v318_v58 = vsel %vm310_vm4, %v302_v54, %v314_v56 }
 0x108   :  { %v337_v59 = vadd.f32 %v374_v38, %v327_v57  ;;  %v328_v60 = vmul.f32 %v373_v35, %v318_v58 }
 0x10a   :  { %341 = vst.msk [vmem:[%s566_s4 + $0x10] sm:$0xff] %vm200_vm0, %v337_v59  ;;  %v338_v61 = vadd.f32 %v374_v38, %v328_v60 }
 0x10c   :  { %342 = vst.msk [vmem:[%s566_s4 + $0x18] sm:$0xff] %vm200_vm0, %v338_v61 }

// kernel: res_generator_forward.22
= control target key start
LH: loop header
LB: loop body
LE: loop exit
PB: predicated region body
PF: predicated region fallthrough
CT: control target
= control target key end

     0   :  { %vm203_vm0 = vcmask 261120   ;;  %s590_s1 = inlined_call_operand.vmem [shape: bf16[288,32], index: 1, kind: input, shape index: {}]   ;;  %s591_s0 = inlined_call_operand.vmem [shape: bf16[32,288], index: 0, kind: input, shape index: {}]   ;;  %s592_s2 = inlined_call_operand.vmem [shape: f32[1,32], index: 2, kind: input, shape index: {}]   ;;  %s593_s3 = inlined_call_operand.vmem [shape: f32[1,32], index: 3, kind: input, shape index: {}]   ;;  %s594_s4 = inlined_call_operand.vmem [shape: f32[32,32], index: 4, kind: input, shape index: {}]   ;;  %s595_s5 = inlined_call_operand.vmem [shape: f32[32,32], index: 5, kind: output, shape index: {}]  }
   0x1   :  { %v426_v0 = vld [vmem:[%s590_s1 + $0x40] sm:$0xff]   ;;  %v428_v2 = vld [vmem:[%s590_s1 + $0x48] sm:$0xff]   ;;  %v430_v4 = vld [vmem:[%s590_s1 + $0x50] sm:$0xff]  }
   0x2   :  { %v427_v1 = vld [vmem:[%s590_s1] sm:$0xff]   ;;  %386 = vmatprep.subr.bf16.mxu0 %v426_v0  ;;  %v429_v3 = vld [vmem:[%s590_s1 + $0x8] sm:$0xff]   ;;  %v431_v5 = vld [vmem:[%s590_s1 + $0x10] sm:$0xff]  }
   0x3   :  { %387 = vmatpush3.bf16.msra.mxu0 %v427_v1  ;;  %v432_v6 = vld [vmem:[%s590_s1 + $0x58] sm:$0xff]   ;;  %v434_v8 = vld [vmem:[%s590_s1 + $0x60] sm:$0xff]   ;;  %v436_v11 = vld [vmem:[%s590_s1 + $0x68] sm:$0xff]  }
   0x4   :  { %388 = vmatprep.subr.bf16.mxu0 %v428_v2  ;;  %v433_v7 = vld [vmem:[%s590_s1 + $0x18] sm:$0xff]   ;;  %v440_v9 = vld [vmem:[%s590_s1 + $0x80] sm:$0xff]   ;;  %v437_v12 = vld [vmem:[%s590_s1 + $0x28] sm:$0xff]  }
   0x5   :  { %v435_v10 = vld [vmem:[%s590_s1 + $0x20] sm:$0xff]   ;;  %418 = vmatprep.subr.bf16.mxu1 %v440_v9  ;;  %v443_v13 = vld [vmem:[%s590_s1 + $0x88] sm:$0xff]   ;;  %v438_v14 = vld [vmem:[%s590_s1 + $0x70] sm:$0xff]  }
   0x6   :  { %419 = vmatpush3.bf16.msra.mxu1 %v440_v9  ;;  %v446_v15 = vld [vmem:[%s591_s0 + $0x4] ss:$12 sps:$4 sm:$0xff]   ;;  %v447_v16 = vld [vmem:[%s591_s0 + $0x8] ss:$12 sps:$4 sm:$0xff]   ;;  %v448_v17 = vld [vmem:[%s591_s0 + $0x20] ss:$12 sps:$4 sm:$0xff]  }
   0x7   :  { %389 = vmatpush3.bf16.msra.mxu0 %v429_v3  ;;  %420 = vmatprep.subr.bf16.mxu1 %v443_v13  ;;  %v439_v18 = vld [vmem:[%s590_s1 + $0x30] sm:$0xff]   ;;  %v441_v19 = vld [vmem:[%s590_s1 + $0x78] sm:$0xff]   ;;  %v444_v21 = vld [vmem:[%s591_s0] ss:$12 sps:$4 sm:$0xff]  }
   0x8   :  { %390 = vmatprep.subr.bf16.mxu0 %v430_v4  ;;  %242 = vmatprep.mubr.bf16.mxu0 %v446_v15  ;;  %v442_v20 = vld [vmem:[%s590_s1 + $0x38] sm:$0xff]   ;;  %v384_v35 = vld [vmem:[%s592_s2] ss:$0 sm:$0xff]  ;;  %v343_v51 = vld [vmem:[%s594_s4 + $0x8] sm:$0xff] }
   0x9   :  { %422 = vmatprep.mubr.msk.bf16.mxu1 %vm203_vm0, %v447_v16  ;;  %v449_v22 = vld [vmem:[%s591_s0 + $0x1c] ss:$12 sps:$4 sm:$0xff]   ;;  %v451_v23 = vld [vmem:[%s591_s0 + $0x18] ss:$12 sps:$4 sm:$0xff]   ;;  %v385_v38 = vld [vmem:[%s593_s3] ss:$0 sm:$0xff] }
   0xa   :  { %421 = vmatpush3.bf16.msra.mxu1 %v443_v13  ;;  %v342_v44 = vld [vmem:[%s594_s4] sm:$0xff]  ;;  %v344_v62 = vld [vmem:[%s594_s4 + $0x10] sm:$0xff]  ;;  %v345_v2 = vld [vmem:[%s594_s4 + $0x18] sm:$0xff] }
   0xb   :  { %391 = vmatpush3.bf16.msra.mxu0 %v431_v5 }
   0xc   :  { %392 = vmatprep.subr.bf16.mxu0 %v432_v6 }
   0xd   :  { %423 = vmatmul.mubr.msk.bf16.vlgmr.msra.gmra.mrb[0].mxu1 %vm203_vm0, %v448_v17 }
   0xf   :  { %393 = vmatpush3.bf16.msra.mxu0 %v433_v7 }
  0x10   :  { %394 = vmatprep.subr.bf16.mxu0 %v434_v8 }
  0x13   :  { %395 = vmatpush3.bf16.msra.mxu0 %v435_v10 }
  0x14   :  { %396 = vmatprep.subr.bf16.mxu0 %v436_v11 }
  0x17   :  { %397 = vmatpush3.bf16.msra.mxu0 %v437_v12 }
  0x18   :  { %398 = vmatprep.subr.bf16.mxu0 %v438_v14 }
  0x1b   :  { %399 = vmatpush3.bf16.msra.mxu0 %v439_v18 }
  0x1c   :  { %400 = vmatprep.subr.bf16.mxu0 %v441_v19 }
  0x1f   :  { %401 = vmatpush3.bf16.msra.mxu0 %v442_v20 }
  0x22   :  { %243 = vmatmul.mubr.bf16.vlgmr.msra.gmra.mrb[0].mxu0 %v444_v21 }
  0x23   :  { %250 = vmatprep.mubr.bf16.mxu0 %v449_v22 }
  0x2a   :  { %251 = vmatmul.mubr.bf16.gmra.mrb[4].mxu0 %v451_v23 }
  0xe0   :  { %v424_v24 = vpop.f32.mrb[0].mxu1 }
  0xe1   :  { %v293_v25 = vpop.f32.mrb[1].mxu1 }
  0xe2   :  { %v425_v26 = vpop.f32.mrb[2].mxu1 }
  0xe3   :  { %v296_v27 = vpop.f32.mrb[3].mxu1 }
  0xf5   :  { %v402_v28 = vpop.f32.mrb[0].mxu0 }
  0xf6   :  { %v403_v29 = vpop.f32.mrb[1].mxu0 }
  0xf7   :  { %v404_v30 = vadd.f32 %v403_v29, %v402_v28  ;;  %v405_v31 = vpop.f32.mrb[2].mxu0 }
  0xf8   :  { %v406_v32 = vpop.f32.mrb[3].mxu0 }
  0xf9   :  { %v407_v33 = vadd.f32 %v406_v32, %v405_v31  ;;  %v294_v34 = vadd.f32 %v404_v30, %v293_v25 }
  0xfb   :  { %vm310_vm1 = vcmp.ge.f32.partialorder %v294_v34, 0.0  ;;  %v314_v36 = vmul.f32 0.2, %v294_v34  ;;  %v297_v37 = vadd.f32 %v407_v33, %v296_v27 }
  0xfd   :  { %v318_v39 = vsel %vm310_vm1, %v294_v34, %v314_v36  ;;  %vm311_vm2 = vcmp.ge.f32.partialorder %v297_v37, 0.0  ;;  %v315_v40 = vmul.f32 0.2, %v297_v37  ;;  %v408_v41 = vpop.f32.mrb[4].mxu0 }
  0xfe   :  { %v328_v42 = vmul.f32 %v384_v35, %v318_v39  ;;  %v409_v43 = vpop.f32.mrb[5].mxu0 }
  0xff   :  { %v319_v45 = vsel %vm311_vm2, %v297_v37, %v315_v40  ;;  %v410_v46 = vadd.f32 %v409_v43, %v408_v41  ;;  %v411_v47 = vpop.f32.mrb[6].mxu0 }
 0x100   :  { %v338_v48 = vadd.f32 %v385_v38, %v328_v42  ;;  %v329_v49 = vmul.f32 %v384_v35, %v319_v45  ;;  %v412_v50 = vpop.f32.mrb[7].mxu0 }
 0x101   :  { %v302_v52 = vadd.f32 %v424_v24, %v410_v46  ;;  %v413_v53 = vadd.f32 %v412_v50, %v411_v47 }
 0x102   :  { %v346_v54 = vadd.f32 %v342_v44, %v338_v48  ;;  %v339_v55 = vadd.f32 %v385_v38, %v329_v49 }
 0x103   :  { %vm312_vm3 = vcmp.ge.f32.partialorder %v302_v52, 0.0  ;;  %v316_v56 = vmul.f32 0.2, %v302_v52  ;;  %v305_v57 = vadd.f32 %v425_v26, %v413_v53 }
 0x104   :  { %350 = vst.msk [vmem:[%s595_s5] sm:$0xff] %vm203_vm0, %v346_v54  ;;  %v347_v58 = vadd.f32 %v343_v51, %v339_v55 }
 0x105   :  { %v320_v59 = vsel %vm312_vm3, %v302_v52, %v316_v56  ;;  %vm313_vm4 = vcmp.ge.f32.partialorder %v305_v57, 0.0  ;;  %v317_v60 = vmul.f32 0.2, %v305_v57 }
 0x106   :  { %351 = vst.msk [vmem:[%s595_s5 + $0x8] sm:$0xff] %vm203_vm0, %v347_v58  ;;  %v330_v61 = vmul.f32 %v384_v35, %v320_v59 }
 0x107   :  { %v321_v63 = vsel %vm313_vm4, %v305_v57, %v317_v60 }
 0x108   :  { %v340_v0 = vadd.f32 %v385_v38, %v330_v61  ;;  %v331_v1 = vmul.f32 %v384_v35, %v321_v63 }
 0x10a   :  { %v348_v3 = vadd.f32 %v344_v62, %v340_v0  ;;  %v341_v4 = vadd.f32 %v385_v38, %v331_v1 }
 0x10c   :  { %352 = vst.msk [vmem:[%s595_s5 + $0x10] sm:$0xff] %vm203_vm0, %v348_v3  ;;  %v349_v5 = vadd.f32 %v345_v2, %v341_v4 }
 0x10e   :  { %353 = vst.msk [vmem:[%s595_s5 + $0x18] sm:$0xff] %vm203_vm0, %v349_v5 }

// kernel: tile.23
= control target key start
LH: loop header
LB: loop body
LE: loop exit
PB: predicated region body
PF: predicated region fallthrough
CT: control target
= control target key end

     0   :  { %s22_s0 = inlined_call_operand.vmem [shape: f32[16], index: 0, kind: input, shape index: {}]   ;;  %s23_s1 = inlined_call_operand.vmem [shape: f32[4,16], index: 1, kind: output, shape index: {}]  }
   0x1   :  { %v4_v0 = vld [vmem:[%s22_s0] ss:$0 sm:$0xff] }
   0x2   :  { %5 = vst [vmem:[%s23_s1] sm:$0xf] %v4_v0 }

// kernel: tile.28
= control target key start
LH: loop header
LB: loop body
LE: loop exit
PB: predicated region body
PF: predicated region fallthrough
CT: control target
= control target key end

     0   :  { %vm7_vm0 = vcmask 130048   ;;  %s37_s8 = smov 16   ;;  %s38_s9 = smov 32   ;;  %vm13_vm1 = vcmask 523648   ;;  %vm19_vm2 = vcmask 392448   ;;  %vm25_vm3 = vcmask 261248   ;;  %s55_s0 = inlined_call_operand.vmem [shape: f32[4,16], index: 0, kind: input, shape index: {}]   ;;  %s56_s1 = inlined_call_operand.vmem [shape: f32[1,64], index: 1, kind: output, shape index: {}]  }
   0x1   :  { %v4_v0 = vld [vmem:[%s55_s0] sm:$0xf]  ;;  %s36_s0 = smov 48  }
   0x2   :  { %5 = vst [vmem:[#allocation1] sm:$0xf] %v4_v0 }
   0x9   :  { %v10_v1 = vld [vmem:[#allocation1 + $0x3] sm:$0x1]   ;;  %v22_v2 = vld [vmem:[#allocation1 + $0x1] sm:$0x1]   ;;  %v6_v3 = vld [vmem:[#allocation1] sm:$0x1]  }
   0xa   :  { %11 = vrot.lane.b32.xlu0 %v10_v1, %s36_s0  ;;  %23 = vrot.lane.b32.xlu1 %v22_v2, %s37_s8  ;;  %v16_v4 = vld [vmem:[#allocation1 + $0x2] sm:$0x1]   ;;  %8 = vst.msk [vmem:[#allocation0] sm:$0x1] %vm7_vm0, %v6_v3  }
   0xe   :  { %17 = vrot.lane.b32.xlu0 %v16_v4, %s38_s9 }
  0x7c   :  { %v12_v5 = vpop.permute.xlu0 %11   ;;  %v24_v6 = vpop.permute.xlu1 %23  }
  0x7d   :  { %14 = vst.msk [vmem:[#allocation0] sm:$0x1] %vm13_vm1, %v12_v5  }
  0x80   :  { %v18_v7 = vpop.permute.xlu0 %17  }
  0x81   :  { %20 = vst.msk [vmem:[#allocation0] sm:$0x1] %vm19_vm2, %v18_v7  }
  0x82   :  { %26 = vst.msk [vmem:[#allocation0] sm:$0x1] %vm25_vm3, %v24_v6  }
  0x89   :  { %v30_v8 = vld [vmem:[#allocation0] sm:$0x1] }
  0x8a   :  { %32 = vst [vmem:[%s56_s1] sm:$0x1] %v30_v8 }

// kernel: res_generator_forward.33
= control target key start
LH: loop header
LB: loop body
LE: loop exit
PB: predicated region body
PF: predicated region fallthrough
CT: control target
= control target key end

     0   :  { %vm181_vm4 = vcmask 523264   ;;  %s315_s1 = inlined_call_operand.vmem [shape: bf16[128,64], index: 1, kind: input, shape index: {}]   ;;  %s316_s0 = inlined_call_operand.vmem [shape: bf16[32,128], index: 0, kind: input, shape index: {}]   ;;  %s317_s2 = inlined_call_operand.vmem [shape: f32[1,64], index: 2, kind: input, shape index: {}]   ;;  %s318_s3 = inlined_call_operand.vmem [shape: f32[1,64], index: 3, kind: input, shape index: {}]   ;;  %s319_s4 = inlined_call_operand.vmem [shape: f32[32,64], index: 4, kind: output, shape index: {}]  }
   0x1   :  { %v232_v0 = vld [vmem:[%s315_s1] sm:$0xff]   ;;  %v233_v1 = vld [vmem:[%s315_s1 + $0x8] sm:$0xff]   ;;  %v234_v2 = vld [vmem:[%s315_s1 + $0x10] sm:$0xff]  }
   0x2   :  { %212 = vmatprep.subr.bf16.mxu0 %v232_v0  ;;  %v235_v3 = vld [vmem:[%s315_s1 + $0x18] sm:$0xff]   ;;  %v240_v4 = vld [vmem:[%s316_s0] sm:$0xff]   ;;  %v237_v6 = vld [vmem:[%s315_s1 + $0x28] sm:$0xff]  }
   0x3   :  { %213 = vmatpush3.bf16.msra.mxu0 %v232_v0  ;;  %228 = vmatprep.mubr.bf16.mxu0 %v240_v4  ;;  %v236_v5 = vld [vmem:[%s315_s1 + $0x20] sm:$0xff]   ;;  %v238_v7 = vld [vmem:[%s315_s1 + $0x30] sm:$0xff]   ;;  %v239_v8 = vld [vmem:[%s315_s1 + $0x38] sm:$0xff]  }
   0x4   :  { %214 = vmatprep.subr.bf16.mxu0 %v233_v1  ;;  %v241_v9 = vld [vmem:[%s316_s0 + $0x8] sm:$0xff]   ;;  %v200_v11 = vld [vmem:[%s317_s2] ss:$0 sm:$0xff] }
   0x5   :  { %v201_v16 = vld [vmem:[%s318_s3] ss:$0 sm:$0xff] }
   0x7   :  { %215 = vmatpush3.bf16.msra.mxu0 %v233_v1 }
   0x8   :  { %216 = vmatprep.subr.bf16.mxu0 %v234_v2 }
   0xb   :  { %217 = vmatpush3.bf16.msra.mxu0 %v234_v2 }
   0xc   :  { %218 = vmatprep.subr.bf16.mxu0 %v235_v3 }
   0xf   :  { %219 = vmatpush3.bf16.msra.mxu0 %v235_v3 }
  0x10   :  { %220 = vmatprep.subr.bf16.mxu0 %v236_v5 }
  0x13   :  { %221 = vmatpush3.bf16.msra.mxu0 %v236_v5 }
  0x14   :  { %222 = vmatprep.subr.bf16.mxu0 %v237_v6 }
  0x17   :  { %223 = vmatpush3.bf16.msra.mxu0 %v237_v6 }
  0x18   :  { %224 = vmatprep.subr.bf16.mxu0 %v238_v7 }
  0x1b   :  { %225 = vmatpush3.bf16.msra.mxu0 %v238_v7 }
  0x1c   :  { %226 = vmatprep.subr.bf16.mxu0 %v239_v8 }
  0x1f   :  { %227 = vmatpush3.bf16.msra.mxu0 %v239_v8 }
  0x22   :  { %229 = vmatmul.mubr.bf16.vlgmr.msra.gmra.mrb[0].mxu0 %v241_v9 }
  0xf5   :  { %v230_v10 = vpop.f32.mrb[0].mxu0 }
  0xf6   :  { %vm151_vm0 = vcmp.ge.f32.partialorder %v230_v10, 0.0  ;;  %v155_v12 = vmul.f32 0.2, %v230_v10  ;;  %v132_v13 = vpop.f32.mrb[1].mxu0 }
  0xf7   :  { %vm149_vm1 = vcmp.ge.f32.partialorder %v132_v13, 0.0  ;;  %v153_v14 = vmul.f32 0.2, %v132_v13  ;;  %v231_v15 = vpop.f32.mrb[2].mxu0 }
  0xf8   :  { %v159_v17 = vsel %vm151_vm0, %v230_v10, %v155_v12  ;;  %vm152_vm2 = vcmp.ge.f32.partialorder %v231_v15, 0.0  ;;  %v156_v18 = vmul.f32 0.2, %v231_v15  ;;  %v135_v19 = vpop.f32.mrb[3].mxu0 }
  0xf9   :  { %v169_v20 = vmul.f32 %v200_v11, %v159_v17  ;;  %v157_v21 = vsel %vm149_vm1, %v132_v13, %v153_v14  ;;  %vm150_vm3 = vcmp.ge.f32.partialorder %v135_v19, 0.0  ;;  %v154_v22 = vmul.f32 0.2, %v135_v19 }
  0xfa   :  { %v167_v23 = vmul.f32 %v200_v11, %v157_v21  ;;  %v160_v24 = vsel %vm152_vm2, %v231_v15, %v156_v18 }
  0xfb   :  { %v179_v25 = vadd.f32 %v201_v16, %v169_v20  ;;  %v170_v26 = vmul.f32 %v200_v11, %v160_v24  ;;  %v158_v27 = vsel %vm150_vm3, %v135_v19, %v154_v22 }
  0xfc   :  { %v177_v28 = vadd.f32 %v201_v16, %v167_v23  ;;  %v168_v29 = vmul.f32 %v200_v11, %v158_v27 }
  0xfd   :  { %184 = vst.msk [vmem:[%s319_s4 + $0x10] sm:$0xff] %vm181_vm4, %v179_v25  ;;  %v180_v30 = vadd.f32 %v201_v16, %v170_v26 }
  0xfe   :  { %182 = vst.msk [vmem:[%s319_s4] sm:$0xff] %vm181_vm4, %v177_v28  ;;  %v178_v31 = vadd.f32 %v201_v16, %v168_v29 }
  0xff   :  { %185 = vst.msk [vmem:[%s319_s4 + $0x18] sm:$0xff] %vm181_vm4, %v180_v30 }
 0x100   :  { %183 = vst.msk [vmem:[%s319_s4 + $0x8] sm:$0xff] %vm181_vm4, %v178_v31 }

// kernel: tile.33
= control target key start
LH: loop header
LB: loop body
LE: loop exit
PB: predicated region body
PF: predicated region fallthrough
CT: control target
= control target key end

     0   :  { %s22_s0 = inlined_call_operand.vmem [shape: f32[8], index: 0, kind: input, shape index: {}]   ;;  %s23_s1 = inlined_call_operand.vmem [shape: f32[4,8], index: 1, kind: output, shape index: {}]  }
   0x1   :  { %v4_v0 = vld [vmem:[%s22_s0] ss:$0 sm:$0xff] }
   0x2   :  { %5 = vst [vmem:[%s23_s1] sm:$0xf] %v4_v0 }

// kernel: tile.38
= control target key start
LH: loop header
LB: loop body
LE: loop exit
PB: predicated region body
PF: predicated region fallthrough
CT: control target
= control target key end

     0   :  { %vm7_vm0 = vcmask 64512   ;;  %s37_s8 = smov 8   ;;  %s38_s9 = smov 16   ;;  %vm13_vm1 = vcmask 261312   ;;  %vm19_vm2 = vcmask 195712   ;;  %vm25_vm3 = vcmask 130112   ;;  %s55_s0 = inlined_call_operand.vmem [shape: f32[4,8], index: 0, kind: input, shape index: {}]   ;;  %s56_s1 = inlined_call_operand.vmem [shape: f32[1,32], index: 1, kind: output, shape index: {}]  }
   0x1   :  { %v4_v0 = vld [vmem:[%s55_s0] sm:$0xf]  ;;  %s36_s0 = smov 24  }
   0x2   :  { %5 = vst [vmem:[#allocation1] sm:$0xf] %v4_v0 }
   0x9   :  { %v10_v1 = vld [vmem:[#allocation1 + $0x3] sm:$0x1]   ;;  %v22_v2 = vld [vmem:[#allocation1 + $0x1] sm:$0x1]   ;;  %v6_v3 = vld [vmem:[#allocation1] sm:$0x1]  }
   0xa   :  { %11 = vrot.lane.b32.xlu0 %v10_v1, %s36_s0  ;;  %23 = vrot.lane.b32.xlu1 %v22_v2, %s37_s8  ;;  %v16_v4 = vld [vmem:[#allocation1 + $0x2] sm:$0x1]   ;;  %8 = vst.msk [vmem:[#allocation0] sm:$0x1] %vm7_vm0, %v6_v3  }
   0xe   :  { %17 = vrot.lane.b32.xlu0 %v16_v4, %s38_s9 }
  0x7c   :  { %v12_v5 = vpop.permute.xlu0 %11   ;;  %v24_v6 = vpop.permute.xlu1 %23  }
  0x7d   :  { %14 = vst.msk [vmem:[#allocation0] sm:$0x1] %vm13_vm1, %v12_v5  }
  0x80   :  { %v18_v7 = vpop.permute.xlu0 %17  }
  0x81   :  { %20 = vst.msk [vmem:[#allocation0] sm:$0x1] %vm19_vm2, %v18_v7  }
  0x82   :  { %26 = vst.msk [vmem:[#allocation0] sm:$0x1] %vm25_vm3, %v24_v6  }
  0x89   :  { %v30_v8 = vld [vmem:[#allocation0] sm:$0x1] }
  0x8a   :  { %32 = vst [vmem:[%s56_s1] sm:$0x1] %v30_v8 }

// kernel: res_generator_forward.34
= control target key start
LH: loop header
LB: loop body
LE: loop exit
PB: predicated region body
PF: predicated region fallthrough
CT: control target
= control target key end

     0   :  { %vm106_vm0 = vcmask 523264   ;;  %vm322_vm3 = vcmask 261120   ;;  %s600_s1 = inlined_call_operand.vmem [shape: bf16[64,32], index: 1, kind: input, shape index: {}]   ;;  %s601_s0 = inlined_call_operand.vmem [shape: bf16[128,64], index: 0, kind: input, shape index: {}]   ;;  %s602_s2 = inlined_call_operand.vmem [shape: f32[1,32], index: 2, kind: input, shape index: {}]   ;;  %s603_s3 = inlined_call_operand.vmem [shape: f32[1,32], index: 3, kind: input, shape index: {}]   ;;  %s604_s4 = inlined_call_operand.vmem [shape: f32[128,32], index: 4, kind: output, shape index: {}]  }
   0x1   :  { %v409_v0 = vld [vmem:[%s600_s1] sm:$0xff]   ;;  %v410_v1 = vld [vmem:[%s600_s1 + $0x8] sm:$0xff]   ;;  %v411_v2 = vld [vmem:[%s600_s1 + $0x10] sm:$0xff]  }
   0x2   :  { %377 = vmatprep.subr.bf16.mxu0 %v409_v0  ;;  %401 = vmatprep.subr.bf16.mxu1 %v409_v0  ;;  %v413_v3 = vld [vmem:[%s601_s0] sm:$0xff]   ;;  %v412_v5 = vld [vmem:[%s600_s1 + $0x18] sm:$0xff]   ;;  %v415_v6 = vld [vmem:[%s601_s0 + $0x8] sm:$0xff]  }
   0x3   :  { %378 = vmatpush3.bf16.msra.mxu0 %v409_v0  ;;  %405 = vmatpush3.bf16.msra.mxu1 %v409_v0  ;;  %v414_v4 = vld [vmem:[%s601_s0 + $0x20] sm:$0xff]   ;;  %v416_v7 = vld [vmem:[%s601_s0 + $0x28] sm:$0xff]   ;;  %v417_v8 = vld [vmem:[%s601_s0 + $0x10] sm:$0xff]  }
   0x4   :  { %379 = vmatprep.subr.bf16.mxu0 %v410_v1  ;;  %402 = vmatprep.subr.bf16.mxu1 %v410_v1  ;;  %v418_v9 = vld [vmem:[%s601_s0 + $0x30] sm:$0xff]   ;;  %v419_v10 = vld [vmem:[%s601_s0 + $0x18] sm:$0xff]   ;;  %v493_v13 = vld [vmem:[%s602_s2] ss:$0 sm:$0xff] }
   0x5   :  { %385 = vmatprep.mubr.msk.bf16.mxu0 %vm106_vm0, %v413_v3  ;;  %393 = vmatprep.mubr.msk.bf16.mxu1 %vm106_vm0, %v414_v4  ;;  %v420_v11 = vld [vmem:[%s601_s0 + $0x38] sm:$0xff]   ;;  %v498_v17 = vld [vmem:[%s603_s3] ss:$0 sm:$0xff] }
   0x7   :  { %380 = vmatpush3.bf16.msra.mxu0 %v410_v1  ;;  %406 = vmatpush3.bf16.msra.mxu1 %v410_v1 }
   0x8   :  { %381 = vmatprep.subr.bf16.mxu0 %v411_v2  ;;  %403 = vmatprep.subr.bf16.mxu1 %v411_v2 }
   0xb   :  { %382 = vmatpush3.bf16.msra.mxu0 %v411_v2  ;;  %407 = vmatpush3.bf16.msra.mxu1 %v411_v2 }
   0xc   :  { %383 = vmatprep.subr.bf16.mxu0 %v412_v5  ;;  %404 = vmatprep.subr.bf16.mxu1 %v412_v5 }
   0xf   :  { %384 = vmatpush3.bf16.msra.mxu0 %v412_v5  ;;  %408 = vmatpush3.bf16.msra.mxu1 %v412_v5 }
  0x12   :  { %386 = vmatmul.mubr.msk.bf16.vlgmr.msra.gmra.mrb[0].mxu0 %vm106_vm0, %v415_v6  ;;  %394 = vmatmul.mubr.msk.bf16.vlgmr.msra.gmra.mrb[0].mxu1 %vm106_vm0, %v416_v7 }
  0x13   :  { %389 = vmatprep.mubr.msk.bf16.mxu0 %vm106_vm0, %v417_v8  ;;  %397 = vmatprep.mubr.msk.bf16.mxu1 %vm106_vm0, %v418_v9 }
  0x1a   :  { %390 = vmatmul.mubr.msk.bf16.gmra.mrb[4].mxu0 %vm106_vm0, %v419_v10  ;;  %398 = vmatmul.mubr.msk.bf16.gmra.mrb[4].mxu1 %vm106_vm0, %v420_v11 }
  0xe5   :  { %v387_v12 = vpop.f32.mrb[0].mxu0  ;;  %v395_v14 = vpop.f32.mrb[0].mxu1 }
  0xe6   :  { %vm232_vm1 = vcmp.ge.f32.partialorder %v387_v12, 0.0  ;;  %v248_v15 = vmul.f32 0.2, %v387_v12  ;;  %vm240_vm2 = vcmp.ge.f32.partialorder %v395_v14, 0.0  ;;  %v256_v16 = vmul.f32 0.2, %v395_v14 }
  0xe7   :  { %v165_v18 = vpop.f32.mrb[1].mxu0  ;;  %v197_v19 = vpop.f32.mrb[1].mxu1 }
  0xe8   :  { %v264_v20 = vsel %vm232_vm1, %v387_v12, %v248_v15  ;;  %v272_v21 = vsel %vm240_vm2, %v395_v14, %v256_v16  ;;  %vm230_vm4 = vcmp.ge.f32.partialorder %v165_v18, 0.0  ;;  %v246_v22 = vmul.f32 0.2, %v165_v18  ;;  %v388_v23 = vpop.f32.mrb[2].mxu0  ;;  %v396_v24 = vpop.f32.mrb[2].mxu1 }
  0xe9   :  { %v286_v25 = vmul.f32 %v493_v13, %v264_v20  ;;  %v294_v26 = vmul.f32 %v493_v13, %v272_v21  ;;  %vm238_vm5 = vcmp.ge.f32.partialorder %v197_v19, 0.0  ;;  %v254_v27 = vmul.f32 0.2, %v197_v19  ;;  %v168_v28 = vpop.f32.mrb[3].mxu0  ;;  %v200_v29 = vpop.f32.mrb[3].mxu1 }
  0xea   :  { %v262_v30 = vsel %vm230_vm4, %v165_v18, %v246_v22  ;;  %vm233_vm6 = vcmp.ge.f32.partialorder %v388_v23, 0.0  ;;  %v249_v31 = vmul.f32 0.2, %v388_v23  ;;  %vm241_vm7 = vcmp.ge.f32.partialorder %v396_v24, 0.0 }
  0xeb   :  { %v308_v32 = vadd.f32 %v498_v17, %v286_v25  ;;  %v316_v33 = vadd.f32 %v498_v17, %v294_v26  ;;  %v284_v34 = vmul.f32 %v493_v13, %v262_v30  ;;  %v270_v35 = vsel %vm238_vm5, %v197_v19, %v254_v27 }
  0xec   :  { %v292_v36 = vmul.f32 %v493_v13, %v270_v35  ;;  %v265_v37 = vsel %vm233_vm6, %v388_v23, %v249_v31  ;;  %v257_v38 = vmul.f32 0.2, %v396_v24  ;;  %vm231_vm8 = vcmp.ge.f32.partialorder %v168_v28, 0.0 }
  0xed   :  { %325 = vst.msk [vmem:[%s604_s4 + $0x10] sm:$0xff] %vm322_vm3, %v308_v32  ;;  %333 = vst.msk [vmem:[%s604_s4 + $0x50] sm:$0xff] %vm322_vm3, %v316_v33  ;;  %v306_v39 = vadd.f32 %v498_v17, %v284_v34  ;;  %v287_v40 = vmul.f32 %v493_v13, %v265_v37  ;;  %v247_v41 = vmul.f32 0.2, %v168_v28  ;;  %vm239_vm9 = vcmp.ge.f32.partialorder %v200_v29, 0.0  ;;  %v391_v42 = vpop.f32.mrb[4].mxu0 }
  0xee   :  { %v399_v43 = vpop.f32.mrb[4].mxu1  ;;  %v314_v44 = vadd.f32 %v498_v17, %v292_v36  ;;  %v273_v45 = vsel %vm241_vm7, %v396_v24, %v257_v38  ;;  %v255_v46 = vmul.f32 0.2, %v200_v29  ;;  %vm236_vm10 = vcmp.ge.f32.partialorder %v391_v42, 0.0  ;;  %v181_v47 = vpop.f32.mrb[5].mxu0 }
  0xef   :  { %v213_v48 = vpop.f32.mrb[5].mxu1  ;;  %323 = vst.msk [vmem:[%s604_s4] sm:$0xff] %vm322_vm3, %v306_v39  ;;  %v309_v49 = vadd.f32 %v498_v17, %v287_v40  ;;  %v295_v50 = vmul.f32 %v493_v13, %v273_v45  ;;  %v263_v51 = vsel %vm231_vm8, %v168_v28, %v247_v41  ;;  %v252_v52 = vmul.f32 0.2, %v391_v42  ;;  %v392_v53 = vpop.f32.mrb[6].mxu0 }
  0xf0   :  { %v400_v54 = vpop.f32.mrb[6].mxu1  ;;  %331 = vst.msk [vmem:[%s604_s4 + $0x40] sm:$0xff] %vm322_vm3, %v314_v44  ;;  %v285_v55 = vmul.f32 %v493_v13, %v263_v51  ;;  %v271_v56 = vsel %vm239_vm9, %v200_v29, %v255_v46  ;;  %vm244_vm11 = vcmp.ge.f32.partialorder %v399_v43, 0.0  ;;  %v260_v57 = vmul.f32 0.2, %v399_v43  ;;  %v184_v58 = vpop.f32.mrb[7].mxu0 }
  0xf1   :  { %v216_v59 = vpop.f32.mrb[7].mxu1  ;;  %326 = vst.msk [vmem:[%s604_s4 + $0x18] sm:$0xff] %vm322_vm3, %v309_v49  ;;  %v317_v60 = vadd.f32 %v498_v17, %v295_v50  ;;  %v293_v61 = vmul.f32 %v493_v13, %v271_v56  ;;  %v268_v62 = vsel %vm236_vm10, %v391_v42, %v252_v52  ;;  %vm234_vm12 = vcmp.ge.f32.partialorder %v181_v47, 0.0 }
  0xf2   :  { %v307_v63 = vadd.f32 %v498_v17, %v285_v55  ;;  %v290_v0 = vmul.f32 %v493_v13, %v268_v62  ;;  %v276_v1 = vsel %vm244_vm11, %v399_v43, %v260_v57  ;;  %v250_v2 = vmul.f32 0.2, %v181_v47 }
  0xf3   :  { %334 = vst.msk [vmem:[%s604_s4 + $0x58] sm:$0xff] %vm322_vm3, %v317_v60  ;;  %v315_v3 = vadd.f32 %v498_v17, %v293_v61  ;;  %v298_v4 = vmul.f32 %v493_v13, %v276_v1  ;;  %vm242_vm13 = vcmp.ge.f32.partialorder %v213_v48, 0.0  ;;  %v258_v5 = vmul.f32 0.2, %v213_v48 }
  0xf4   :  { %324 = vst.msk [vmem:[%s604_s4 + $0x8] sm:$0xff] %vm322_vm3, %v307_v63  ;;  %v312_v6 = vadd.f32 %v498_v17, %v290_v0  ;;  %v266_v7 = vsel %vm234_vm12, %v181_v47, %v250_v2  ;;  %vm237_vm14 = vcmp.ge.f32.partialorder %v392_v53, 0.0  ;;  %v253_v8 = vmul.f32 0.2, %v392_v53 }
  0xf5   :  { %332 = vst.msk [vmem:[%s604_s4 + $0x48] sm:$0xff] %vm322_vm3, %v315_v3  ;;  %v320_v9 = vadd.f32 %v498_v17, %v298_v4  ;;  %v288_v10 = vmul.f32 %v493_v13, %v266_v7  ;;  %v274_v11 = vsel %vm242_vm13, %v213_v48, %v258_v5  ;;  %vm245_vm15 = vcmp.ge.f32.partialorder %v400_v54, 0.0 }
  0xf6   :  { %329 = vst.msk [vmem:[%s604_s4 + $0x30] sm:$0xff] %vm322_vm3, %v312_v6  ;;  %v296_v12 = vmul.f32 %v493_v13, %v274_v11  ;;  %v269_v14 = vsel %vm237_vm14, %v392_v53, %v253_v8  ;;  %v261_v15 = vmul.f32 0.2, %v400_v54  ;;  %vm235_vm0 = vcmp.ge.f32.partialorder %v184_v58, 0.0 }
  0xf7   :  { %337 = vst.msk [vmem:[%s604_s4 + $0x70] sm:$0xff] %vm322_vm3, %v320_v9  ;;  %v310_v16 = vadd.f32 %v498_v17, %v288_v10  ;;  %v291_v18 = vmul.f32 %v493_v13, %v269_v14  ;;  %v251_v19 = vmul.f32 0.2, %v184_v58  ;;  %vm243_vm1 = vcmp.ge.f32.partialorder %v216_v59, 0.0 }
  0xf8   :  { %v318_v20 = vadd.f32 %v498_v17, %v296_v12  ;;  %v277_v21 = vsel %vm245_vm15, %v400_v54, %v261_v15  ;;  %v259_v22 = vmul.f32 0.2, %v216_v59 }
  0xf9   :  { %327 = vst.msk [vmem:[%s604_s4 + $0x20] sm:$0xff] %vm322_vm3, %v310_v16  ;;  %v313_v23 = vadd.f32 %v498_v17, %v291_v18  ;;  %v299_v24 = vmul.f32 %v493_v13, %v277_v21  ;;  %v267_v25 = vsel %vm235_vm0, %v184_v58, %v251_v19 }
  0xfa   :  { %335 = vst.msk [vmem:[%s604_s4 + $0x60] sm:$0xff] %vm322_vm3, %v318_v20  ;;  %v289_v26 = vmul.f32 %v493_v13, %v267_v25  ;;  %v275_v27 = vsel %vm243_vm1, %v216_v59, %v259_v22 }
  0xfb   :  { %330 = vst.msk [vmem:[%s604_s4 + $0x38] sm:$0xff] %vm322_vm3, %v313_v23  ;;  %v321_v28 = vadd.f32 %v498_v17, %v299_v24  ;;  %v297_v29 = vmul.f32 %v493_v13, %v275_v27 }
  0xfc   :  { %v311_v30 = vadd.f32 %v498_v17, %v289_v26 }
  0xfd   :  { %338 = vst.msk [vmem:[%s604_s4 + $0x78] sm:$0xff] %vm322_vm3, %v321_v28  ;;  %v319_v31 = vadd.f32 %v498_v17, %v297_v29 }
  0xfe   :  { %328 = vst.msk [vmem:[%s604_s4 + $0x28] sm:$0xff] %vm322_vm3, %v311_v30 }
  0xff   :  { %336 = vst.msk [vmem:[%s604_s4 + $0x68] sm:$0xff] %vm322_vm3, %v319_v31 }

// kernel: res_generator_forward.35
= control target key start
LH: loop header
LB: loop body
LE: loop exit
PB: predicated region body
PF: predicated region fallthrough
CT: control target
= control target key end

     0   :  { %s1803_s15 = smov 0   ;;  %s2130_s0 = inlined_call_operand.vmem [shape: bf16[512,392], index: 0, kind: input, shape index: {}]   ;;  %s2131_s1 = inlined_call_operand.vmem [shape: bf16[392,3], index: 1, kind: input, shape index: {}]   ;;  %s2132_s2 = inlined_call_operand.vmem [shape: f32[1,3], index: 2, kind: input, shape index: {}]   ;;  %s2133_s3 = inlined_call_operand.vmem [shape: f32[1,3], index: 3, kind: input, shape index: {}]   ;;  %s2134_s4 = inlined_call_operand.vmem [shape: f32[512,3], index: 4, kind: output, shape index: {}]  }
   0x1 LB: > { %s1343_s16 = sadd.s32 4294967295, %s1775_s15   ;;  %p1347_p0 = scmp.ge.s32.totalorder %s1775_s15, 1  ;;  %s1775_s15 = sphi %s1803_s15, %s14_s15  }
   0x2   : > { %p164_p1 = scmp.lt.s32.totalorder %s1775_s15, 3 }
   0x4   : > { %p165_p2 = pnand %p1347_p0, %p164_p1 }
   0x5   : > { %v1584_v0 = vld [vmem:[%s2131_s1 + $0x40] sm:$0xff] (!%p165_p2)   ;;  %v1777_v1 = vmov (!%p165_p2), 0   ;;  %v1587_v4 = vld [vmem:[%s2131_s1 + $0x48] sm:$0xff] (!%p165_p2)   ;;  %v1590_v7 = vld [vmem:[%s2131_s1 + $0x50] sm:$0xff] (!%p165_p2)   ;;  %s1348_s9 = sshll.u32 (!%p165_p2), %s1343_s16, 5  ;;  %vm769_vm0 = vcmask (!%p165_p2), 64512  }
   0x6   : > { %168 = sbr.rel (%p165_p2) target bundleno = 394 (0x18a), region = 36  ;;  %983 = vmatprep.subr.bf16.mxu1 (!%p165_p2), %v1777_v1  ;;  %v1585_v2 = vld [vmem:[%s2131_s1 + $0x80] sm:$0xff] (!%p165_p2)   ;;  %1463 = vmatprep.subr.bf16.mxu0 (!%p165_p2), %v1584_v0  ;;  %v1588_v5 = vld [vmem:[%s2131_s1 + $0x88] sm:$0xff] (!%p165_p2)   ;;  %v1591_v8 = vld [vmem:[%s2131_s1 + $0x90] sm:$0xff] (!%p165_p2)   ;;  %p192_p3 = scmp.lt.s32.totalorder (!%p165_p2), %s1348_s9, 63  ;;  %vm818_vm1 = vcmask (!%p165_p2), 1043456  }
   0x7   : > { %v1586_v3 = vld [vmem:[%s2131_s1] sm:$0xff] (!%p165_p2)   ;;  %984 = vmatpush1.bf16.msra.mxu1 (!%p165_p2), %v1585_v2  ;;  %v1589_v6 = vld [vmem:[%s2131_s1 + $0x8] sm:$0xff] (!%p165_p2)   ;;  %v1592_v9 = vld [vmem:[%s2131_s1 + $0x10] sm:$0xff] (!%p165_p2)   ;;  %vm1254_vm2 = vcmask (!%p165_p2), 23552  }
   0x8   : > { %1464 = vmatpush3.bf16.msra.mxu0 (!%p165_p2), %v1586_v3  ;;  %985 = vmatprep.subr.bf16.mxu1 (!%p165_p2), %v1777_v1  ;;  %v1593_v10 = vld [vmem:[%s2131_s1 + $0x58] sm:$0xff] (!%p165_p2)   ;;  %v1596_v13 = vld [vmem:[%s2131_s1 + $0x60] sm:$0xff] (!%p165_p2)   ;;  %v1599_v16 = vld [vmem:[%s2131_s1 + $0x68] sm:$0xff] (!%p165_p2)  }
   0x9   : > { %1465 = vmatprep.subr.bf16.mxu0 (!%p165_p2), %v1587_v4  ;;  %v1594_v11 = vld [vmem:[%s2131_s1 + $0x98] sm:$0xff] (!%p165_p2)   ;;  %v1597_v14 = vld [vmem:[%s2131_s1 + $0xa0] sm:$0xff] (!%p165_p2)   ;;  %v1600_v17 = vld [vmem:[%s2131_s1 + $0xa8] sm:$0xff] (!%p165_p2)  }
   0xa   : > { %v1595_v12 = vld [vmem:[%s2131_s1 + $0x18] sm:$0xff] (!%p165_p2)   ;;  %v1598_v15 = vld [vmem:[%s2131_s1 + $0x20] sm:$0xff] (!%p165_p2)   ;;  %v1601_v18 = vld [vmem:[%s2131_s1 + $0x28] sm:$0xff] (!%p165_p2)  }
   0xb   : > { %986 = vmatpush1.bf16.msra.mxu1 (!%p165_p2), %v1588_v5  ;;  %v1602_v19 = vld [vmem:[%s2131_s1 + $0x70] sm:$0xff] (!%p165_p2)   ;;  %v1605_v22 = vld [vmem:[%s2131_s1 + $0x78] sm:$0xff] (!%p165_p2)   ;;  %v1611_v27 = vld [vmem:[%s2131_s1 + $0xc0] ss:$0 sps:$4 sm:$0xff] (!%p165_p2)  }
   0xc   : > { %1466 = vmatpush3.bf16.msra.mxu0 (!%p165_p2), %v1589_v6  ;;  %987 = vmatprep.subr.bf16.mxu1 (!%p165_p2), %v1777_v1  ;;  %v1603_v20 = vld [vmem:[%s2131_s1 + $0xb0] sm:$0xff] (!%p165_p2)   ;;  %v1606_v24 = vld [vmem:[%s2131_s1 + $0xb8] sm:$0xff] (!%p165_p2)   ;;  %v820_v29 = vsel (!%p165_p2), %vm818_vm1, %v1611_v27, 0 }
   0xd   : > { %1467 = vmatprep.subr.bf16.mxu0 %v1590_v7  ;;  %s2136_s9 = smov (!%p192_p3, %s1348_s9), 63  ;;  %v1604_v21 = vld [vmem:[%s2131_s1 + $0x30] sm:$0xff]   ;;  %v1607_v26 = vld [vmem:[%s2131_s1 + $0x38] sm:$0xff]  }
   0xe   : > { %s1462_s27 = sshll.u32 %s2136_s9, 4 }
   0xf   : > { %988 = vmatpush1.bf16.msra.mxu1 %v1591_v8  ;;  %s1880_s8 = scalar_lea.vmem %s2130_s0, %s1462_s27  ;;  %s1352_s27 = sshll.u32 %s2136_s9, 3 }
  0x10   : > { %1468 = vmatpush3.bf16.msra.mxu0 %v1592_v9  ;;  %989 = vmatprep.subr.bf16.mxu1 %v1777_v1  ;;  %v1610_v23 = vld [vmem:[%s1880_s8 + $0x4] ss:$16 sps:$4 sm:$0xff]   ;;  %v1614_v25 = vld [vmem:[%s1880_s8 + $0xc] ss:$16 sps:$4 sm:$0xff]   ;;  %v1608_v28 = vld [vmem:[%s1880_s8] ss:$16 sps:$4 sm:$0xff]   ;;  %s2004_s30 = scalar_lea.vmem %s2134_s4, %s1352_s27 }
  0x11   : > { %1469 = vmatprep.subr.bf16.mxu0 %v1593_v10  ;;  %854 = vmatprep.mubr.bf16.mxu0 %v1610_v23  ;;  %v1615_v30 = vld [vmem:[%s1880_s8 + $0x24] ss:$16 sps:$4 sm:$0xff]   ;;  %v1612_v31 = vld [vmem:[%s1880_s8 + $0x8] ss:$16 sps:$4 sm:$0xff]   ;;  %v1618_v32 = vld [vmem:[%s1880_s8 + $0x2c] ss:$16 sps:$4 sm:$0xff]  }
  0x12   : > { %1442 = vmatprep.mubr.msk.bf16.mxu1 %vm769_vm0, %v1614_v25  ;;  %v1617_v33 = vld [vmem:[%s1880_s8 + $0x20] ss:$16 sps:$4 sm:$0xff]   ;;  %v1621_v34 = vld [vmem:[%s1880_s8 + $0x44] ss:$16 sps:$4 sm:$0xff]   ;;  %v1620_v35 = vld [vmem:[%s1880_s8 + $0x28] ss:$16 sps:$4 sm:$0xff]  }
  0x13   : > { %990 = vmatpush1.bf16.msra.mxu1 %v1594_v11  ;;  %v1624_v36 = vld [vmem:[%s1880_s8 + $0x4c] ss:$16 sps:$4 sm:$0xff]   ;;  %v1623_v37 = vld [vmem:[%s1880_s8 + $0x40] ss:$16 sps:$4 sm:$0xff]   ;;  %v1627_v38 = vld [vmem:[%s1880_s8 + $0x64] ss:$16 sps:$4 sm:$0xff]  }
  0x14   : > { %1470 = vmatpush3.bf16.msra.mxu0 %v1595_v12  ;;  %991 = vmatprep.subr.bf16.mxu1 %v1777_v1  ;;  %v1626_v39 = vld [vmem:[%s1880_s8 + $0x48] ss:$16 sps:$4 sm:$0xff]   ;;  %v1630_v40 = vld [vmem:[%s1880_s8 + $0x6c] ss:$16 sps:$4 sm:$0xff]   ;;  %v1629_v41 = vld [vmem:[%s1880_s8 + $0x60] ss:$16 sps:$4 sm:$0xff]  }
  0x15   : > { %1471 = vmatprep.subr.bf16.mxu0 %v1596_v13  ;;  %v1633_v42 = vld [vmem:[%s1880_s8 + $0x84] ss:$16 sps:$4 sm:$0xff]   ;;  %v1632_v43 = vld [vmem:[%s1880_s8 + $0x68] ss:$16 sps:$4 sm:$0xff]   ;;  %v1636_v44 = vld [vmem:[%s1880_s8 + $0x8c] ss:$16 sps:$4 sm:$0xff]  }
  0x16   : > { %v1635_v45 = vld [vmem:[%s1880_s8 + $0x80] ss:$16 sps:$4 sm:$0xff]   ;;  %v1639_v46 = vld [vmem:[%s1880_s8 + $0xa4] ss:$16 sps:$4 sm:$0xff]   ;;  %v1638_v47 = vld [vmem:[%s1880_s8 + $0x88] ss:$16 sps:$4 sm:$0xff]  }
  0x17   : > { %992 = vmatpush1.bf16.msra.mxu1 %v1597_v14  ;;  %v1642_v48 = vld [vmem:[%s1880_s8 + $0xac] ss:$16 sps:$4 sm:$0xff]   ;;  %v1641_v49 = vld [vmem:[%s1880_s8 + $0xa0] ss:$16 sps:$4 sm:$0xff]   ;;  %v1645_v50 = vld [vmem:[%s1880_s8 + $0xc4] ss:$16 sps:$4 sm:$0xff]  }
  0x18   : > { %1472 = vmatpush3.bf16.msra.mxu0 %v1598_v15  ;;  %993 = vmatprep.subr.bf16.mxu1 %v1777_v1  ;;  %v1644_v51 = vld [vmem:[%s1880_s8 + $0xa8] ss:$16 sps:$4 sm:$0xff]   ;;  %v1648_v52 = vld [vmem:[%s1880_s8 + $0xcc] ss:$16 sps:$4 sm:$0xff]   ;;  %v1647_v53 = vld [vmem:[%s1880_s8 + $0xc0] ss:$16 sps:$4 sm:$0xff]  }
  0x19   : > { %1473 = vmatprep.subr.bf16.mxu0 %v1599_v16  ;;  %v1651_v54 = vld [vmem:[%s1880_s8 + $0xe4] ss:$16 sps:$4 sm:$0xff]   ;;  %v1650_v55 = vld [vmem:[%s1880_s8 + $0xc8] ss:$16 sps:$4 sm:$0xff]   ;;  %v1654_v56 = vld [vmem:[%s1880_s8 + $0xec] ss:$16 sps:$4 sm:$0xff]  }
  0x1a   : > { %v1653_v57 = vld [vmem:[%s1880_s8 + $0xe0] ss:$16 sps:$4 sm:$0xff]   ;;  %v1657_v58 = vld [vmem:[%s1880_s8 + $0x104] ss:$16 sps:$4 sm:$0xff]   ;;  %v1656_v59 = vld [vmem:[%s1880_s8 + $0xe8] ss:$16 sps:$4 sm:$0xff]  }
  0x1b   : > { %994 = vmatpush1.bf16.msra.mxu1 %v1600_v17  ;;  %v1660_v60 = vld [vmem:[%s1880_s8 + $0x10c] ss:$16 sps:$4 sm:$0xff]   ;;  %v1659_v61 = vld [vmem:[%s1880_s8 + $0x100] ss:$16 sps:$4 sm:$0xff]   ;;  %v1663_v62 = vld [vmem:[%s1880_s8 + $0x124] ss:$16 sps:$4 sm:$0xff]  }
  0x1c   : > { %1474 = vmatpush3.bf16.msra.mxu0 %v1601_v18  ;;  %995 = vmatprep.subr.bf16.mxu1 %v1777_v1  ;;  %v1662_v63 = vld [vmem:[%s1880_s8 + $0x108] ss:$16 sps:$4 sm:$0xff]   ;;  %v1666_v0 = vld [vmem:[%s1880_s8 + $0x12c] ss:$16 sps:$4 sm:$0xff]   ;;  %v1669_v2 = vld [vmem:[%s1880_s8 + $0x144] ss:$16 sps:$4 sm:$0xff]  }
  0x1d   : > { %1475 = vmatprep.subr.bf16.mxu0 %v1602_v19  ;;  %v1668_v3 = vld [vmem:[%s1880_s8 + $0x128] ss:$16 sps:$4 sm:$0xff]   ;;  %v1672_v4 = vld [vmem:[%s1880_s8 + $0x14c] ss:$16 sps:$4 sm:$0xff]   ;;  %v1671_v5 = vld [vmem:[%s1880_s8 + $0x140] ss:$16 sps:$4 sm:$0xff]  }
  0x1e   : > { %v1675_v6 = vld [vmem:[%s1880_s8 + $0x164] ss:$16 sps:$4 sm:$0xff]   ;;  %v1674_v7 = vld [vmem:[%s1880_s8 + $0x148] ss:$16 sps:$4 sm:$0xff]   ;;  %v1678_v8 = vld [vmem:[%s1880_s8 + $0x16c] ss:$16 sps:$4 sm:$0xff]  }
  0x1f   : > { %996 = vmatpush1.bf16.msra.mxu1 %v1603_v20  ;;  %v1677_v9 = vld [vmem:[%s1880_s8 + $0x160] ss:$16 sps:$4 sm:$0xff]   ;;  %v1681_v10 = vld [vmem:[%s1880_s8 + $0x184] ss:$16 sps:$4 sm:$0xff]   ;;  %v1680_v11 = vld [vmem:[%s1880_s8 + $0x168] ss:$16 sps:$4 sm:$0xff]  }
  0x20   : > { %1476 = vmatpush3.bf16.msra.mxu0 %v1604_v21  ;;  %997 = vmatprep.subr.bf16.mxu1 %v1777_v1  ;;  %v1684_v12 = vld [vmem:[%s1880_s8 + $0x18c] ss:$16 sps:$4 sm:$0xff]   ;;  %v1683_v13 = vld [vmem:[%s1880_s8 + $0x180] ss:$16 sps:$4 sm:$0xff]   ;;  %v1687_v14 = vld [vmem:[%s1880_s8 + $0x1a4] ss:$16 sps:$4 sm:$0xff]  }
  0x21   : > { %1477 = vmatprep.subr.bf16.mxu0 %v1605_v22  ;;  %v1686_v15 = vld [vmem:[%s1880_s8 + $0x188] ss:$16 sps:$4 sm:$0xff]   ;;  %v1690_v16 = vld [vmem:[%s1880_s8 + $0x1ac] ss:$16 sps:$4 sm:$0xff]   ;;  %v1689_v17 = vld [vmem:[%s1880_s8 + $0x1a0] ss:$16 sps:$4 sm:$0xff]  }
  0x22   : > { %v1693_v18 = vld [vmem:[%s1880_s8 + $0x1c4] ss:$16 sps:$4 sm:$0xff]   ;;  %v1692_v19 = vld [vmem:[%s1880_s8 + $0x1a8] ss:$16 sps:$4 sm:$0xff]   ;;  %v1696_v20 = vld [vmem:[%s1880_s8 + $0x1cc] ss:$16 sps:$4 sm:$0xff]  }
  0x23   : > { %998 = vmatpush1.bf16.msra.mxu1 %v1606_v24  ;;  %v1695_v21 = vld [vmem:[%s1880_s8 + $0x1c0] ss:$16 sps:$4 sm:$0xff]   ;;  %v1699_v22 = vld [vmem:[%s1880_s8 + $0x1e4] ss:$16 sps:$4 sm:$0xff]   ;;  %v1698_v23 = vld [vmem:[%s1880_s8 + $0x1c8] ss:$16 sps:$4 sm:$0xff]  }
  0x24   : > { %1478 = vmatpush3.bf16.msra.mxu0 %v1607_v26  ;;  %999 = vmatprep.subr.bf16.mxu1 %v1777_v1  ;;  %v1665_v1 = vld [vmem:[%s1880_s8 + $0x120] ss:$16 sps:$4 sm:$0xff]   ;;  %v1702_v24 = vld [vmem:[%s1880_s8 + $0x1ec] ss:$16 sps:$4 sm:$0xff]   ;;  %v1704_v26 = vld [vmem:[%s1880_s8 + $0x1e8] ss:$16 sps:$4 sm:$0xff]  }
  0x25   : > { %v1701_v25 = vld [vmem:[%s1880_s8 + $0x1e0] ss:$16 sps:$4 sm:$0xff]  }
  0x27   : > { %855 = vmatmul.mubr.bf16.vlgmr.msra.gmra.mrb[0].mxu0 %v1608_v28  ;;  %1000 = vmatpush1.bf16.msra.mxu1 %v820_v29 }
  0x28   : > { %862 = vmatprep.mubr.bf16.mxu0 %v1615_v30 }
  0x2a   : > { %1016 = vmatmul.mubr.bf16.vlgmr.msra.gmra.mrb[0].mxu1 %v1612_v31 }
  0x2b   : > { %1443 = vmatprep.mubr.msk.bf16.mxu1 %vm769_vm0, %v1618_v32 }
  0x2f   : > { %863 = vmatmul.mubr.bf16.gmra.mrb[4].mxu0 %v1617_v33  ;;  %v1986_v33 = vld [vmem:[%s2132_s2] ss:$0 sm:$0xff] }
  0x30   : > { %870 = vmatprep.mubr.bf16.mxu0 %v1621_v34 }
  0x32   : > { %1024 = vmatmul.mubr.bf16.gmra.mrb[4].mxu1 %v1620_v35 }
  0x33   : > { %1444 = vmatprep.mubr.msk.bf16.mxu1 %vm769_vm0, %v1624_v36 }
  0x37   : > { %871 = vmatmul.mubr.bf16.gmra.mrb[8].mxu0 %v1623_v37  ;;  %v1991_v37 = vld [vmem:[%s2133_s3] ss:$0 sm:$0xff] }
  0x38   : > { %878 = vmatprep.mubr.bf16.mxu0 %v1627_v38 }
  0x3a   : > { %1032 = vmatmul.mubr.bf16.gmra.mrb[8].mxu1 %v1626_v39 }
  0x3b   : > { %1445 = vmatprep.mubr.msk.bf16.mxu1 %vm769_vm0, %v1630_v40 }
  0x3f   : > { %879 = vmatmul.mubr.bf16.gmra.mrb[12].mxu0 %v1629_v41 }
  0x40   : > { %886 = vmatprep.mubr.bf16.mxu0 %v1633_v42 }
  0x42   : > { %1040 = vmatmul.mubr.bf16.gmra.mrb[12].mxu1 %v1632_v43 }
  0x43   : > { %1446 = vmatprep.mubr.msk.bf16.mxu1 %vm769_vm0, %v1636_v44 }
  0x47   : > { %887 = vmatmul.mubr.bf16.gmra.mrb[16].mxu0 %v1635_v45 }
  0x48   : > { %894 = vmatprep.mubr.bf16.mxu0 %v1639_v46 }
  0x4a   : > { %1048 = vmatmul.mubr.bf16.gmra.mrb[16].mxu1 %v1638_v47 }
  0x4b   : > { %1447 = vmatprep.mubr.msk.bf16.mxu1 %vm769_vm0, %v1642_v48 }
  0x4f   : > { %895 = vmatmul.mubr.bf16.gmra.mrb[20].mxu0 %v1641_v49 }
  0x50   : > { %902 = vmatprep.mubr.bf16.mxu0 %v1645_v50 }
  0x52   : > { %1056 = vmatmul.mubr.bf16.gmra.mrb[20].mxu1 %v1644_v51 }
  0x53   : > { %1448 = vmatprep.mubr.msk.bf16.mxu1 %vm769_vm0, %v1648_v52 }
  0x57   : > { %903 = vmatmul.mubr.bf16.gmra.mrb[24].mxu0 %v1647_v53 }
  0x58   : > { %910 = vmatprep.mubr.bf16.mxu0 %v1651_v54 }
  0x5a   : > { %1064 = vmatmul.mubr.bf16.gmra.mrb[24].mxu1 %v1650_v55 }
  0x5b   : > { %1449 = vmatprep.mubr.msk.bf16.mxu1 %vm769_vm0, %v1654_v56 }
  0x5f   : > { %911 = vmatmul.mubr.bf16.gmra.mrb[28].mxu0 %v1653_v57 }
  0x60   : > { %918 = vmatprep.mubr.bf16.mxu0 %v1657_v58 }
  0x62   : > { %1072 = vmatmul.mubr.bf16.gmra.mrb[28].mxu1 %v1656_v59 }
  0x63   : > { %1450 = vmatprep.mubr.msk.bf16.mxu1 %vm769_vm0, %v1660_v60 }
  0x67   : > { %919 = vmatmul.mubr.bf16.gmra.mrb[32].mxu0 %v1659_v61 }
  0x68   : > { %926 = vmatprep.mubr.bf16.mxu0 %v1663_v62 }
  0x6a   : > { %1080 = vmatmul.mubr.bf16.gmra.mrb[32].mxu1 %v1662_v63 }
  0x6b   : > { %1451 = vmatprep.mubr.msk.bf16.mxu1 %vm769_vm0, %v1666_v0 }
  0x6f   : > { %927 = vmatmul.mubr.bf16.gmra.mrb[36].mxu0 %v1665_v1 }
  0x70   : > { %934 = vmatprep.mubr.bf16.mxu0 %v1669_v2 }
  0x72   : > { %1088 = vmatmul.mubr.bf16.gmra.mrb[36].mxu1 %v1668_v3 }
  0x73   : > { %1452 = vmatprep.mubr.msk.bf16.mxu1 %vm769_vm0, %v1672_v4 }
  0x77   : > { %935 = vmatmul.mubr.bf16.gmra.mrb[40].mxu0 %v1671_v5 }
  0x78   : > { %942 = vmatprep.mubr.bf16.mxu0 %v1675_v6 }
  0x7a   : > { %1096 = vmatmul.mubr.bf16.gmra.mrb[40].mxu1 %v1674_v7 }
  0x7b   : > { %1453 = vmatprep.mubr.msk.bf16.mxu1 %vm769_vm0, %v1678_v8 }
  0x7f   : > { %943 = vmatmul.mubr.bf16.gmra.mrb[44].mxu0 %v1677_v9 }
  0x80   : > { %950 = vmatprep.mubr.bf16.mxu0 %v1681_v10 }
  0x82   : > { %1104 = vmatmul.mubr.bf16.gmra.mrb[44].mxu1 %v1680_v11 }
  0x83   : > { %1454 = vmatprep.mubr.msk.bf16.mxu1 %vm769_vm0, %v1684_v12 }
  0x87   : > { %951 = vmatmul.mubr.bf16.gmra.mrb[48].mxu0 %v1683_v13 }
  0x88   : > { %958 = vmatprep.mubr.bf16.mxu0 %v1687_v14 }
  0x8a   : > { %1112 = vmatmul.mubr.bf16.gmra.mrb[48].mxu1 %v1686_v15 }
  0x8b   : > { %1455 = vmatprep.mubr.msk.bf16.mxu1 %vm769_vm0, %v1690_v16 }
  0x8f   : > { %959 = vmatmul.mubr.bf16.gmra.mrb[52].mxu0 %v1689_v17 }
  0x90   : > { %966 = vmatprep.mubr.bf16.mxu0 %v1693_v18 }
  0x92   : > { %1120 = vmatmul.mubr.bf16.gmra.mrb[52].mxu1 %v1692_v19 }
  0x93   : > { %1456 = vmatprep.mubr.msk.bf16.mxu1 %vm769_vm0, %v1696_v20 }
  0x97   : > { %967 = vmatmul.mubr.bf16.gmra.mrb[56].mxu0 %v1695_v21 }
  0x98   : > { %974 = vmatprep.mubr.bf16.mxu0 %v1699_v22 }
  0x9a   : > { %1128 = vmatmul.mubr.bf16.gmra.mrb[56].mxu1 %v1698_v23 }
  0x9b   : > { %1457 = vmatprep.mubr.msk.bf16.mxu1 %vm769_vm0, %v1702_v24 }
  0x9f   : > { %975 = vmatmul.mubr.bf16.gmra.mrb[60].mxu0 %v1701_v25 }
  0xa2   : > { %1136 = vmatmul.mubr.bf16.gmra.mrb[60].mxu1 %v1704_v26 }
  0xfa   : > { %v1479_v27 = vpop.f32.mrb[0].mxu0 }
  0xfb   : > { %v1480_v28 = vpop.f32.mrb[1].mxu0 }
  0xfc   : > { %v1481_v29 = vadd.f32 %v1480_v28, %v1479_v27  ;;  %v1482_v30 = vpop.f32.mrb[2].mxu0 }
  0xfd   : > { %v1483_v31 = vpop.f32.mrb[3].mxu0  ;;  %v1017_v32 = vpop.f32.mrb[0].mxu1 }
  0xfe   : > { %v1484_v34 = vadd.f32 %v1483_v31, %v1482_v30  ;;  %v1018_v35 = vadd.f32 %v1481_v29, %v1017_v32  ;;  %v1019_v36 = vpop.f32.mrb[1].mxu1 }
  0xff   : > { %v1020_v38 = vpop.f32.mrb[2].mxu1 }
 0x100   : > { %v1152_v39 = vmul.f32 %v1986_v33, %v1018_v35  ;;  %v1021_v40 = vadd.f32 %v1484_v34, %v1020_v38  ;;  %v1022_v41 = vpop.f32.mrb[3].mxu1 }
 0x102   : > { %v1190_v42 = vadd.f32 %v1991_v37, %v1152_v39  ;;  %v1153_v43 = vmul.f32 %v1986_v33, %v1021_v40  ;;  %v1485_v44 = vpop.f32.mrb[4].mxu0 }
 0x103   : > { %v1486_v45 = vpop.f32.mrb[5].mxu0 }
 0x104   : > { %1705 = vtanh.f32 %v1190_v42  ;;  %v1191_v46 = vadd.f32 %v1991_v37, %v1153_v43  ;;  %v1487_v47 = vadd.f32 %v1486_v45, %v1485_v44  ;;  %v1488_v48 = vpop.f32.mrb[6].mxu0 }
 0x105   : > { %v1489_v49 = vpop.f32.mrb[7].mxu0  ;;  %v1025_v50 = vpop.f32.mrb[4].mxu1 }
 0x106   : > { %1707 = vtanh.f32 %v1191_v46  ;;  %v1490_v51 = vadd.f32 %v1489_v49, %v1488_v48  ;;  %v1026_v52 = vadd.f32 %v1487_v47, %v1025_v50  ;;  %v1027_v53 = vpop.f32.mrb[5].mxu1 }
 0x107   : > { %v1028_v54 = vpop.f32.mrb[6].mxu1 }
 0x108   : > { %v1154_v55 = vmul.f32 %v1986_v33, %v1026_v52  ;;  %v1029_v56 = vadd.f32 %v1490_v51, %v1028_v54  ;;  %v1030_v57 = vpop.f32.mrb[7].mxu1 }
 0x10a   : > { %v1192_v58 = vadd.f32 %v1991_v37, %v1154_v55  ;;  %v1155_v59 = vmul.f32 %v1986_v33, %v1029_v56  ;;  %v1491_v60 = vpop.f32.mrb[8].mxu0 }
 0x10b   : > { %v1492_v61 = vpop.f32.mrb[9].mxu0 }
 0x10c   : > { %1709 = vtanh.f32 %v1192_v58  ;;  %v1193_v62 = vadd.f32 %v1991_v37, %v1155_v59  ;;  %v1493_v63 = vadd.f32 %v1492_v61, %v1491_v60  ;;  %v1494_v0 = vpop.f32.mrb[10].mxu0 }
 0x10d   : > { %v1495_v1 = vpop.f32.mrb[11].mxu0  ;;  %v1033_v2 = vpop.f32.mrb[8].mxu1 }
 0x10e   : > { %v1706_v3 = vpop.eup %1705  ;;  %1711 = vtanh.f32 %v1193_v62  ;;  %v1496_v4 = vadd.f32 %v1495_v1, %v1494_v0  ;;  %v1034_v5 = vadd.f32 %v1493_v63, %v1033_v2  ;;  %v1035_v6 = vpop.f32.mrb[9].mxu1 }
 0x10f   : > { %1255 = vst.msk [vmem:[%s2004_s30] sm:$0xff] %vm1254_vm2, %v1706_v3  ;;  %v1036_v7 = vpop.f32.mrb[10].mxu1 }
 0x110   : > { %v1708_v8 = vpop.eup %1707  ;;  %v1156_v9 = vmul.f32 %v1986_v33, %v1034_v5  ;;  %v1037_v10 = vadd.f32 %v1496_v4, %v1036_v7  ;;  %v1038_v11 = vpop.f32.mrb[11].mxu1 }
 0x111   : > { %1256 = vst.msk [vmem:[%s2004_s30 + $0x8] sm:$0xff] %vm1254_vm2, %v1708_v8 }
 0x112   : > { %v1194_v12 = vadd.f32 %v1991_v37, %v1156_v9  ;;  %v1157_v13 = vmul.f32 %v1986_v33, %v1037_v10  ;;  %v1497_v14 = vpop.f32.mrb[12].mxu0 }
 0x113   : > { %v1498_v15 = vpop.f32.mrb[13].mxu0 }
 0x114   : > { %1713 = vtanh.f32 %v1194_v12  ;;  %v1195_v16 = vadd.f32 %v1991_v37, %v1157_v13  ;;  %v1499_v17 = vadd.f32 %v1498_v15, %v1497_v14  ;;  %v1500_v18 = vpop.f32.mrb[14].mxu0 }
 0x115   : > { %v1501_v19 = vpop.f32.mrb[15].mxu0  ;;  %v1041_v20 = vpop.f32.mrb[12].mxu1 }
 0x116   : > { %v1710_v21 = vpop.eup %1709  ;;  %1715 = vtanh.f32 %v1195_v16  ;;  %v1502_v22 = vadd.f32 %v1501_v19, %v1500_v18  ;;  %v1042_v23 = vadd.f32 %v1499_v17, %v1041_v20  ;;  %v1043_v24 = vpop.f32.mrb[13].mxu1 }
 0x117   : > { %1257 = vst.msk [vmem:[%s2004_s30 + $0x10] sm:$0xff] %vm1254_vm2, %v1710_v21  ;;  %v1044_v25 = vpop.f32.mrb[14].mxu1 }
 0x118   : > { %v1712_v26 = vpop.eup %1711  ;;  %v1158_v27 = vmul.f32 %v1986_v33, %v1042_v23  ;;  %v1045_v28 = vadd.f32 %v1502_v22, %v1044_v25  ;;  %v1046_v29 = vpop.f32.mrb[15].mxu1 }
 0x119   : > { %1258 = vst.msk [vmem:[%s2004_s30 + $0x18] sm:$0xff] %vm1254_vm2, %v1712_v26 }
 0x11a   : > { %v1196_v30 = vadd.f32 %v1991_v37, %v1158_v27  ;;  %v1159_v31 = vmul.f32 %v1986_v33, %v1045_v28  ;;  %v1503_v32 = vpop.f32.mrb[16].mxu0 }
 0x11b   : > { %v1504_v34 = vpop.f32.mrb[17].mxu0 }
 0x11c   : > { %1717 = vtanh.f32 %v1196_v30  ;;  %v1197_v35 = vadd.f32 %v1991_v37, %v1159_v31  ;;  %v1505_v36 = vadd.f32 %v1504_v34, %v1503_v32  ;;  %v1506_v38 = vpop.f32.mrb[18].mxu0 }
 0x11d   : > { %v1507_v39 = vpop.f32.mrb[19].mxu0  ;;  %v1049_v40 = vpop.f32.mrb[16].mxu1 }
 0x11e   : > { %v1714_v41 = vpop.eup %1713  ;;  %1719 = vtanh.f32 %v1197_v35  ;;  %v1508_v42 = vadd.f32 %v1507_v39, %v1506_v38  ;;  %v1050_v43 = vadd.f32 %v1505_v36, %v1049_v40  ;;  %v1051_v44 = vpop.f32.mrb[17].mxu1 }
 0x11f   : > { %1259 = vst.msk [vmem:[%s2004_s30 + $0x20] sm:$0xff] %vm1254_vm2, %v1714_v41  ;;  %v1052_v45 = vpop.f32.mrb[18].mxu1 }
 0x120   : > { %v1716_v46 = vpop.eup %1715  ;;  %v1160_v47 = vmul.f32 %v1986_v33, %v1050_v43  ;;  %v1053_v48 = vadd.f32 %v1508_v42, %v1052_v45  ;;  %v1054_v49 = vpop.f32.mrb[19].mxu1 }
 0x121   : > { %1260 = vst.msk [vmem:[%s2004_s30 + $0x28] sm:$0xff] %vm1254_vm2, %v1716_v46 }
 0x122   : > { %v1198_v50 = vadd.f32 %v1991_v37, %v1160_v47  ;;  %v1161_v51 = vmul.f32 %v1986_v33, %v1053_v48  ;;  %v1509_v52 = vpop.f32.mrb[20].mxu0 }
 0x123   : > { %v1510_v53 = vpop.f32.mrb[21].mxu0 }
 0x124   : > { %1721 = vtanh.f32 %v1198_v50  ;;  %v1199_v54 = vadd.f32 %v1991_v37, %v1161_v51  ;;  %v1511_v55 = vadd.f32 %v1510_v53, %v1509_v52  ;;  %v1512_v56 = vpop.f32.mrb[22].mxu0 }
 0x125   : > { %v1513_v57 = vpop.f32.mrb[23].mxu0  ;;  %v1057_v58 = vpop.f32.mrb[20].mxu1 }
 0x126   : > { %v1718_v59 = vpop.eup %1717  ;;  %1723 = vtanh.f32 %v1199_v54  ;;  %v1514_v60 = vadd.f32 %v1513_v57, %v1512_v56  ;;  %v1058_v61 = vadd.f32 %v1511_v55, %v1057_v58  ;;  %v1059_v62 = vpop.f32.mrb[21].mxu1 }
 0x127   : > { %1261 = vst.msk [vmem:[%s2004_s30 + $0x30] sm:$0xff] %vm1254_vm2, %v1718_v59  ;;  %v1060_v63 = vpop.f32.mrb[22].mxu1 }
 0x128   : > { %v1720_v0 = vpop.eup %1719  ;;  %v1162_v1 = vmul.f32 %v1986_v33, %v1058_v61  ;;  %v1061_v2 = vadd.f32 %v1514_v60, %v1060_v63  ;;  %v1062_v3 = vpop.f32.mrb[23].mxu1 }
 0x129   : > { %1262 = vst.msk [vmem:[%s2004_s30 + $0x38] sm:$0xff] %vm1254_vm2, %v1720_v0 }
 0x12a   : > { %v1200_v4 = vadd.f32 %v1991_v37, %v1162_v1  ;;  %v1163_v5 = vmul.f32 %v1986_v33, %v1061_v2  ;;  %v1515_v6 = vpop.f32.mrb[24].mxu0 }
 0x12b   : > { %v1516_v7 = vpop.f32.mrb[25].mxu0 }
 0x12c   : > { %1725 = vtanh.f32 %v1200_v4  ;;  %v1201_v8 = vadd.f32 %v1991_v37, %v1163_v5  ;;  %v1517_v9 = vadd.f32 %v1516_v7, %v1515_v6  ;;  %v1518_v10 = vpop.f32.mrb[26].mxu0 }
 0x12d   : > { %v1519_v11 = vpop.f32.mrb[27].mxu0  ;;  %v1065_v12 = vpop.f32.mrb[24].mxu1 }
 0x12e   : > { %v1722_v13 = vpop.eup %1721  ;;  %1727 = vtanh.f32 %v1201_v8  ;;  %v1520_v14 = vadd.f32 %v1519_v11, %v1518_v10  ;;  %v1066_v15 = vadd.f32 %v1517_v9, %v1065_v12  ;;  %v1067_v16 = vpop.f32.mrb[25].mxu1 }
 0x12f   : > { %1263 = vst.msk [vmem:[%s2004_s30 + $0x40] sm:$0xff] %vm1254_vm2, %v1722_v13  ;;  %v1068_v17 = vpop.f32.mrb[26].mxu1 }
 0x130   : > { %v1724_v18 = vpop.eup %1723  ;;  %v1164_v19 = vmul.f32 %v1986_v33, %v1066_v15  ;;  %v1069_v20 = vadd.f32 %v1520_v14, %v1068_v17  ;;  %v1070_v21 = vpop.f32.mrb[27].mxu1 }
 0x131   : > { %1264 = vst.msk [vmem:[%s2004_s30 + $0x48] sm:$0xff] %vm1254_vm2, %v1724_v18 }
 0x132   : > { %v1202_v22 = vadd.f32 %v1991_v37, %v1164_v19  ;;  %v1165_v23 = vmul.f32 %v1986_v33, %v1069_v20  ;;  %v1521_v24 = vpop.f32.mrb[28].mxu0 }
 0x133   : > { %v1522_v25 = vpop.f32.mrb[29].mxu0 }
 0x134   : > { %1729 = vtanh.f32 %v1202_v22  ;;  %v1203_v26 = vadd.f32 %v1991_v37, %v1165_v23  ;;  %v1523_v27 = vadd.f32 %v1522_v25, %v1521_v24  ;;  %v1524_v28 = vpop.f32.mrb[30].mxu0 }
 0x135   : > { %v1525_v29 = vpop.f32.mrb[31].mxu0  ;;  %v1073_v30 = vpop.f32.mrb[28].mxu1 }
 0x136   : > { %v1726_v31 = vpop.eup %1725  ;;  %1731 = vtanh.f32 %v1203_v26  ;;  %v1526_v32 = vadd.f32 %v1525_v29, %v1524_v28  ;;  %v1074_v34 = vadd.f32 %v1523_v27, %v1073_v30  ;;  %v1075_v35 = vpop.f32.mrb[29].mxu1 }
 0x137   : > { %1265 = vst.msk [vmem:[%s2004_s30 + $0x50] sm:$0xff] %vm1254_vm2, %v1726_v31  ;;  %v1076_v36 = vpop.f32.mrb[30].mxu1 }
 0x138   : > { %v1728_v38 = vpop.eup %1727  ;;  %v1166_v39 = vmul.f32 %v1986_v33, %v1074_v34  ;;  %v1077_v40 = vadd.f32 %v1526_v32, %v1076_v36  ;;  %v1078_v41 = vpop.f32.mrb[31].mxu1 }
 0x139   : > { %1266 = vst.msk [vmem:[%s2004_s30 + $0x58] sm:$0xff] %vm1254_vm2, %v1728_v38 }
 0x13a   : > { %v1204_v42 = vadd.f32 %v1991_v37, %v1166_v39  ;;  %v1167_v43 = vmul.f32 %v1986_v33, %v1077_v40  ;;  %v1527_v44 = vpop.f32.mrb[32].mxu0 }
 0x13b   : > { %v1528_v45 = vpop.f32.mrb[33].mxu0 }
 0x13c   : > { %1733 = vtanh.f32 %v1204_v42  ;;  %v1205_v46 = vadd.f32 %v1991_v37, %v1167_v43  ;;  %v1529_v47 = vadd.f32 %v1528_v45, %v1527_v44  ;;  %v1530_v48 = vpop.f32.mrb[34].mxu0 }
 0x13d   : > { %v1531_v49 = vpop.f32.mrb[35].mxu0  ;;  %v1081_v50 = vpop.f32.mrb[32].mxu1 }
 0x13e   : > { %v1730_v51 = vpop.eup %1729  ;;  %1735 = vtanh.f32 %v1205_v46  ;;  %v1532_v52 = vadd.f32 %v1531_v49, %v1530_v48  ;;  %v1082_v53 = vadd.f32 %v1529_v47, %v1081_v50  ;;  %v1083_v54 = vpop.f32.mrb[33].mxu1 }
 0x13f   : > { %1267 = vst.msk [vmem:[%s2004_s30 + $0x60] sm:$0xff] %vm1254_vm2, %v1730_v51  ;;  %v1084_v55 = vpop.f32.mrb[34].mxu1 }
 0x140   : > { %v1732_v56 = vpop.eup %1731  ;;  %v1168_v57 = vmul.f32 %v1986_v33, %v1082_v53  ;;  %v1085_v58 = vadd.f32 %v1532_v52, %v1084_v55  ;;  %v1086_v59 = vpop.f32.mrb[35].mxu1 }
 0x141   : > { %1268 = vst.msk [vmem:[%s2004_s30 + $0x68] sm:$0xff] %vm1254_vm2, %v1732_v56 }
 0x142   : > { %v1206_v60 = vadd.f32 %v1991_v37, %v1168_v57  ;;  %v1169_v61 = vmul.f32 %v1986_v33, %v1085_v58  ;;  %v1533_v62 = vpop.f32.mrb[36].mxu0 }
 0x143   : > { %v1534_v63 = vpop.f32.mrb[37].mxu0 }
 0x144   : > { %1737 = vtanh.f32 %v1206_v60  ;;  %v1207_v0 = vadd.f32 %v1991_v37, %v1169_v61  ;;  %v1535_v1 = vadd.f32 %v1534_v63, %v1533_v62  ;;  %v1536_v2 = vpop.f32.mrb[38].mxu0 }
 0x145   : > { %v1537_v3 = vpop.f32.mrb[39].mxu0  ;;  %v1089_v4 = vpop.f32.mrb[36].mxu1 }
 0x146   : > { %v1734_v5 = vpop.eup %1733  ;;  %1739 = vtanh.f32 %v1207_v0  ;;  %v1538_v6 = vadd.f32 %v1537_v3, %v1536_v2  ;;  %v1090_v7 = vadd.f32 %v1535_v1, %v1089_v4  ;;  %v1091_v8 = vpop.f32.mrb[37].mxu1 }
 0x147   : > { %1269 = vst.msk [vmem:[%s2004_s30 + $0x70] sm:$0xff] %vm1254_vm2, %v1734_v5  ;;  %v1092_v9 = vpop.f32.mrb[38].mxu1 }
 0x148   : > { %v1736_v10 = vpop.eup %1735  ;;  %v1170_v11 = vmul.f32 %v1986_v33, %v1090_v7  ;;  %v1093_v12 = vadd.f32 %v1538_v6, %v1092_v9  ;;  %v1094_v13 = vpop.f32.mrb[39].mxu1 }
 0x149   : > { %1270 = vst.msk [vmem:[%s2004_s30 + $0x78] sm:$0xff] %vm1254_vm2, %v1736_v10 }
 0x14a   : > { %v1208_v14 = vadd.f32 %v1991_v37, %v1170_v11  ;;  %v1171_v15 = vmul.f32 %v1986_v33, %v1093_v12  ;;  %v1539_v16 = vpop.f32.mrb[40].mxu0 }
 0x14b   : > { %v1540_v17 = vpop.f32.mrb[41].mxu0 }
 0x14c   : > { %1741 = vtanh.f32 %v1208_v14  ;;  %v1209_v18 = vadd.f32 %v1991_v37, %v1171_v15  ;;  %v1541_v19 = vadd.f32 %v1540_v17, %v1539_v16  ;;  %v1542_v20 = vpop.f32.mrb[42].mxu0 }
 0x14d   : > { %v1543_v21 = vpop.f32.mrb[43].mxu0  ;;  %v1097_v22 = vpop.f32.mrb[40].mxu1 }
 0x14e   : > { %v1738_v23 = vpop.eup %1737  ;;  %1743 = vtanh.f32 %v1209_v18  ;;  %v1544_v24 = vadd.f32 %v1543_v21, %v1542_v20  ;;  %v1098_v25 = vadd.f32 %v1541_v19, %v1097_v22  ;;  %v1099_v26 = vpop.f32.mrb[41].mxu1 }
 0x14f   : > { %1271 = vst.msk [vmem:[%s2004_s30 + $0x80] sm:$0xff] %vm1254_vm2, %v1738_v23  ;;  %v1100_v27 = vpop.f32.mrb[42].mxu1 }
 0x150   : > { %v1740_v28 = vpop.eup %1739  ;;  %v1172_v29 = vmul.f32 %v1986_v33, %v1098_v25  ;;  %v1101_v30 = vadd.f32 %v1544_v24, %v1100_v27  ;;  %v1102_v31 = vpop.f32.mrb[43].mxu1 }
 0x151   : > { %1272 = vst.msk [vmem:[%s2004_s30 + $0x88] sm:$0xff] %vm1254_vm2, %v1740_v28 }
 0x152   : > { %v1210_v32 = vadd.f32 %v1991_v37, %v1172_v29  ;;  %v1173_v34 = vmul.f32 %v1986_v33, %v1101_v30  ;;  %v1545_v35 = vpop.f32.mrb[44].mxu0 }
 0x153   : > { %v1546_v36 = vpop.f32.mrb[45].mxu0 }
 0x154   : > { %1745 = vtanh.f32 %v1210_v32  ;;  %v1211_v38 = vadd.f32 %v1991_v37, %v1173_v34  ;;  %v1547_v39 = vadd.f32 %v1546_v36, %v1545_v35  ;;  %v1548_v40 = vpop.f32.mrb[46].mxu0 }
 0x155   : > { %v1549_v41 = vpop.f32.mrb[47].mxu0  ;;  %v1105_v42 = vpop.f32.mrb[44].mxu1 }
 0x156   : > { %v1742_v43 = vpop.eup %1741  ;;  %1747 = vtanh.f32 %v1211_v38  ;;  %v1550_v44 = vadd.f32 %v1549_v41, %v1548_v40  ;;  %v1106_v45 = vadd.f32 %v1547_v39, %v1105_v42  ;;  %v1107_v46 = vpop.f32.mrb[45].mxu1 }
 0x157   : > { %1273 = vst.msk [vmem:[%s2004_s30 + $0x90] sm:$0xff] %vm1254_vm2, %v1742_v43  ;;  %v1108_v47 = vpop.f32.mrb[46].mxu1 }
 0x158   : > { %v1744_v48 = vpop.eup %1743  ;;  %v1174_v49 = vmul.f32 %v1986_v33, %v1106_v45  ;;  %v1109_v50 = vadd.f32 %v1550_v44, %v1108_v47  ;;  %v1110_v51 = vpop.f32.mrb[47].mxu1 }
 0x159   : > { %1274 = vst.msk [vmem:[%s2004_s30 + $0x98] sm:$0xff] %vm1254_vm2, %v1744_v48 }
 0x15a   : > { %v1212_v52 = vadd.f32 %v1991_v37, %v1174_v49  ;;  %v1175_v53 = vmul.f32 %v1986_v33, %v1109_v50  ;;  %v1551_v54 = vpop.f32.mrb[48].mxu0 }
 0x15b   : > { %v1552_v55 = vpop.f32.mrb[49].mxu0 }
 0x15c   : > { %1749 = vtanh.f32 %v1212_v52  ;;  %v1213_v56 = vadd.f32 %v1991_v37, %v1175_v53  ;;  %v1553_v57 = vadd.f32 %v1552_v55, %v1551_v54  ;;  %v1554_v58 = vpop.f32.mrb[50].mxu0 }
 0x15d   : > { %v1555_v59 = vpop.f32.mrb[51].mxu0  ;;  %v1113_v60 = vpop.f32.mrb[48].mxu1 }
 0x15e   : > { %v1746_v61 = vpop.eup %1745  ;;  %1751 = vtanh.f32 %v1213_v56  ;;  %v1556_v62 = vadd.f32 %v1555_v59, %v1554_v58  ;;  %v1114_v63 = vadd.f32 %v1553_v57, %v1113_v60  ;;  %v1115_v0 = vpop.f32.mrb[49].mxu1 }
 0x15f   : > { %1275 = vst.msk [vmem:[%s2004_s30 + $0xa0] sm:$0xff] %vm1254_vm2, %v1746_v61  ;;  %v1116_v1 = vpop.f32.mrb[50].mxu1 }
 0x160   : > { %v1748_v2 = vpop.eup %1747  ;;  %v1176_v3 = vmul.f32 %v1986_v33, %v1114_v63  ;;  %v1117_v4 = vadd.f32 %v1556_v62, %v1116_v1  ;;  %v1118_v5 = vpop.f32.mrb[51].mxu1 }
 0x161   : > { %1276 = vst.msk [vmem:[%s2004_s30 + $0xa8] sm:$0xff] %vm1254_vm2, %v1748_v2 }
 0x162   : > { %v1214_v6 = vadd.f32 %v1991_v37, %v1176_v3  ;;  %v1177_v7 = vmul.f32 %v1986_v33, %v1117_v4  ;;  %v1557_v8 = vpop.f32.mrb[52].mxu0 }
 0x163   : > { %v1558_v9 = vpop.f32.mrb[53].mxu0 }
 0x164   : > { %1753 = vtanh.f32 %v1214_v6  ;;  %v1215_v10 = vadd.f32 %v1991_v37, %v1177_v7  ;;  %v1559_v11 = vadd.f32 %v1558_v9, %v1557_v8  ;;  %v1560_v12 = vpop.f32.mrb[54].mxu0 }
 0x165   : > { %v1561_v13 = vpop.f32.mrb[55].mxu0  ;;  %v1121_v14 = vpop.f32.mrb[52].mxu1 }
 0x166   : > { %v1750_v15 = vpop.eup %1749  ;;  %1755 = vtanh.f32 %v1215_v10  ;;  %v1562_v16 = vadd.f32 %v1561_v13, %v1560_v12  ;;  %v1122_v17 = vadd.f32 %v1559_v11, %v1121_v14  ;;  %v1123_v18 = vpop.f32.mrb[53].mxu1 }
 0x167   : > { %1277 = vst.msk [vmem:[%s2004_s30 + $0xb0] sm:$0xff] %vm1254_vm2, %v1750_v15  ;;  %v1124_v19 = vpop.f32.mrb[54].mxu1 }
 0x168   : > { %v1752_v20 = vpop.eup %1751  ;;  %v1178_v21 = vmul.f32 %v1986_v33, %v1122_v17  ;;  %v1125_v22 = vadd.f32 %v1562_v16, %v1124_v19  ;;  %v1126_v23 = vpop.f32.mrb[55].mxu1 }
 0x169   : > { %1278 = vst.msk [vmem:[%s2004_s30 + $0xb8] sm:$0xff] %vm1254_vm2, %v1752_v20 }
 0x16a   : > { %v1216_v24 = vadd.f32 %v1991_v37, %v1178_v21  ;;  %v1179_v25 = vmul.f32 %v1986_v33, %v1125_v22  ;;  %v1563_v26 = vpop.f32.mrb[56].mxu0 }
 0x16b   : > { %v1564_v27 = vpop.f32.mrb[57].mxu0 }
 0x16c   : > { %1757 = vtanh.f32 %v1216_v24  ;;  %v1217_v28 = vadd.f32 %v1991_v37, %v1179_v25  ;;  %v1565_v29 = vadd.f32 %v1564_v27, %v1563_v26  ;;  %v1566_v30 = vpop.f32.mrb[58].mxu0 }
 0x16d   : > { %v1567_v31 = vpop.f32.mrb[59].mxu0  ;;  %v1129_v32 = vpop.f32.mrb[56].mxu1 }
 0x16e   : > { %v1754_v34 = vpop.eup %1753  ;;  %1759 = vtanh.f32 %v1217_v28  ;;  %v1568_v35 = vadd.f32 %v1567_v31, %v1566_v30  ;;  %v1130_v36 = vadd.f32 %v1565_v29, %v1129_v32  ;;  %v1131_v38 = vpop.f32.mrb[57].mxu1 }
 0x16f   : > { %1279 = vst.msk [vmem:[%s2004_s30 + $0xc0] sm:$0xff] %vm1254_vm2, %v1754_v34  ;;  %v1132_v39 = vpop.f32.mrb[58].mxu1 }
 0x170   : > { %v1756_v40 = vpop.eup %1755  ;;  %v1180_v41 = vmul.f32 %v1986_v33, %v1130_v36  ;;  %v1133_v42 = vadd.f32 %v1568_v35, %v1132_v39  ;;  %v1134_v43 = vpop.f32.mrb[59].mxu1 }
 0x171   : > { %1280 = vst.msk [vmem:[%s2004_s30 + $0xc8] sm:$0xff] %vm1254_vm2, %v1756_v40 }
 0x172   : > { %v1218_v44 = vadd.f32 %v1991_v37, %v1180_v41  ;;  %v1181_v45 = vmul.f32 %v1986_v33, %v1133_v42  ;;  %v1569_v46 = vpop.f32.mrb[60].mxu0 }
 0x173   : > { %v1570_v47 = vpop.f32.mrb[61].mxu0 }
 0x174   : > { %1761 = vtanh.f32 %v1218_v44  ;;  %v1219_v48 = vadd.f32 %v1991_v37, %v1181_v45  ;;  %v1571_v49 = vadd.f32 %v1570_v47, %v1569_v46  ;;  %v1572_v50 = vpop.f32.mrb[62].mxu0 }
 0x175   : > { %v1573_v51 = vpop.f32.mrb[63].mxu0  ;;  %v1137_v52 = vpop.f32.mrb[60].mxu1 }
 0x176   : > { %v1758_v53 = vpop.eup %1757  ;;  %1763 = vtanh.f32 %v1219_v48  ;;  %v1574_v54 = vadd.f32 %v1573_v51, %v1572_v50  ;;  %v1138_v55 = vadd.f32 %v1571_v49, %v1137_v52  ;;  %v1139_v56 = vpop.f32.mrb[61].mxu1 }
 0x177   : > { %1281 = vst.msk [vmem:[%s2004_s30 + $0xd0] sm:$0xff] %vm1254_vm2, %v1758_v53  ;;  %v1140_v57 = vpop.f32.mrb[62].mxu1 }
 0x178   : > { %v1760_v58 = vpop.eup %1759  ;;  %v1182_v59 = vmul.f32 %v1986_v33, %v1138_v55  ;;  %v1141_v60 = vadd.f32 %v1574_v54, %v1140_v57  ;;  %v1142_v61 = vpop.f32.mrb[63].mxu1 }
 0x179   : > { %1282 = vst.msk [vmem:[%s2004_s30 + $0xd8] sm:$0xff] %vm1254_vm2, %v1760_v58 }
 0x17a   : > { %v1220_v62 = vadd.f32 %v1991_v37, %v1182_v59  ;;  %v1183_v63 = vmul.f32 %v1986_v33, %v1141_v60 }
 0x17c   : > { %1765 = vtanh.f32 %v1220_v62  ;;  %v1221_v0 = vadd.f32 %v1991_v37, %v1183_v63 }
 0x17e   : > { %v1762_v1 = vpop.eup %1761  ;;  %1767 = vtanh.f32 %v1221_v0 }
 0x17f   : > { %1283 = vst.msk [vmem:[%s2004_s30 + $0xe0] sm:$0xff] %vm1254_vm2, %v1762_v1 }
 0x180   : > { %v1764_v2 = vpop.eup %1763 }
 0x181   : > { %1284 = vst.msk [vmem:[%s2004_s30 + $0xe8] sm:$0xff] %vm1254_vm2, %v1764_v2 }
 0x186   : > { %v1766_v3 = vpop.eup %1765 }
 0x187   : > { %1285 = vst.msk [vmem:[%s2004_s30 + $0xf0] sm:$0xff] %vm1254_vm2, %v1766_v3 }
 0x188   : > { %v1768_v4 = vpop.eup %1767 }
 0x189   : > { %1286 = vst.msk [vmem:[%s2004_s30 + $0xf8] sm:$0xff] %vm1254_vm2, %v1768_v4 }
 0x18a PF: > { %s14_s15 = sadd.s32 1, %s1775_s15  }
 0x18b   : > { %p11_p4 = scmp.ge.s32.totalorder %s14_s15, 4  }
 0x18d   :  { %13 = sbr.rel (!%p11_p4) target bundleno = 1 (0x1), region = 66 }

</bundles_post_ra>
